<compile_context>
chip_gen: v7x
topology: tpu7x:2x2x1
jax: 0.10.0
libtpu: 0.0.40
codegen_flags: <defaults>
</compile_context>

<pallas_src>
import functools

import jax
import jax.numpy as jnp
from jax.experimental import pallas as pl
from jax.experimental.pallas import tpu as pltpu


# ----------------------------- tiling helper -----------------------------

def _tile(dim, pref, align):
    """Largest tile <= pref that divides dim and is a multiple of `align`; else the full dim."""
    if dim <= pref:
        return dim
    t = (pref // align) * align
    while t >= align:
        if dim % t == 0:
            return t
        t -= align
    return dim


# ----------------------------- tiled matmul (stacked weights, fused bias/act) -----------------------------

def _matmul_kernel(x_ref, w_ref, b_ref, o_ref, acc_ref, *, act):
    @pl.when(pl.program_id(3) == 0)
    def _init():
        acc_ref[...] = jnp.zeros_like(acc_ref)

    acc_ref[...] += jnp.dot(x_ref[...], w_ref[0], preferred_element_type=jnp.float32)

    @pl.when(pl.program_id(3) == pl.num_programs(3) - 1)
    def _finalize():
        y = acc_ref[...] + b_ref[0].astype(jnp.float32)
        if act == "tanh":
            y = jnp.tanh(y)
        elif act == "gelu":
            # TODO(synk): HF RoBERTa uses exact erf-GELU; tanh-approximate GELU used here.
            y = jax.nn.gelu(y, approximate=True)
        o_ref[0] = y.astype(o_ref.dtype)


def matmul(x, w, b, act="none", out_dtype=jnp.bfloat16, tm=256, tn=256, tk=512):
    """x: [M, K]; w: [G, K, N]; b: [G, 1, N] -> [G, M, N] = act(x @ w[g] + b[g])."""
    M, K = x.shape
    G, _, N = w.shape
    tm = _tile(M, tm, 8)
    tn = _tile(N, tn, 128)
    tk = _tile(K, tk, 128)
    grid = (G, M // tm, N // tn, K // tk)
    return pl.pallas_call(
        functools.partial(_matmul_kernel, act=act),
        out_shape=jax.ShapeDtypeStruct((G, M, N), out_dtype),
        grid=grid,
        in_specs=[
            pl.BlockSpec((tm, tk), lambda g, i, n, k: (i, k)),
            pl.BlockSpec((1, tk, tn), lambda g, i, n, k: (g, k, n)),
            pl.BlockSpec((1, 1, tn), lambda g, i, n, k: (g, 0, n)),
        ],
        out_specs=pl.BlockSpec((1, tm, tn), lambda g, i, n, k: (g, i, n)),
        scratch_shapes=[pltpu.VMEM((tm, tn), jnp.float32)],
        compiler_params=pltpu.CompilerParams(
            dimension_semantics=("parallel", "parallel", "parallel", "arbitrary")),
    )(x, w, b)


# ----------------------------- matmul + residual-add + LayerNorm epilogue -----------------------------

def _matmul_res_ln_kernel(x_ref, w_ref, b_ref, r_ref, g_ref, be_ref, o_ref, acc_ref, *, eps):
    @pl.when(pl.program_id(1) == 0)
    def _init():
        acc_ref[...] = jnp.zeros_like(acc_ref)

    acc_ref[...] += jnp.dot(x_ref[...], w_ref[...], preferred_element_type=jnp.float32)

    @pl.when(pl.program_id(1) == pl.num_programs(1) - 1)
    def _finalize():
        h = acc_ref[...] + b_ref[...].astype(jnp.float32) + r_ref[...].astype(jnp.float32)
        mu = jnp.mean(h, axis=-1, keepdims=True)
        var = jnp.mean((h - mu) ** 2, axis=-1, keepdims=True)
        y = (h - mu) * jax.lax.rsqrt(var + eps)
        o_ref[...] = (y * g_ref[...].astype(jnp.float32)
                      + be_ref[...].astype(jnp.float32)).astype(o_ref.dtype)


def matmul_residual_layernorm(x, w, b, residual, gamma, beta, eps=1e-5,
                              out_dtype=jnp.bfloat16, tm=256, tk=512):
    """LayerNorm(residual + x @ w + b); N (=hidden) is kept whole so LN sees full rows."""
    M, K = x.shape
    N = w.shape[1]
    tm = _tile(M, tm, 8)
    tk = _tile(K, tk, 128)
    grid = (M // tm, K // tk)
    return pl.pallas_call(
        functools.partial(_matmul_res_ln_kernel, eps=eps),
        out_shape=jax.ShapeDtypeStruct((M, N), out_dtype),
        grid=grid,
        in_specs=[
            pl.BlockSpec((tm, tk), lambda i, k: (i, k)),
            pl.BlockSpec((tk, N), lambda i, k: (k, 0)),
            pl.BlockSpec((1, N), lambda i, k: (0, 0)),
            pl.BlockSpec((tm, N), lambda i, k: (i, 0)),
            pl.BlockSpec((1, N), lambda i, k: (0, 0)),
            pl.BlockSpec((1, N), lambda i, k: (0, 0)),
        ],
        out_specs=pl.BlockSpec((tm, N), lambda i, k: (i, 0)),
        scratch_shapes=[pltpu.VMEM((tm, N), jnp.float32)],
        compiler_params=pltpu.CompilerParams(
            dimension_semantics=("parallel", "arbitrary")),
    )(x, w, b, residual, gamma, beta)


# ----------------------------- fused embedding-sum + LayerNorm -----------------------------

def _embed_ln_kernel(we_ref, pos_ref, tok_ref, g_ref, b_ref, o_ref, *, eps):
    x = (we_ref[0].astype(jnp.float32)
         + pos_ref[0].astype(jnp.float32)
         + tok_ref[...].astype(jnp.float32))
    mu = jnp.mean(x, axis=-1, keepdims=True)
    var = jnp.mean((x - mu) ** 2, axis=-1, keepdims=True)
    y = (x - mu) * jax.lax.rsqrt(var + eps)
    o_ref[0] = (y * g_ref[...].astype(jnp.float32)
                + b_ref[...].astype(jnp.float32)).astype(o_ref.dtype)


def embed_layernorm(word_emb_gathered, pos_emb_gathered, tok_type, gamma, beta,
                    eps=1e-5, out_dtype=jnp.bfloat16, ts=256):
    """word/pos gathered: [B, S, H]; tok_type/gamma/beta: [1, H] -> LN(word + pos + tok)."""
    B, S, H = word_emb_gathered.shape
    ts = _tile(S, ts, 8)
    grid = (B, S // ts)
    return pl.pallas_call(
        functools.partial(_embed_ln_kernel, eps=eps),
        out_shape=jax.ShapeDtypeStruct((B, S, H), out_dtype),
        grid=grid,
        in_specs=[
            pl.BlockSpec((1, ts, H), lambda b, s: (b, s, 0)),
            pl.BlockSpec((1, ts, H), lambda b, s: (b, s, 0)),
            pl.BlockSpec((1, H), lambda b, s: (0, 0)),
            pl.BlockSpec((1, H), lambda b, s: (0, 0)),
            pl.BlockSpec((1, H), lambda b, s: (0, 0)),
        ],
        out_specs=pl.BlockSpec((1, ts, H), lambda b, s: (b, s, 0)),
        compiler_params=pltpu.CompilerParams(
            dimension_semantics=("parallel", "parallel")),
    )(word_emb_gathered, pos_emb_gathered, tok_type, gamma, beta)


# ----------------------------- fused prefix-KV attention + out-proj + residual + LayerNorm -----------------------------

def _attn_out_ln_kernel(qkv_ref, pk_ref, pv_ref, m_ref, wo_ref, bo_ref,
                        r_ref, g_ref, be_ref, o_ref, *, n_heads, scale, eps):
    q = qkv_ref[0]                       # [S, H] bf16
    k = qkv_ref[1]
    v = qkv_ref[2]
    mask = m_ref[0].astype(jnp.float32)  # [1, S] additive mask for non-prefix keys
    d = q.shape[-1] // n_heads
    outs = []
    for h in range(n_heads):             # static loop over heads; output stays lane-dense
        lo = h * d
        qh = q[:, lo:lo + d]
        kh = k[:, lo:lo + d]
        vh = v[:, lo:lo + d]
        pkh = pk_ref[0, h]               # [P, d] prefix keys (always attended -> no mask)
        pvh = pv_ref[0, h]
        s_self = jax.lax.dot_general(
            qh, kh, (((1,), (1,)), ((), ())),
            preferred_element_type=jnp.float32) * scale + mask
        s_pref = jax.lax.dot_general(
            qh, pkh, (((1,), (1,)), ((), ())),
            preferred_element_type=jnp.float32) * scale
        m = jnp.maximum(jnp.max(s_self, axis=-1, keepdims=True),
                        jnp.max(s_pref, axis=-1, keepdims=True))
        p_self = jnp.exp(s_self - m)
        p_pref = jnp.exp(s_pref - m)
        denom = (jnp.sum(p_self, axis=-1, keepdims=True)
                 + jnp.sum(p_pref, axis=-1, keepdims=True))
        ctx_h = (jnp.dot(p_pref.astype(pvh.dtype), pvh, preferred_element_type=jnp.float32)
                 + jnp.dot(p_self.astype(vh.dtype), vh, preferred_element_type=jnp.float32))
        outs.append(ctx_h * pl.reciprocal(denom, approx=True))
    ctx = jnp.concatenate(outs, axis=-1).astype(wo_ref.dtype)    # [S, H] bf16

    # output projection + residual + LayerNorm epilogue (all in-VMEM, f32)
    hcur = jnp.dot(ctx, wo_ref[...], preferred_element_type=jnp.float32)
    hcur = hcur + bo_ref[...].astype(jnp.float32) + r_ref[...].astype(jnp.float32)
    mu = jnp.mean(hcur, axis=-1, keepdims=True)
    var = jnp.mean((hcur - mu) ** 2, axis=-1, keepdims=True)
    y = (hcur - mu) * jax.lax.rsqrt(var + eps)
    o_ref[...] = (y * g_ref[...].astype(jnp.float32)
                  + be_ref[...].astype(jnp.float32)).astype(o_ref.dtype)


def attention_out_ln(qkv, pk, pv, add_mask, wo, bo, residual, gamma, beta,
                     n_heads, seq_len, eps=1e-5, out_dtype=jnp.bfloat16):
    """qkv: [3, B*S, H]; pk/pv: [B, nH, P, d]; add_mask: [B, 1, S]; residual: [B*S, H].
    Returns LayerNorm(residual + AttnOut(qkv, prefix) @ wo + bo) as [B*S, H]."""
    _, M, H = qkv.shape
    S = seq_len
    B = M // S
    P = pk.shape[2]
    d = H // n_heads
    kern = functools.partial(_attn_out_ln_kernel, n_heads=n_heads,
                             scale=1.0 / (d ** 0.5), eps=eps)
    return pl.pallas_call(
        kern,
        out_shape=jax.ShapeDtypeStruct((M, H), out_dtype),
        grid=(B,),
        in_specs=[
            pl.BlockSpec((3, S, H), lambda b: (0, b, 0)),
            pl.BlockSpec((1, n_heads, P, d), lambda b: (b, 0, 0, 0)),
            pl.BlockSpec((1, n_heads, P, d), lambda b: (b, 0, 0, 0)),
            pl.BlockSpec((1, 1, S), lambda b: (b, 0, 0)),
            pl.BlockSpec((H, H), lambda b: (0, 0)),     # constant index -> stays resident
            pl.BlockSpec((1, H), lambda b: (0, 0)),
            pl.BlockSpec((S, H), lambda b: (b, 0)),
            pl.BlockSpec((1, H), lambda b: (0, 0)),
            pl.BlockSpec((1, H), lambda b: (0, 0)),
        ],
        out_specs=pl.BlockSpec((S, H), lambda b: (b, 0)),
        compiler_params=pltpu.CompilerParams(dimension_semantics=("parallel",)),
    )(qkv, pk, pv, add_mask, wo, bo, residual, gamma, beta)


# ----------------------------- Parameter init (bf16 storage) -----------------------------

def init_params(key, cfg):
    H = cfg["hidden_size"]
    L = cfg["num_hidden_layers"]
    I = cfg["intermediate_size"]
    V = cfg["vocab_size"]
    P = cfg["pre_seq_len"]
    PH = cfg["prefix_hidden_size"]
    C = cfg["connector_out"]
    dt = jnp.bfloat16

    def nrm(k, shape, scale=0.02):
        return (scale * jax.random.normal(k, shape, jnp.float32)).astype(dt)

    keys = iter(jax.random.split(key, 16 + 8 * L))
    params = {
        "word_emb": nrm(next(keys), (V, H)),
        "pos_emb": nrm(next(keys), (cfg["max_position_embeddings"], H)),
        "tok_type_emb": nrm(next(keys), (1, H)),
        "emb_ln_g": jnp.ones((1, H), dt),
        "emb_ln_b": jnp.zeros((1, H), dt),
        "prefix": {
            "embedding": nrm(next(keys), (P, H)),
            "w1": nrm(next(keys), (1, H, PH)),
            "b1": jnp.zeros((1, 1, PH), dt),
            "w2": nrm(next(keys), (1, PH, L * 2 * H)),
            "b2": jnp.zeros((1, 1, L * 2 * H), dt),
        },
        "connector_w": nrm(next(keys), (1, H, C)),
        "connector_b": jnp.zeros((1, 1, C), dt),
        "layers": [],
    }
    for _ in range(L):
        params["layers"].append({
            "w_qkv": nrm(next(keys), (3, H, H)),          # stacked [q, k, v] projections
            "b_qkv": jnp.zeros((3, 1, H), dt),
            "wo": nrm(next(keys), (H, H)),
            "bo": jnp.zeros((1, H), dt),
            "attn_ln_g": jnp.ones((1, H), dt),
            "attn_ln_b": jnp.zeros((1, H), dt),
            "w1": nrm(next(keys), (1, H, I)),
            "b1": jnp.zeros((1, 1, I), dt),
            "w2": nrm(next(keys), (I, H)),
            "b2": jnp.zeros((1, H), dt),
            "ffn_ln_g": jnp.ones((1, H), dt),
            "ffn_ln_b": jnp.zeros((1, H), dt),
        })
    return params


# ----------------------------- Forward pass -----------------------------

def get_prompt(params, batch_size, cfg):
    """PrefixEncoder (prefix_projection=True): Embedding -> Linear -> Tanh -> Linear,
    reshaped to [2L, B, nH, P, d]; dropout is eval-mode identity."""
    P = cfg["pre_seq_len"]
    H = cfg["hidden_size"]
    L = cfg["num_hidden_layers"]
    nH = cfg["num_attention_heads"]
    d = H // nH
    pf = params["prefix"]
    # prefix_tokens = arange(P) -> the embedding lookup is the identity gather of all P rows.
    x = jnp.broadcast_to(pf["embedding"][None], (batch_size, P, H)).reshape(batch_size * P, H)
    h = matmul(x, pf["w1"], pf["b1"], act="tanh")[0]        # [B*P, PH]
    pkv = matmul(h, pf["w2"], pf["b2"], act="none")[0]      # [B*P, 2*L*H]
    pkv = pkv.reshape(batch_size, P, L * 2, nH, d).transpose(2, 0, 3, 1, 4)  # [2L, B, nH, P, d]
    return pkv


def text_encoder_forward(params, input_ids, attention_mask, cfg):
    B, S = input_ids.shape
    H = cfg["hidden_size"]
    nH = cfg["num_attention_heads"]
    P = cfg["pre_seq_len"]

    pkv = get_prompt(params, B, cfg)                        # [2L, B, nH, P, d]

    # Embeddings: gathers in XLA; (word + pos + token_type) + LayerNorm fused in Pallas.
    # RoBERTa position ids: padding_idx(=1) + cumsum(mask), offset by past (prefix) length.
    # TODO(synk): HF derives the mask from input_ids != padding_idx; attention_mask used here.
    mask_i = attention_mask.astype(jnp.int32)
    pos_ids = (jnp.cumsum(mask_i, axis=1) + P) * mask_i + 1          # [B, S]
    we = jnp.take(params["word_emb"], input_ids, axis=0)             # [B, S, H]
    pos = jnp.take(params["pos_emb"], pos_ids, axis=0)               # [B, S, H]
    x = embed_layernorm(we, pos, params["tok_type_emb"],
                        params["emb_ln_g"], params["emb_ln_b"])      # [B, S, H] bf16
    x = x.reshape(B * S, H)

    # Additive mask for the non-prefix keys only (prefix positions are always attended).
    add_mask = ((1.0 - attention_mask.astype(jnp.float32)) * -1e9).reshape(B, 1, S)

    for l, lp in enumerate(params["layers"]):
        qkv = matmul(x, lp["w_qkv"], lp["b_qkv"])           # fused QKV: [3, B*S, H]
        pk, pv = pkv[2 * l], pkv[2 * l + 1]                 # [B, nH, P, d] each
        # attention + output projection + residual add + LayerNorm fused in one kernel
        x = attention_out_ln(qkv, pk, pv, add_mask, lp["wo"], lp["bo"],
                             x, lp["attn_ln_g"], lp["attn_ln_b"], nH, S)
        h = matmul(x, lp["w1"], lp["b1"], act="gelu")[0]    # [B*S, I]
        # second FFN matmul fused with residual add + LayerNorm
        x = matmul_residual_layernorm(h, lp["w2"], lp["b2"],
                                      x, lp["ffn_ln_g"], lp["ffn_ln_b"])

    # Connector: nn.Linear(hidden_size, 768) applied to last_hidden_state (f32 output).
    out = matmul(x, params["connector_w"], params["connector_b"], out_dtype=jnp.float32)[0]
    return out.reshape(B, S, -1)


# ----------------------------- Main -----------------------------

if __name__ == "__main__":
    cfg = dict(
        vocab_size=100,
        hidden_size=128,
        num_hidden_layers=2,
        num_attention_heads=4,
        intermediate_size=256,
        max_position_embeddings=64,
        pre_seq_len=8,
        prefix_hidden_size=128,
        prefix_projection=True,
        connector_out=768,
    )
    B, S = 2, 16

    root = jax.random.PRNGKey(0)
    k_params, k_ids = jax.random.split(root)
    params = init_params(k_params, cfg)
    input_ids = jax.random.randint(k_ids, (B, S), 0, cfg["vocab_size"], dtype=jnp.int32)
    attention_mask = jnp.ones((B, S), jnp.int32)

    fwd = jax.jit(functools.partial(text_encoder_forward, cfg=cfg))
    out = jax.block_until_ready(fwd(params, input_ids, attention_mask))

    assert out.shape == (B, S, cfg["connector_out"]), out.shape
    assert out.dtype == jnp.float32
    assert bool(jnp.all(jnp.isfinite(out)))
    print("KERNEL_OK")
</pallas_src>

<mosaic_0001>
module attributes {stable_mosaic.version = 11 : i64} {
  func.func @_embed_ln_kernel(%arg0: i32, %arg1: i32, %arg2: memref<1x16x128xbf16, #tpu.memory_space<vmem>>, %arg3: memref<1x16x128xbf16, #tpu.memory_space<vmem>>, %arg4: memref<1x128xbf16, #tpu.memory_space<vmem>>, %arg5: memref<1x128xbf16, #tpu.memory_space<vmem>>, %arg6: memref<1x128xbf16, #tpu.memory_space<vmem>>, %arg7: memref<1x16x128xbf16, #tpu.memory_space<vmem>>) attributes {dimension_semantics = [#tpu.dimension_semantics<parallel>, #tpu.dimension_semantics<parallel>], iteration_bounds = array<i64: 2, 1>, scalar_prefetch = 0 : i64, scratch_operands = 0 : i64, tpu.core_type = #tpu.core_type<tc>, window_params = [{transform_indices = @transform_0, window_bounds = array<i64: 1, 16, 128>}, {transform_indices = @transform_1, window_bounds = array<i64: 1, 16, 128>}, {pipeline_mode = #tpu.pipeline_mode<synchronous>, transform_indices = @transform_2, window_bounds = array<i64: 1, 128>}, {pipeline_mode = #tpu.pipeline_mode<synchronous>, transform_indices = @transform_3, window_bounds = array<i64: 1, 128>}, {pipeline_mode = #tpu.pipeline_mode<synchronous>, transform_indices = @transform_4, window_bounds = array<i64: 1, 128>}, {transform_indices = @transform_5, window_bounds = array<i64: 1, 16, 128>}]} {
    %c0 = arith.constant 0 : index
    %c0_0 = arith.constant 0 : index
    %c0_1 = arith.constant 0 : index
    %0 = vector.load %arg2[%c0, %c0_0, %c0_1] : memref<1x16x128xbf16, #tpu.memory_space<vmem>>, vector<1x16x128xbf16>
    %1 = vector.shape_cast %0 : vector<1x16x128xbf16> to vector<16x128xbf16>
    %2 = arith.extf %1 : vector<16x128xbf16> to vector<16x128xf32>
    %c0_2 = arith.constant 0 : index
    %c0_3 = arith.constant 0 : index
    %c0_4 = arith.constant 0 : index
    %3 = vector.load %arg3[%c0_2, %c0_3, %c0_4] : memref<1x16x128xbf16, #tpu.memory_space<vmem>>, vector<1x16x128xbf16>
    %4 = vector.shape_cast %3 : vector<1x16x128xbf16> to vector<16x128xbf16>
    %5 = arith.extf %4 : vector<16x128xbf16> to vector<16x128xf32>
    %6 = arith.addf %2, %5 : vector<16x128xf32>
    %c0_5 = arith.constant 0 : index
    %c0_6 = arith.constant 0 : index
    %7 = vector.load %arg4[%c0_5, %c0_6] : memref<1x128xbf16, #tpu.memory_space<vmem>>, vector<1x128xbf16>
    %8 = arith.extf %7 : vector<1x128xbf16> to vector<1x128xf32>
    %9 = vector.broadcast %8 : vector<1x128xf32> to vector<16x128xf32>
    %10 = arith.addf %6, %9 : vector<16x128xf32>
    %cst = arith.constant dense<0.000000e+00> : vector<16xf32>
    %11 = vector.multi_reduction <add>, %10, %cst [1] : vector<16x128xf32> to vector<16xf32>
    %12 = vector.shape_cast %11 : vector<16xf32> to vector<16x1xf32>
    %cst_7 = arith.constant 1.280000e+02 : f32
    %13 = vector.broadcast %cst_7 : f32 to vector<16x1xf32>
    %14 = arith.divf %12, %13 : vector<16x1xf32>
    %15 = vector.broadcast %14 : vector<16x1xf32> to vector<16x128xf32>
    %16 = arith.subf %10, %15 : vector<16x128xf32>
    %17 = arith.mulf %16, %16 : vector<16x128xf32>
    %cst_8 = arith.constant dense<0.000000e+00> : vector<16xf32>
    %18 = vector.multi_reduction <add>, %17, %cst_8 [1] : vector<16x128xf32> to vector<16xf32>
    %19 = vector.shape_cast %18 : vector<16xf32> to vector<16x1xf32>
    %cst_9 = arith.constant 1.280000e+02 : f32
    %20 = vector.broadcast %cst_9 : f32 to vector<16x1xf32>
    %21 = arith.divf %19, %20 : vector<16x1xf32>
    %22 = vector.broadcast %14 : vector<16x1xf32> to vector<16x128xf32>
    %23 = arith.subf %10, %22 : vector<16x128xf32>
    %cst_10 = arith.constant 9.99999974E-6 : f32
    %24 = vector.broadcast %cst_10 : f32 to vector<16x1xf32>
    %25 = arith.addf %21, %24 : vector<16x1xf32>
    %26 = math.rsqrt %25 : vector<16x1xf32>
    %27 = vector.broadcast %26 : vector<16x1xf32> to vector<16x128xf32>
    %28 = arith.mulf %23, %27 : vector<16x128xf32>
    %c0_11 = arith.constant 0 : index
    %c0_12 = arith.constant 0 : index
    %29 = vector.load %arg5[%c0_11, %c0_12] : memref<1x128xbf16, #tpu.memory_space<vmem>>, vector<1x128xbf16>
    %30 = arith.extf %29 : vector<1x128xbf16> to vector<1x128xf32>
    %31 = vector.broadcast %30 : vector<1x128xf32> to vector<16x128xf32>
    %32 = arith.mulf %28, %31 : vector<16x128xf32>
    %c0_13 = arith.constant 0 : index
    %c0_14 = arith.constant 0 : index
    %33 = vector.load %arg6[%c0_13, %c0_14] : memref<1x128xbf16, #tpu.memory_space<vmem>>, vector<1x128xbf16>
    %34 = arith.extf %33 : vector<1x128xbf16> to vector<1x128xf32>
    %35 = vector.broadcast %34 : vector<1x128xf32> to vector<16x128xf32>
    %36 = arith.addf %32, %35 : vector<16x128xf32>
    %37 = arith.truncf %36 : vector<16x128xf32> to vector<16x128xbf16>
    %c0_15 = arith.constant 0 : index
    %c0_16 = arith.constant 0 : index
    %c0_17 = arith.constant 0 : index
    %38 = vector.load %arg7[%c0_15, %c0_16, %c0_17] : memref<1x16x128xbf16, #tpu.memory_space<vmem>>, vector<1x16x128xbf16>
    %39 = vector.shape_cast %38 : vector<1x16x128xbf16> to vector<16x128xbf16>
    %40 = vector.shape_cast %37 : vector<16x128xbf16> to vector<1x16x128xbf16>
    tpu.vector_store %arg7[%c0_15, %c0_16, %c0_17], %40 {strides = array<i32>} : memref<1x16x128xbf16, #tpu.memory_space<vmem>>, vector<1x16x128xbf16>,
    return
  }
  func.func @transform_0(%arg0: i32, %arg1: i32) -> (i32, i32, i32) {
    %c0_i32 = arith.constant 0 : i32
    %c0_i32_0 = arith.constant 0 : i32
    return %arg0, %arg1, %c0_i32 : i32, i32, i32
  }
  func.func @transform_1(%arg0: i32, %arg1: i32) -> (i32, i32, i32) {
    %c0_i32 = arith.constant 0 : i32
    %c0_i32_0 = arith.constant 0 : i32
    return %arg0, %arg1, %c0_i32 : i32, i32, i32
  }
  func.func @transform_2(%arg0: i32, %arg1: i32) -> (i32, i32) {
    %c0_i32 = arith.constant 0 : i32
    %c0_i32_0 = arith.constant 0 : i32
    %c0_i32_1 = arith.constant 0 : i32
    return %c0_i32, %c0_i32_0 : i32, i32
  }
  func.func @transform_3(%arg0: i32, %arg1: i32) -> (i32, i32) {
    %c0_i32 = arith.constant 0 : i32
    %c0_i32_0 = arith.constant 0 : i32
    %c0_i32_1 = arith.constant 0 : i32
    return %c0_i32, %c0_i32_0 : i32, i32
  }
  func.func @transform_4(%arg0: i32, %arg1: i32) -> (i32, i32) {
    %c0_i32 = arith.constant 0 : i32
    %c0_i32_0 = arith.constant 0 : i32
    %c0_i32_1 = arith.constant 0 : i32
    return %c0_i32, %c0_i32_0 : i32, i32
  }
  func.func @transform_5(%arg0: i32, %arg1: i32) -> (i32, i32, i32) {
    %c0_i32 = arith.constant 0 : i32
    %c0_i32_0 = arith.constant 0 : i32
    return %arg0, %arg1, %c0_i32 : i32, i32, i32
  }
}

module attributes {stable_mosaic.version = 11 : i64} {
  func.func @_matmul_kernel(%arg0: i32, %arg1: i32, %arg2: i32, %arg3: i32, %arg4: memref<32x128xbf16, #tpu.memory_space<vmem>>, %arg5: memref<1x128x128xbf16, #tpu.memory_space<vmem>>, %arg6: memref<1x1x128xbf16, #tpu.memory_space<vmem>>, %arg7: memref<1x32x128xbf16, #tpu.memory_space<vmem>>, %arg8: memref<32x128xf32, #tpu.memory_space<vmem>>) attributes {dimension_semantics = [#tpu.dimension_semantics<parallel>, #tpu.dimension_semantics<parallel>, #tpu.dimension_semantics<parallel>, #tpu.dimension_semantics<arbitrary>], iteration_bounds = array<i64: 3, 1, 1, 1>, scalar_prefetch = 0 : i64, scratch_operands = 1 : i64, tpu.core_type = #tpu.core_type<tc>, window_params = [{transform_indices = @transform_0, window_bounds = array<i64: 32, 128>}, {transform_indices = @transform_1, window_bounds = array<i64: 1, 128, 128>}, {transform_indices = @transform_2, window_bounds = array<i64: 1, 1, 128>}, {transform_indices = @transform_3, window_bounds = array<i64: 1, 32, 128>}]} {
    %c0_i32 = arith.constant 0 : i32
    %0 = arith.cmpi eq, %arg3, %c0_i32 : i32
    %1 = arith.extui %0 : i1 to i32
    %c0_i32_0 = arith.constant 0 : i32
    %2 = arith.cmpi ne, %1, %c0_i32_0 : i32
    scf.if %2 {
      %cst_11 = arith.constant 0.000000e+00 : f32
      %13 = vector.broadcast %cst_11 : f32 to vector<32x128xf32>
      %c0_12 = arith.constant 0 : index
      %c0_13 = arith.constant 0 : index
      %14 = vector.load %arg8[%c0_12, %c0_13] : memref<32x128xf32, #tpu.memory_space<vmem>>, vector<32x128xf32>
      tpu.vector_store %arg8[%c0_12, %c0_13], %13 {strides = array<i32>} : memref<32x128xf32, #tpu.memory_space<vmem>>, vector<32x128xf32>,
    } else {
    }
    %c0 = arith.constant 0 : index
    %c0_1 = arith.constant 0 : index
    %3 = vector.load %arg8[%c0, %c0_1] : memref<32x128xf32, #tpu.memory_space<vmem>>, vector<32x128xf32>
    %c0_2 = arith.constant 0 : index
    %c0_3 = arith.constant 0 : index
    %4 = vector.load %arg4[%c0_2, %c0_3] : memref<32x128xbf16, #tpu.memory_space<vmem>>, vector<32x128xbf16>
    %c0_4 = arith.constant 0 : index
    %c0_5 = arith.constant 0 : index
    %c0_6 = arith.constant 0 : index
    %5 = vector.load %arg5[%c0_4, %c0_5, %c0_6] : memref<1x128x128xbf16, #tpu.memory_space<vmem>>, vector<1x128x128xbf16>
    %6 = vector.shape_cast %5 : vector<1x128x128xbf16> to vector<128x128xbf16>
    %cst = arith.constant dense<0.000000e+00> : vector<32x128xf32>
    %7 = tpu.matmul %4, %6, %cst {dimension_numbers = #tpu.dot_dimension_numbers<[1], [0], [0], [1], [0, 0, 1, 1], [], []>} : vector<32x128xbf16>, vector<128x128xbf16>, vector<32x128xf32> -> vector<32x128xf32>
    %8 = arith.addf %3, %7 : vector<32x128xf32>
    %c0_7 = arith.constant 0 : index
    %c0_8 = arith.constant 0 : index
    %9 = vector.load %arg8[%c0_7, %c0_8] : memref<32x128xf32, #tpu.memory_space<vmem>>, vector<32x128xf32>
    tpu.vector_store %arg8[%c0_7, %c0_8], %8 {strides = array<i32>} : memref<32x128xf32, #tpu.memory_space<vmem>>, vector<32x128xf32>,
    %c0_i32_9 = arith.constant 0 : i32
    %10 = arith.cmpi eq, %arg3, %c0_i32_9 : i32
    %11 = arith.extui %10 : i1 to i32
    %c0_i32_10 = arith.constant 0 : i32
    %12 = arith.cmpi ne, %11, %c0_i32_10 : i32
    scf.if %12 {
      %c0_11 = arith.constant 0 : index
      %c0_12 = arith.constant 0 : index
      %13 = vector.load %arg8[%c0_11, %c0_12] : memref<32x128xf32, #tpu.memory_space<vmem>>, vector<32x128xf32>
      %c0_13 = arith.constant 0 : index
      %c0_14 = arith.constant 0 : index
      %c0_15 = arith.constant 0 : index
      %14 = vector.load %arg6[%c0_13, %c0_14, %c0_15] : memref<1x1x128xbf16, #tpu.memory_space<vmem>>, vector<1x1x128xbf16>
      %15 = vector.shape_cast %14 : vector<1x1x128xbf16> to vector<1x128xbf16>
      %16 = arith.extf %15 : vector<1x128xbf16> to vector<1x128xf32>
      %17 = vector.broadcast %16 : vector<1x128xf32> to vector<32x128xf32>
      %18 = arith.addf %13, %17 : vector<32x128xf32>
      %19 = arith.truncf %18 : vector<32x128xf32> to vector<32x128xbf16>
      %c0_16 = arith.constant 0 : index
      %c0_17 = arith.constant 0 : index
      %c0_18 = arith.constant 0 : index
      %20 = vector.load %arg7[%c0_16, %c0_17, %c0_18] : memref<1x32x128xbf16, #tpu.memory_space<vmem>>, vector<1x32x128xbf16>
      %21 = vector.shape_cast %20 : vector<1x32x128xbf16> to vector<32x128xbf16>
      %22 = vector.shape_cast %19 : vector<32x128xbf16> to vector<1x32x128xbf16>
      tpu.vector_store %arg7[%c0_16, %c0_17, %c0_18], %22 {strides = array<i32>} : memref<1x32x128xbf16, #tpu.memory_space<vmem>>, vector<1x32x128xbf16>,
    } else {
    }
    return
  }
  func.func @transform_0(%arg0: i32, %arg1: i32, %arg2: i32, %arg3: i32) -> (i32, i32) {
    %c0_i32 = arith.constant 0 : i32
    return %arg1, %arg3 : i32, i32
  }
  func.func @transform_1(%arg0: i32, %arg1: i32, %arg2: i32, %arg3: i32) -> (i32, i32, i32) {
    %c0_i32 = arith.constant 0 : i32
    return %arg0, %arg3, %arg2 : i32, i32, i32
  }
  func.func @transform_2(%arg0: i32, %arg1: i32, %arg2: i32, %arg3: i32) -> (i32, i32, i32) {
    %c0_i32 = arith.constant 0 : i32
    %c0_i32_0 = arith.constant 0 : i32
    return %arg0, %c0_i32, %arg2 : i32, i32, i32
  }
  func.func @transform_3(%arg0: i32, %arg1: i32, %arg2: i32, %arg3: i32) -> (i32, i32, i32) {
    %c0_i32 = arith.constant 0 : i32
    return %arg0, %arg1, %arg2 : i32, i32, i32
  }
}

module attributes {stable_mosaic.version = 11 : i64} {
  func.func @_matmul_kernel(%arg0: i32, %arg1: i32, %arg2: i32, %arg3: i32, %arg4: memref<16x128xbf16, #tpu.memory_space<vmem>>, %arg5: memref<1x128x128xbf16, #tpu.memory_space<vmem>>, %arg6: memref<1x1x128xbf16, #tpu.memory_space<vmem>>, %arg7: memref<1x16x128xbf16, #tpu.memory_space<vmem>>, %arg8: memref<16x128xf32, #tpu.memory_space<vmem>>) attributes {dimension_semantics = [#tpu.dimension_semantics<parallel>, #tpu.dimension_semantics<parallel>, #tpu.dimension_semantics<parallel>, #tpu.dimension_semantics<arbitrary>], iteration_bounds = array<i64: 1, 1, 1, 1>, scalar_prefetch = 0 : i64, scratch_operands = 1 : i64, tpu.core_type = #tpu.core_type<tc>, window_params = [{transform_indices = @transform_0, window_bounds = array<i64: 16, 128>}, {transform_indices = @transform_1, window_bounds = array<i64: 1, 128, 128>}, {transform_indices = @transform_2, window_bounds = array<i64: 1, 1, 128>}, {transform_indices = @transform_3, window_bounds = array<i64: 1, 16, 128>}]} {
    %c0_i32 = arith.constant 0 : i32
    %0 = arith.cmpi eq, %arg3, %c0_i32 : i32
    %1 = arith.extui %0 : i1 to i32
    %c0_i32_0 = arith.constant 0 : i32
    %2 = arith.cmpi ne, %1, %c0_i32_0 : i32
    scf.if %2 {
      %cst_11 = arith.constant 0.000000e+00 : f32
      %13 = vector.broadcast %cst_11 : f32 to vector<16x128xf32>
      %c0_12 = arith.constant 0 : index
      %c0_13 = arith.constant 0 : index
      %14 = vector.load %arg8[%c0_12, %c0_13] : memref<16x128xf32, #tpu.memory_space<vmem>>, vector<16x128xf32>
      tpu.vector_store %arg8[%c0_12, %c0_13], %13 {strides = array<i32>} : memref<16x128xf32, #tpu.memory_space<vmem>>, vector<16x128xf32>,
    } else {
    }
    %c0 = arith.constant 0 : index
    %c0_1 = arith.constant 0 : index
    %3 = vector.load %arg8[%c0, %c0_1] : memref<16x128xf32, #tpu.memory_space<vmem>>, vector<16x128xf32>
    %c0_2 = arith.constant 0 : index
    %c0_3 = arith.constant 0 : index
    %4 = vector.load %arg4[%c0_2, %c0_3] : memref<16x128xbf16, #tpu.memory_space<vmem>>, vector<16x128xbf16>
    %c0_4 = arith.constant 0 : index
    %c0_5 = arith.constant 0 : index
    %c0_6 = arith.constant 0 : index
    %5 = vector.load %arg5[%c0_4, %c0_5, %c0_6] : memref<1x128x128xbf16, #tpu.memory_space<vmem>>, vector<1x128x128xbf16>
    %6 = vector.shape_cast %5 : vector<1x128x128xbf16> to vector<128x128xbf16>
    %cst = arith.constant dense<0.000000e+00> : vector<16x128xf32>
    %7 = tpu.matmul %4, %6, %cst {dimension_numbers = #tpu.dot_dimension_numbers<[1], [0], [0], [1], [0, 0, 1, 1], [], []>} : vector<16x128xbf16>, vector<128x128xbf16>, vector<16x128xf32> -> vector<16x128xf32>
    %8 = arith.addf %3, %7 : vector<16x128xf32>
    %c0_7 = arith.constant 0 : index
    %c0_8 = arith.constant 0 : index
    %9 = vector.load %arg8[%c0_7, %c0_8] : memref<16x128xf32, #tpu.memory_space<vmem>>, vector<16x128xf32>
    tpu.vector_store %arg8[%c0_7, %c0_8], %8 {strides = array<i32>} : memref<16x128xf32, #tpu.memory_space<vmem>>, vector<16x128xf32>,
    %c0_i32_9 = arith.constant 0 : i32
    %10 = arith.cmpi eq, %arg3, %c0_i32_9 : i32
    %11 = arith.extui %10 : i1 to i32
    %c0_i32_10 = arith.constant 0 : i32
    %12 = arith.cmpi ne, %11, %c0_i32_10 : i32
    scf.if %12 {
      %c0_11 = arith.constant 0 : index
      %c0_12 = arith.constant 0 : index
      %13 = vector.load %arg8[%c0_11, %c0_12] : memref<16x128xf32, #tpu.memory_space<vmem>>, vector<16x128xf32>
      %c0_13 = arith.constant 0 : index
      %c0_14 = arith.constant 0 : index
      %c0_15 = arith.constant 0 : index
      %14 = vector.load %arg6[%c0_13, %c0_14, %c0_15] : memref<1x1x128xbf16, #tpu.memory_space<vmem>>, vector<1x1x128xbf16>
      %15 = vector.shape_cast %14 : vector<1x1x128xbf16> to vector<1x128xbf16>
      %16 = arith.extf %15 : vector<1x128xbf16> to vector<1x128xf32>
      %17 = vector.broadcast %16 : vector<1x128xf32> to vector<16x128xf32>
      %18 = arith.addf %13, %17 : vector<16x128xf32>
      %19 = math.tanh %18 : vector<16x128xf32>
      %20 = arith.truncf %19 : vector<16x128xf32> to vector<16x128xbf16>
      %c0_16 = arith.constant 0 : index
      %c0_17 = arith.constant 0 : index
      %c0_18 = arith.constant 0 : index
      %21 = vector.load %arg7[%c0_16, %c0_17, %c0_18] : memref<1x16x128xbf16, #tpu.memory_space<vmem>>, vector<1x16x128xbf16>
      %22 = vector.shape_cast %21 : vector<1x16x128xbf16> to vector<16x128xbf16>
      %23 = vector.shape_cast %20 : vector<16x128xbf16> to vector<1x16x128xbf16>
      tpu.vector_store %arg7[%c0_16, %c0_17, %c0_18], %23 {strides = array<i32>} : memref<1x16x128xbf16, #tpu.memory_space<vmem>>, vector<1x16x128xbf16>,
    } else {
    }
    return
  }
  func.func @transform_0(%arg0: i32, %arg1: i32, %arg2: i32, %arg3: i32) -> (i32, i32) {
    %c0_i32 = arith.constant 0 : i32
    return %arg1, %arg3 : i32, i32
  }
  func.func @transform_1(%arg0: i32, %arg1: i32, %arg2: i32, %arg3: i32) -> (i32, i32, i32) {
    %c0_i32 = arith.constant 0 : i32
    return %arg0, %arg3, %arg2 : i32, i32, i32
  }
  func.func @transform_2(%arg0: i32, %arg1: i32, %arg2: i32, %arg3: i32) -> (i32, i32, i32) {
    %c0_i32 = arith.constant 0 : i32
    %c0_i32_0 = arith.constant 0 : i32
    return %arg0, %c0_i32, %arg2 : i32, i32, i32
  }
  func.func @transform_3(%arg0: i32, %arg1: i32, %arg2: i32, %arg3: i32) -> (i32, i32, i32) {
    %c0_i32 = arith.constant 0 : i32
    return %arg0, %arg1, %arg2 : i32, i32, i32
  }
}

module attributes {stable_mosaic.version = 11 : i64} {
  func.func @_matmul_kernel(%arg0: i32, %arg1: i32, %arg2: i32, %arg3: i32, %arg4: memref<16x128xbf16, #tpu.memory_space<vmem>>, %arg5: memref<1x128x256xbf16, #tpu.memory_space<vmem>>, %arg6: memref<1x1x256xbf16, #tpu.memory_space<vmem>>, %arg7: memref<1x16x256xbf16, #tpu.memory_space<vmem>>, %arg8: memref<16x256xf32, #tpu.memory_space<vmem>>) attributes {dimension_semantics = [#tpu.dimension_semantics<parallel>, #tpu.dimension_semantics<parallel>, #tpu.dimension_semantics<parallel>, #tpu.dimension_semantics<arbitrary>], iteration_bounds = array<i64: 1, 1, 2, 1>, scalar_prefetch = 0 : i64, scratch_operands = 1 : i64, tpu.core_type = #tpu.core_type<tc>, window_params = [{transform_indices = @transform_0, window_bounds = array<i64: 16, 128>}, {transform_indices = @transform_1, window_bounds = array<i64: 1, 128, 256>}, {transform_indices = @transform_2, window_bounds = array<i64: 1, 1, 256>}, {transform_indices = @transform_3, window_bounds = array<i64: 1, 16, 256>}]} {
    %c0_i32 = arith.constant 0 : i32
    %0 = arith.cmpi eq, %arg3, %c0_i32 : i32
    %1 = arith.extui %0 : i1 to i32
    %c0_i32_0 = arith.constant 0 : i32
    %2 = arith.cmpi ne, %1, %c0_i32_0 : i32
    scf.if %2 {
      %cst_11 = arith.constant 0.000000e+00 : f32
      %13 = vector.broadcast %cst_11 : f32 to vector<16x256xf32>
      %c0_12 = arith.constant 0 : index
      %c0_13 = arith.constant 0 : index
      %14 = vector.load %arg8[%c0_12, %c0_13] : memref<16x256xf32, #tpu.memory_space<vmem>>, vector<16x256xf32>
      tpu.vector_store %arg8[%c0_12, %c0_13], %13 {strides = array<i32>} : memref<16x256xf32, #tpu.memory_space<vmem>>, vector<16x256xf32>,
    } else {
    }
    %c0 = arith.constant 0 : index
    %c0_1 = arith.constant 0 : index
    %3 = vector.load %arg8[%c0, %c0_1] : memref<16x256xf32, #tpu.memory_space<vmem>>, vector<16x256xf32>
    %c0_2 = arith.constant 0 : index
    %c0_3 = arith.constant 0 : index
    %4 = vector.load %arg4[%c0_2, %c0_3] : memref<16x128xbf16, #tpu.memory_space<vmem>>, vector<16x128xbf16>
    %c0_4 = arith.constant 0 : index
    %c0_5 = arith.constant 0 : index
    %c0_6 = arith.constant 0 : index
    %5 = vector.load %arg5[%c0_4, %c0_5, %c0_6] : memref<1x128x256xbf16, #tpu.memory_space<vmem>>, vector<1x128x256xbf16>
    %6 = vector.shape_cast %5 : vector<1x128x256xbf16> to vector<128x256xbf16>
    %cst = arith.constant dense<0.000000e+00> : vector<16x256xf32>
    %7 = tpu.matmul %4, %6, %cst {dimension_numbers = #tpu.dot_dimension_numbers<[1], [0], [0], [1], [0, 0, 1, 1], [], []>} : vector<16x128xbf16>, vector<128x256xbf16>, vector<16x256xf32> -> vector<16x256xf32>
    %8 = arith.addf %3, %7 : vector<16x256xf32>
    %c0_7 = arith.constant 0 : index
    %c0_8 = arith.constant 0 : index
    %9 = vector.load %arg8[%c0_7, %c0_8] : memref<16x256xf32, #tpu.memory_space<vmem>>, vector<16x256xf32>
    tpu.vector_store %arg8[%c0_7, %c0_8], %8 {strides = array<i32>} : memref<16x256xf32, #tpu.memory_space<vmem>>, vector<16x256xf32>,
    %c0_i32_9 = arith.constant 0 : i32
    %10 = arith.cmpi eq, %arg3, %c0_i32_9 : i32
    %11 = arith.extui %10 : i1 to i32
    %c0_i32_10 = arith.constant 0 : i32
    %12 = arith.cmpi ne, %11, %c0_i32_10 : i32
    scf.if %12 {
      %c0_11 = arith.constant 0 : index
      %c0_12 = arith.constant 0 : index
      %13 = vector.load %arg8[%c0_11, %c0_12] : memref<16x256xf32, #tpu.memory_space<vmem>>, vector<16x256xf32>
      %c0_13 = arith.constant 0 : index
      %c0_14 = arith.constant 0 : index
      %c0_15 = arith.constant 0 : index
      %14 = vector.load %arg6[%c0_13, %c0_14, %c0_15] : memref<1x1x256xbf16, #tpu.memory_space<vmem>>, vector<1x1x256xbf16>
      %15 = vector.shape_cast %14 : vector<1x1x256xbf16> to vector<1x256xbf16>
      %16 = arith.extf %15 : vector<1x256xbf16> to vector<1x256xf32>
      %17 = vector.broadcast %16 : vector<1x256xf32> to vector<16x256xf32>
      %18 = arith.addf %13, %17 : vector<16x256xf32>
      %19 = arith.truncf %18 : vector<16x256xf32> to vector<16x256xbf16>
      %c0_16 = arith.constant 0 : index
      %c0_17 = arith.constant 0 : index
      %c0_18 = arith.constant 0 : index
      %20 = vector.load %arg7[%c0_16, %c0_17, %c0_18] : memref<1x16x256xbf16, #tpu.memory_space<vmem>>, vector<1x16x256xbf16>
      %21 = vector.shape_cast %20 : vector<1x16x256xbf16> to vector<16x256xbf16>
      %22 = vector.shape_cast %19 : vector<16x256xbf16> to vector<1x16x256xbf16>
      tpu.vector_store %arg7[%c0_16, %c0_17, %c0_18], %22 {strides = array<i32>} : memref<1x16x256xbf16, #tpu.memory_space<vmem>>, vector<1x16x256xbf16>,
    } else {
    }
    return
  }
  func.func @transform_0(%arg0: i32, %arg1: i32, %arg2: i32, %arg3: i32) -> (i32, i32) {
    %c0_i32 = arith.constant 0 : i32
    return %arg1, %arg3 : i32, i32
  }
  func.func @transform_1(%arg0: i32, %arg1: i32, %arg2: i32, %arg3: i32) -> (i32, i32, i32) {
    %c0_i32 = arith.constant 0 : i32
    return %arg0, %arg3, %arg2 : i32, i32, i32
  }
  func.func @transform_2(%arg0: i32, %arg1: i32, %arg2: i32, %arg3: i32) -> (i32, i32, i32) {
    %c0_i32 = arith.constant 0 : i32
    %c0_i32_0 = arith.constant 0 : i32
    return %arg0, %c0_i32, %arg2 : i32, i32, i32
  }
  func.func @transform_3(%arg0: i32, %arg1: i32, %arg2: i32, %arg3: i32) -> (i32, i32, i32) {
    %c0_i32 = arith.constant 0 : i32
    return %arg0, %arg1, %arg2 : i32, i32, i32
  }
}

module attributes {stable_mosaic.version = 11 : i64} {
  func.func @_attn_out_ln_kernel(%arg0: i32, %arg1: memref<3x16x128xbf16, #tpu.memory_space<vmem>>, %arg2: memref<1x4x8x32xbf16, #tpu.memory_space<vmem>>, %arg3: memref<1x4x8x32xbf16, #tpu.memory_space<vmem>>, %arg4: memref<1x1x16xf32, #tpu.memory_space<vmem>>, %arg5: memref<128x128xbf16, #tpu.memory_space<vmem>>, %arg6: memref<1x128xbf16, #tpu.memory_space<vmem>>, %arg7: memref<16x128xbf16, #tpu.memory_space<vmem>>, %arg8: memref<1x128xbf16, #tpu.memory_space<vmem>>, %arg9: memref<1x128xbf16, #tpu.memory_space<vmem>>, %arg10: memref<16x128xbf16, #tpu.memory_space<vmem>>) attributes {dimension_semantics = [#tpu.dimension_semantics<parallel>], iteration_bounds = array<i64: 2>, scalar_prefetch = 0 : i64, scratch_operands = 0 : i64, tpu.core_type = #tpu.core_type<tc>, window_params = [{transform_indices = @transform_0, window_bounds = array<i64: 3, 16, 128>}, {transform_indices = @transform_1, window_bounds = array<i64: 1, 4, 8, 32>}, {transform_indices = @transform_2, window_bounds = array<i64: 1, 4, 8, 32>}, {transform_indices = @transform_3, window_bounds = array<i64: 1, 1, 16>}, {pipeline_mode = #tpu.pipeline_mode<synchronous>, transform_indices = @transform_4, window_bounds = array<i64: 128, 128>}, {pipeline_mode = #tpu.pipeline_mode<synchronous>, transform_indices = @transform_5, window_bounds = array<i64: 1, 128>}, {transform_indices = @transform_6, window_bounds = array<i64: 16, 128>}, {pipeline_mode = #tpu.pipeline_mode<synchronous>, transform_indices = @transform_7, window_bounds = array<i64: 1, 128>}, {pipeline_mode = #tpu.pipeline_mode<synchronous>, transform_indices = @transform_8, window_bounds = array<i64: 1, 128>}, {transform_indices = @transform_9, window_bounds = array<i64: 16, 128>}]} {
    %c0 = arith.constant 0 : index
    %c0_0 = arith.constant 0 : index
    %c0_1 = arith.constant 0 : index
    %0 = vector.load %arg1[%c0, %c0_0, %c0_1] : memref<3x16x128xbf16, #tpu.memory_space<vmem>>, vector<1x16x128xbf16>
    %1 = vector.shape_cast %0 : vector<1x16x128xbf16> to vector<16x128xbf16>
    %c1 = arith.constant 1 : index
    %c0_2 = arith.constant 0 : index
    %c0_3 = arith.constant 0 : index
    %2 = vector.load %arg1[%c1, %c0_2, %c0_3] : memref<3x16x128xbf16, #tpu.memory_space<vmem>>, vector<1x16x128xbf16>
    %3 = vector.shape_cast %2 : vector<1x16x128xbf16> to vector<16x128xbf16>
    %c2 = arith.constant 2 : index
    %c0_4 = arith.constant 0 : index
    %c0_5 = arith.constant 0 : index
    %4 = vector.load %arg1[%c2, %c0_4, %c0_5] : memref<3x16x128xbf16, #tpu.memory_space<vmem>>, vector<1x16x128xbf16>
    %5 = vector.shape_cast %4 : vector<1x16x128xbf16> to vector<16x128xbf16>
    %c0_6 = arith.constant 0 : index
    %c0_7 = arith.constant 0 : index
    %c0_8 = arith.constant 0 : index
    %6 = vector.load %arg4[%c0_6, %c0_7, %c0_8] : memref<1x1x16xf32, #tpu.memory_space<vmem>>, vector<1x1x16xf32>
    %7 = vector.shape_cast %6 : vector<1x1x16xf32> to vector<1x16xf32>
    %8 = vector.extract_strided_slice %1 {offsets = [0, 0], sizes = [16, 32], strides = [1, 1]} : vector<16x128xbf16> to vector<16x32xbf16>
    %9 = vector.extract_strided_slice %3 {offsets = [0, 0], sizes = [16, 32], strides = [1, 1]} : vector<16x128xbf16> to vector<16x32xbf16>
    %10 = vector.extract_strided_slice %5 {offsets = [0, 0], sizes = [16, 32], strides = [1, 1]} : vector<16x128xbf16> to vector<16x32xbf16>
    %c0_9 = arith.constant 0 : index
    %c0_10 = arith.constant 0 : index
    %c0_11 = arith.constant 0 : index
    %c0_12 = arith.constant 0 : index
    %11 = vector.load %arg2[%c0_9, %c0_10, %c0_11, %c0_12] : memref<1x4x8x32xbf16, #tpu.memory_space<vmem>>, vector<1x1x8x32xbf16>
    %12 = vector.shape_cast %11 : vector<1x1x8x32xbf16> to vector<8x32xbf16>
    %c0_13 = arith.constant 0 : index
    %c0_14 = arith.constant 0 : index
    %c0_15 = arith.constant 0 : index
    %c0_16 = arith.constant 0 : index
    %13 = vector.load %arg3[%c0_13, %c0_14, %c0_15, %c0_16] : memref<1x4x8x32xbf16, #tpu.memory_space<vmem>>, vector<1x1x8x32xbf16>
    %14 = vector.shape_cast %13 : vector<1x1x8x32xbf16> to vector<8x32xbf16>
    %cst = arith.constant dense<0.000000e+00> : vector<16x16xf32>
    %15 = tpu.matmul %8, %9, %cst {dimension_numbers = #tpu.dot_dimension_numbers<[1], [1], [0], [0], [0, 0, 1, 0], [], []>} : vector<16x32xbf16>, vector<16x32xbf16>, vector<16x16xf32> -> vector<16x16xf32>
    %cst_17 = arith.constant 0.176776692 : f32
    %16 = vector.broadcast %cst_17 : f32 to vector<16x16xf32>
    %17 = arith.mulf %15, %16 : vector<16x16xf32>
    %18 = vector.broadcast %7 : vector<1x16xf32> to vector<16x16xf32>
    %19 = arith.addf %17, %18 : vector<16x16xf32>
    %cst_18 = arith.constant dense<0.000000e+00> : vector<16x8xf32>
    %20 = tpu.matmul %8, %12, %cst_18 {dimension_numbers = #tpu.dot_dimension_numbers<[1], [1], [0], [0], [0, 0, 1, 0], [], []>} : vector<16x32xbf16>, vector<8x32xbf16>, vector<16x8xf32> -> vector<16x8xf32>
    %cst_19 = arith.constant 0.176776692 : f32
    %21 = vector.broadcast %cst_19 : f32 to vector<16x8xf32>
    %22 = arith.mulf %20, %21 : vector<16x8xf32>
    %cst_20 = arith.constant dense<0xFF800000> : vector<16xf32>
    %23 = vector.multi_reduction <maximumf>, %19, %cst_20 [1] : vector<16x16xf32> to vector<16xf32>
    %24 = vector.shape_cast %23 : vector<16xf32> to vector<16x1xf32>
    %cst_21 = arith.constant dense<0xFF800000> : vector<16xf32>
    %25 = vector.multi_reduction <maximumf>, %22, %cst_21 [1] : vector<16x8xf32> to vector<16xf32>
    %26 = vector.shape_cast %25 : vector<16xf32> to vector<16x1xf32>
    %27 = arith.maximumf %24, %26 : vector<16x1xf32>
    %28 = vector.broadcast %27 : vector<16x1xf32> to vector<16x16xf32>
    %29 = arith.subf %19, %28 : vector<16x16xf32>
    %30 = math.exp %29 : vector<16x16xf32>
    %31 = vector.broadcast %27 : vector<16x1xf32> to vector<16x8xf32>
    %32 = arith.subf %22, %31 : vector<16x8xf32>
    %33 = math.exp %32 : vector<16x8xf32>
    %cst_22 = arith.constant dense<0.000000e+00> : vector<16xf32>
    %34 = vector.multi_reduction <add>, %30, %cst_22 [1] : vector<16x16xf32> to vector<16xf32>
    %35 = vector.shape_cast %34 : vector<16xf32> to vector<16x1xf32>
    %cst_23 = arith.constant dense<0.000000e+00> : vector<16xf32>
    %36 = vector.multi_reduction <add>, %33, %cst_23 [1] : vector<16x8xf32> to vector<16xf32>
    %37 = vector.shape_cast %36 : vector<16xf32> to vector<16x1xf32>
    %38 = arith.addf %35, %37 : vector<16x1xf32>
    %39 = arith.truncf %33 : vector<16x8xf32> to vector<16x8xbf16>
    %cst_24 = arith.constant dense<0.000000e+00> : vector<16x32xf32>
    %40 = tpu.matmul %39, %14, %cst_24 {dimension_numbers = #tpu.dot_dimension_numbers<[1], [0], [0], [1], [0, 0, 1, 1], [], []>} : vector<16x8xbf16>, vector<8x32xbf16>, vector<16x32xf32> -> vector<16x32xf32>
    %41 = arith.truncf %30 : vector<16x16xf32> to vector<16x16xbf16>
    %cst_25 = arith.constant dense<0.000000e+00> : vector<16x32xf32>
    %42 = tpu.matmul %41, %10, %cst_25 {dimension_numbers = #tpu.dot_dimension_numbers<[1], [0], [0], [1], [0, 0, 1, 1], [], []>} : vector<16x16xbf16>, vector<16x32xbf16>, vector<16x32xf32> -> vector<16x32xf32>
    %43 = arith.addf %40, %42 : vector<16x32xf32>
    %44 = tpu.reciprocal %38 {approx = true} : vector<16x1xf32> -> vector<16x1xf32>
    %45 = vector.broadcast %44 : vector<16x1xf32> to vector<16x32xf32>
    %46 = arith.mulf %43, %45 : vector<16x32xf32>
    %47 = vector.extract_strided_slice %1 {offsets = [0, 32], sizes = [16, 32], strides = [1, 1]} : vector<16x128xbf16> to vector<16x32xbf16>
    %48 = vector.extract_strided_slice %3 {offsets = [0, 32], sizes = [16, 32], strides = [1, 1]} : vector<16x128xbf16> to vector<16x32xbf16>
    %49 = vector.extract_strided_slice %5 {offsets = [0, 32], sizes = [16, 32], strides = [1, 1]} : vector<16x128xbf16> to vector<16x32xbf16>
    %c0_26 = arith.constant 0 : index
    %c1_27 = arith.constant 1 : index
    %c0_28 = arith.constant 0 : index
    %c0_29 = arith.constant 0 : index
    %50 = vector.load %arg2[%c0_26, %c1_27, %c0_28, %c0_29] : memref<1x4x8x32xbf16, #tpu.memory_space<vmem>>, vector<1x1x8x32xbf16>
    %51 = vector.shape_cast %50 : vector<1x1x8x32xbf16> to vector<8x32xbf16>
    %c0_30 = arith.constant 0 : index
    %c1_31 = arith.constant 1 : index
    %c0_32 = arith.constant 0 : index
    %c0_33 = arith.constant 0 : index
    %52 = vector.load %arg3[%c0_30, %c1_31, %c0_32, %c0_33] : memref<1x4x8x32xbf16, #tpu.memory_space<vmem>>, vector<1x1x8x32xbf16>
    %53 = vector.shape_cast %52 : vector<1x1x8x32xbf16> to vector<8x32xbf16>
    %cst_34 = arith.constant dense<0.000000e+00> : vector<16x16xf32>
    %54 = tpu.matmul %47, %48, %cst_34 {dimension_numbers = #tpu.dot_dimension_numbers<[1], [1], [0], [0], [0, 0, 1, 0], [], []>} : vector<16x32xbf16>, vector<16x32xbf16>, vector<16x16xf32> -> vector<16x16xf32>
    %cst_35 = arith.constant 0.176776692 : f32
    %55 = vector.broadcast %cst_35 : f32 to vector<16x16xf32>
    %56 = arith.mulf %54, %55 : vector<16x16xf32>
    %57 = vector.broadcast %7 : vector<1x16xf32> to vector<16x16xf32>
    %58 = arith.addf %56, %57 : vector<16x16xf32>
    %cst_36 = arith.constant dense<0.000000e+00> : vector<16x8xf32>
    %59 = tpu.matmul %47, %51, %cst_36 {dimension_numbers = #tpu.dot_dimension_numbers<[1], [1], [0], [0], [0, 0, 1, 0], [], []>} : vector<16x32xbf16>, vector<8x32xbf16>, vector<16x8xf32> -> vector<16x8xf32>
    %cst_37 = arith.constant 0.176776692 : f32
    %60 = vector.broadcast %cst_37 : f32 to vector<16x8xf32>
    %61 = arith.mulf %59, %60 : vector<16x8xf32>
    %cst_38 = arith.constant dense<0xFF800000> : vector<16xf32>
    %62 = vector.multi_reduction <maximumf>, %58, %cst_38 [1] : vector<16x16xf32> to vector<16xf32>
    %63 = vector.shape_cast %62 : vector<16xf32> to vector<16x1xf32>
    %cst_39 = arith.constant dense<0xFF800000> : vector<16xf32>
    %64 = vector.multi_reduction <maximumf>, %61, %cst_39 [1] : vector<16x8xf32> to vector<16xf32>
    %65 = vector.shape_cast %64 : vector<16xf32> to vector<16x1xf32>
    %66 = arith.maximumf %63, %65 : vector<16x1xf32>
    %67 = vector.broadcast %66 : vector<16x1xf32> to vector<16x16xf32>
    %68 = arith.subf %58, %67 : vector<16x16xf32>
    %69 = math.exp %68 : vector<16x16xf32>
    %70 = vector.broadcast %66 : vector<16x1xf32> to vector<16x8xf32>
    %71 = arith.subf %61, %70 : vector<16x8xf32>
    %72 = math.exp %71 : vector<16x8xf32>
    %cst_40 = arith.constant dense<0.000000e+00> : vector<16xf32>
    %73 = vector.multi_reduction <add>, %69, %cst_40 [1] : vector<16x16xf32> to vector<16xf32>
    %74 = vector.shape_cast %73 : vector<16xf32> to vector<16x1xf32>
    %cst_41 = arith.constant dense<0.000000e+00> : vector<16xf32>
    %75 = vector.multi_reduction <add>, %72, %cst_41 [1] : vector<16x8xf32> to vector<16xf32>
    %76 = vector.shape_cast %75 : vector<16xf32> to vector<16x1xf32>
    %77 = arith.addf %74, %76 : vector<16x1xf32>
    %78 = arith.truncf %72 : vector<16x8xf32> to vector<16x8xbf16>
    %cst_42 = arith.constant dense<0.000000e+00> : vector<16x32xf32>
    %79 = tpu.matmul %78, %53, %cst_42 {dimension_numbers = #tpu.dot_dimension_numbers<[1], [0], [0], [1], [0, 0, 1, 1], [], []>} : vector<16x8xbf16>, vector<8x32xbf16>, vector<16x32xf32> -> vector<16x32xf32>
    %80 = arith.truncf %69 : vector<16x16xf32> to vector<16x16xbf16>
    %cst_43 = arith.constant dense<0.000000e+00> : vector<16x32xf32>
    %81 = tpu.matmul %80, %49, %cst_43 {dimension_numbers = #tpu.dot_dimension_numbers<[1], [0], [0], [1], [0, 0, 1, 1], [], []>} : vector<16x16xbf16>, vector<16x32xbf16>, vector<16x32xf32> -> vector<16x32xf32>
    %82 = arith.addf %79, %81 : vector<16x32xf32>
    %83 = tpu.reciprocal %77 {approx = true} : vector<16x1xf32> -> vector<16x1xf32>
    %84 = vector.broadcast %83 : vector<16x1xf32> to vector<16x32xf32>
    %85 = arith.mulf %82, %84 : vector<16x32xf32>
    %86 = vector.extract_strided_slice %1 {offsets = [0, 64], sizes = [16, 32], strides = [1, 1]} : vector<16x128xbf16> to vector<16x32xbf16>
    %87 = vector.extract_strided_slice %3 {offsets = [0, 64], sizes = [16, 32], strides = [1, 1]} : vector<16x128xbf16> to vector<16x32xbf16>
    %88 = vector.extract_strided_slice %5 {offsets = [0, 64], sizes = [16, 32], strides = [1, 1]} : vector<16x128xbf16> to vector<16x32xbf16>
    %c0_44 = arith.constant 0 : index
    %c2_45 = arith.constant 2 : index
    %c0_46 = arith.constant 0 : index
    %c0_47 = arith.constant 0 : index
    %89 = vector.load %arg2[%c0_44, %c2_45, %c0_46, %c0_47] : memref<1x4x8x32xbf16, #tpu.memory_space<vmem>>, vector<1x1x8x32xbf16>
    %90 = vector.shape_cast %89 : vector<1x1x8x32xbf16> to vector<8x32xbf16>
    %c0_48 = arith.constant 0 : index
    %c2_49 = arith.constant 2 : index
    %c0_50 = arith.constant 0 : index
    %c0_51 = arith.constant 0 : index
    %91 = vector.load %arg3[%c0_48, %c2_49, %c0_50, %c0_51] : memref<1x4x8x32xbf16, #tpu.memory_space<vmem>>, vector<1x1x8x32xbf16>
    %92 = vector.shape_cast %91 : vector<1x1x8x32xbf16> to vector<8x32xbf16>
    %cst_52 = arith.constant dense<0.000000e+00> : vector<16x16xf32>
    %93 = tpu.matmul %86, %87, %cst_52 {dimension_numbers = #tpu.dot_dimension_numbers<[1], [1], [0], [0], [0, 0, 1, 0], [], []>} : vector<16x32xbf16>, vector<16x32xbf16>, vector<16x16xf32> -> vector<16x16xf32>
    %cst_53 = arith.constant 0.176776692 : f32
    %94 = vector.broadcast %cst_53 : f32 to vector<16x16xf32>
    %95 = arith.mulf %93, %94 : vector<16x16xf32>
    %96 = vector.broadcast %7 : vector<1x16xf32> to vector<16x16xf32>
    %97 = arith.addf %95, %96 : vector<16x16xf32>
    %cst_54 = arith.constant dense<0.000000e+00> : vector<16x8xf32>
    %98 = tpu.matmul %86, %90, %cst_54 {dimension_numbers = #tpu.dot_dimension_numbers<[1], [1], [0], [0], [0, 0, 1, 0], [], []>} : vector<16x32xbf16>, vector<8x32xbf16>, vector<16x8xf32> -> vector<16x8xf32>
    %cst_55 = arith.constant 0.176776692 : f32
    %99 = vector.broadcast %cst_55 : f32 to vector<16x8xf32>
    %100 = arith.mulf %98, %99 : vector<16x8xf32>
    %cst_56 = arith.constant dense<0xFF800000> : vector<16xf32>
    %101 = vector.multi_reduction <maximumf>, %97, %cst_56 [1] : vector<16x16xf32> to vector<16xf32>
    %102 = vector.shape_cast %101 : vector<16xf32> to vector<16x1xf32>
    %cst_57 = arith.constant dense<0xFF800000> : vector<16xf32>
    %103 = vector.multi_reduction <maximumf>, %100, %cst_57 [1] : vector<16x8xf32> to vector<16xf32>
    %104 = vector.shape_cast %103 : vector<16xf32> to vector<16x1xf32>
    %105 = arith.maximumf %102, %104 : vector<16x1xf32>
    %106 = vector.broadcast %105 : vector<16x1xf32> to vector<16x16xf32>
    %107 = arith.subf %97, %106 : vector<16x16xf32>
    %108 = math.exp %107 : vector<16x16xf32>
    %109 = vector.broadcast %105 : vector<16x1xf32> to vector<16x8xf32>
    %110 = arith.subf %100, %109 : vector<16x8xf32>
    %111 = math.exp %110 : vector<16x8xf32>
    %cst_58 = arith.constant dense<0.000000e+00> : vector<16xf32>
    %112 = vector.multi_reduction <add>, %108, %cst_58 [1] : vector<16x16xf32> to vector<16xf32>
    %113 = vector.shape_cast %112 : vector<16xf32> to vector<16x1xf32>
    %cst_59 = arith.constant dense<0.000000e+00> : vector<16xf32>
    %114 = vector.multi_reduction <add>, %111, %cst_59 [1] : vector<16x8xf32> to vector<16xf32>
    %115 = vector.shape_cast %114 : vector<16xf32> to vector<16x1xf32>
    %116 = arith.addf %113, %115 : vector<16x1xf32>
    %117 = arith.truncf %111 : vector<16x8xf32> to vector<16x8xbf16>
    %cst_60 = arith.constant dense<0.000000e+00> : vector<16x32xf32>
    %118 = tpu.matmul %117, %92, %cst_60 {dimension_numbers = #tpu.dot_dimension_numbers<[1], [0], [0], [1], [0, 0, 1, 1], [], []>} : vector<16x8xbf16>, vector<8x32xbf16>, vector<16x32xf32> -> vector<16x32xf32>
    %119 = arith.truncf %108 : vector<16x16xf32> to vector<16x16xbf16>
    %cst_61 = arith.constant dense<0.000000e+00> : vector<16x32xf32>
    %120 = tpu.matmul %119, %88, %cst_61 {dimension_numbers = #tpu.dot_dimension_numbers<[1], [0], [0], [1], [0, 0, 1, 1], [], []>} : vector<16x16xbf16>, vector<16x32xbf16>, vector<16x32xf32> -> vector<16x32xf32>
    %121 = arith.addf %118, %120 : vector<16x32xf32>
    %122 = tpu.reciprocal %116 {approx = true} : vector<16x1xf32> -> vector<16x1xf32>
    %123 = vector.broadcast %122 : vector<16x1xf32> to vector<16x32xf32>
    %124 = arith.mulf %121, %123 : vector<16x32xf32>
    %125 = vector.extract_strided_slice %1 {offsets = [0, 96], sizes = [16, 32], strides = [1, 1]} : vector<16x128xbf16> to vector<16x32xbf16>
    %126 = vector.extract_strided_slice %3 {offsets = [0, 96], sizes = [16, 32], strides = [1, 1]} : vector<16x128xbf16> to vector<16x32xbf16>
    %127 = vector.extract_strided_slice %5 {offsets = [0, 96], sizes = [16, 32], strides = [1, 1]} : vector<16x128xbf16> to vector<16x32xbf16>
    %c0_62 = arith.constant 0 : index
    %c3 = arith.constant 3 : index
    %c0_63 = arith.constant 0 : index
    %c0_64 = arith.constant 0 : index
    %128 = vector.load %arg2[%c0_62, %c3, %c0_63, %c0_64] : memref<1x4x8x32xbf16, #tpu.memory_space<vmem>>, vector<1x1x8x32xbf16>
    %129 = vector.shape_cast %128 : vector<1x1x8x32xbf16> to vector<8x32xbf16>
    %c0_65 = arith.constant 0 : index
    %c3_66 = arith.constant 3 : index
    %c0_67 = arith.constant 0 : index
    %c0_68 = arith.constant 0 : index
    %130 = vector.load %arg3[%c0_65, %c3_66, %c0_67, %c0_68] : memref<1x4x8x32xbf16, #tpu.memory_space<vmem>>, vector<1x1x8x32xbf16>
    %131 = vector.shape_cast %130 : vector<1x1x8x32xbf16> to vector<8x32xbf16>
    %cst_69 = arith.constant dense<0.000000e+00> : vector<16x16xf32>
    %132 = tpu.matmul %125, %126, %cst_69 {dimension_numbers = #tpu.dot_dimension_numbers<[1], [1], [0], [0], [0, 0, 1, 0], [], []>} : vector<16x32xbf16>, vector<16x32xbf16>, vector<16x16xf32> -> vector<16x16xf32>
    %cst_70 = arith.constant 0.176776692 : f32
    %133 = vector.broadcast %cst_70 : f32 to vector<16x16xf32>
    %134 = arith.mulf %132, %133 : vector<16x16xf32>
    %135 = vector.broadcast %7 : vector<1x16xf32> to vector<16x16xf32>
    %136 = arith.addf %134, %135 : vector<16x16xf32>
    %cst_71 = arith.constant dense<0.000000e+00> : vector<16x8xf32>
    %137 = tpu.matmul %125, %129, %cst_71 {dimension_numbers = #tpu.dot_dimension_numbers<[1], [1], [0], [0], [0, 0, 1, 0], [], []>} : vector<16x32xbf16>, vector<8x32xbf16>, vector<16x8xf32> -> vector<16x8xf32>
    %cst_72 = arith.constant 0.176776692 : f32
    %138 = vector.broadcast %cst_72 : f32 to vector<16x8xf32>
    %139 = arith.mulf %137, %138 : vector<16x8xf32>
    %cst_73 = arith.constant dense<0xFF800000> : vector<16xf32>
    %140 = vector.multi_reduction <maximumf>, %136, %cst_73 [1] : vector<16x16xf32> to vector<16xf32>
    %141 = vector.shape_cast %140 : vector<16xf32> to vector<16x1xf32>
    %cst_74 = arith.constant dense<0xFF800000> : vector<16xf32>
    %142 = vector.multi_reduction <maximumf>, %139, %cst_74 [1] : vector<16x8xf32> to vector<16xf32>
    %143 = vector.shape_cast %142 : vector<16xf32> to vector<16x1xf32>
    %144 = arith.maximumf %141, %143 : vector<16x1xf32>
    %145 = vector.broadcast %144 : vector<16x1xf32> to vector<16x16xf32>
    %146 = arith.subf %136, %145 : vector<16x16xf32>
    %147 = math.exp %146 : vector<16x16xf32>
    %148 = vector.broadcast %144 : vector<16x1xf32> to vector<16x8xf32>
    %149 = arith.subf %139, %148 : vector<16x8xf32>
    %150 = math.exp %149 : vector<16x8xf32>
    %cst_75 = arith.constant dense<0.000000e+00> : vector<16xf32>
    %151 = vector.multi_reduction <add>, %147, %cst_75 [1] : vector<16x16xf32> to vector<16xf32>
    %152 = vector.shape_cast %151 : vector<16xf32> to vector<16x1xf32>
    %cst_76 = arith.constant dense<0.000000e+00> : vector<16xf32>
    %153 = vector.multi_reduction <add>, %150, %cst_76 [1] : vector<16x8xf32> to vector<16xf32>
    %154 = vector.shape_cast %153 : vector<16xf32> to vector<16x1xf32>
    %155 = arith.addf %152, %154 : vector<16x1xf32>
    %156 = arith.truncf %150 : vector<16x8xf32> to vector<16x8xbf16>
    %cst_77 = arith.constant dense<0.000000e+00> : vector<16x32xf32>
    %157 = tpu.matmul %156, %131, %cst_77 {dimension_numbers = #tpu.dot_dimension_numbers<[1], [0], [0], [1], [0, 0, 1, 1], [], []>} : vector<16x8xbf16>, vector<8x32xbf16>, vector<16x32xf32> -> vector<16x32xf32>
    %158 = arith.truncf %147 : vector<16x16xf32> to vector<16x16xbf16>
    %cst_78 = arith.constant dense<0.000000e+00> : vector<16x32xf32>
    %159 = tpu.matmul %158, %127, %cst_78 {dimension_numbers = #tpu.dot_dimension_numbers<[1], [0], [0], [1], [0, 0, 1, 1], [], []>} : vector<16x16xbf16>, vector<16x32xbf16>, vector<16x32xf32> -> vector<16x32xf32>
    %160 = arith.addf %157, %159 : vector<16x32xf32>
    %161 = tpu.reciprocal %155 {approx = true} : vector<16x1xf32> -> vector<16x1xf32>
    %162 = vector.broadcast %161 : vector<16x1xf32> to vector<16x32xf32>
    %163 = arith.mulf %160, %162 : vector<16x32xf32>
    %164 = tpu.concatenate %46, %85, %124, %163 in 1 : vector<16x32xf32>, vector<16x32xf32>, vector<16x32xf32>, vector<16x32xf32> -> vector<16x128xf32>
    %165 = arith.truncf %164 : vector<16x128xf32> to vector<16x128xbf16>
    %c0_79 = arith.constant 0 : index
    %c0_80 = arith.constant 0 : index
    %166 = vector.load %arg5[%c0_79, %c0_80] : memref<128x128xbf16, #tpu.memory_space<vmem>>, vector<128x128xbf16>
    %cst_81 = arith.constant dense<0.000000e+00> : vector<16x128xf32>
    %167 = tpu.matmul %165, %166, %cst_81 {dimension_numbers = #tpu.dot_dimension_numbers<[1], [0], [0], [1], [0, 0, 1, 1], [], []>} : vector<16x128xbf16>, vector<128x128xbf16>, vector<16x128xf32> -> vector<16x128xf32>
    %c0_82 = arith.constant 0 : index
    %c0_83 = arith.constant 0 : index
    %168 = vector.load %arg6[%c0_82, %c0_83] : memref<1x128xbf16, #tpu.memory_space<vmem>>, vector<1x128xbf16>
    %169 = arith.extf %168 : vector<1x128xbf16> to vector<1x128xf32>
    %170 = vector.broadcast %169 : vector<1x128xf32> to vector<16x128xf32>
    %171 = arith.addf %167, %170 : vector<16x128xf32>
    %c0_84 = arith.constant 0 : index
    %c0_85 = arith.constant 0 : index
    %172 = vector.load %arg7[%c0_84, %c0_85] : memref<16x128xbf16, #tpu.memory_space<vmem>>, vector<16x128xbf16>
    %173 = arith.extf %172 : vector<16x128xbf16> to vector<16x128xf32>
    %174 = arith.addf %171, %173 : vector<16x128xf32>
    %cst_86 = arith.constant dense<0.000000e+00> : vector<16xf32>
    %175 = vector.multi_reduction <add>, %174, %cst_86 [1] : vector<16x128xf32> to vector<16xf32>
    %176 = vector.shape_cast %175 : vector<16xf32> to vector<16x1xf32>
    %cst_87 = arith.constant 1.280000e+02 : f32
    %177 = vector.broadcast %cst_87 : f32 to vector<16x1xf32>
    %178 = arith.divf %176, %177 : vector<16x1xf32>
    %179 = vector.broadcast %178 : vector<16x1xf32> to vector<16x128xf32>
    %180 = arith.subf %174, %179 : vector<16x128xf32>
    %181 = arith.mulf %180, %180 : vector<16x128xf32>
    %cst_88 = arith.constant dense<0.000000e+00> : vector<16xf32>
    %182 = vector.multi_reduction <add>, %181, %cst_88 [1] : vector<16x128xf32> to vector<16xf32>
    %183 = vector.shape_cast %182 : vector<16xf32> to vector<16x1xf32>
    %cst_89 = arith.constant 1.280000e+02 : f32
    %184 = vector.broadcast %cst_89 : f32 to vector<16x1xf32>
    %185 = arith.divf %183, %184 : vector<16x1xf32>
    %186 = vector.broadcast %178 : vector<16x1xf32> to vector<16x128xf32>
    %187 = arith.subf %174, %186 : vector<16x128xf32>
    %cst_90 = arith.constant 9.99999974E-6 : f32
    %188 = vector.broadcast %cst_90 : f32 to vector<16x1xf32>
    %189 = arith.addf %185, %188 : vector<16x1xf32>
    %190 = math.rsqrt %189 : vector<16x1xf32>
    %191 = vector.broadcast %190 : vector<16x1xf32> to vector<16x128xf32>
    %192 = arith.mulf %187, %191 : vector<16x128xf32>
    %c0_91 = arith.constant 0 : index
    %c0_92 = arith.constant 0 : index
    %193 = vector.load %arg8[%c0_91, %c0_92] : memref<1x128xbf16, #tpu.memory_space<vmem>>, vector<1x128xbf16>
    %194 = arith.extf %193 : vector<1x128xbf16> to vector<1x128xf32>
    %195 = vector.broadcast %194 : vector<1x128xf32> to vector<16x128xf32>
    %196 = arith.mulf %192, %195 : vector<16x128xf32>
    %c0_93 = arith.constant 0 : index
    %c0_94 = arith.constant 0 : index
    %197 = vector.load %arg9[%c0_93, %c0_94] : memref<1x128xbf16, #tpu.memory_space<vmem>>, vector<1x128xbf16>
    %198 = arith.extf %197 : vector<1x128xbf16> to vector<1x128xf32>
    %199 = vector.broadcast %198 : vector<1x128xf32> to vector<16x128xf32>
    %200 = arith.addf %196, %199 : vector<16x128xf32>
    %201 = arith.truncf %200 : vector<16x128xf32> to vector<16x128xbf16>
    %c0_95 = arith.constant 0 : index
    %c0_96 = arith.constant 0 : index
    %202 = vector.load %arg10[%c0_95, %c0_96] : memref<16x128xbf16, #tpu.memory_space<vmem>>, vector<16x128xbf16>
    tpu.vector_store %arg10[%c0_95, %c0_96], %201 {strides = array<i32>} : memref<16x128xbf16, #tpu.memory_space<vmem>>, vector<16x128xbf16>,
    return
  }
  func.func @transform_0(%arg0: i32) -> (i32, i32, i32) {
    %c0_i32 = arith.constant 0 : i32
    %c0_i32_0 = arith.constant 0 : i32
    %c0_i32_1 = arith.constant 0 : i32
    return %c0_i32, %arg0, %c0_i32_0 : i32, i32, i32
  }
  func.func @transform_1(%arg0: i32) -> (i32, i32, i32, i32) {
    %c0_i32 = arith.constant 0 : i32
    %c0_i32_0 = arith.constant 0 : i32
    %c0_i32_1 = arith.constant 0 : i32
    %c0_i32_2 = arith.constant 0 : i32
    return %arg0, %c0_i32, %c0_i32_0, %c0_i32_1 : i32, i32, i32, i32
  }
  func.func @transform_2(%arg0: i32) -> (i32, i32, i32, i32) {
    %c0_i32 = arith.constant 0 : i32
    %c0_i32_0 = arith.constant 0 : i32
    %c0_i32_1 = arith.constant 0 : i32
    %c0_i32_2 = arith.constant 0 : i32
    return %arg0, %c0_i32, %c0_i32_0, %c0_i32_1 : i32, i32, i32, i32
  }
  func.func @transform_3(%arg0: i32) -> (i32, i32, i32) {
    %c0_i32 = arith.constant 0 : i32
    %c0_i32_0 = arith.constant 0 : i32
    %c0_i32_1 = arith.constant 0 : i32
    return %arg0, %c0_i32, %c0_i32_0 : i32, i32, i32
  }
  func.func @transform_4(%arg0: i32) -> (i32, i32) {
    %c0_i32 = arith.constant 0 : i32
    %c0_i32_0 = arith.constant 0 : i32
    %c0_i32_1 = arith.constant 0 : i32
    return %c0_i32, %c0_i32_0 : i32, i32
  }
  func.func @transform_5(%arg0: i32) -> (i32, i32) {
    %c0_i32 = arith.constant 0 : i32
    %c0_i32_0 = arith.constant 0 : i32
    %c0_i32_1 = arith.constant 0 : i32
    return %c0_i32, %c0_i32_0 : i32, i32
  }
  func.func @transform_6(%arg0: i32) -> (i32, i32) {
    %c0_i32 = arith.constant 0 : i32
    %c0_i32_0 = arith.constant 0 : i32
    return %arg0, %c0_i32 : i32, i32
  }
  func.func @transform_7(%arg0: i32) -> (i32, i32) {
    %c0_i32 = arith.constant 0 : i32
    %c0_i32_0 = arith.constant 0 : i32
    %c0_i32_1 = arith.constant 0 : i32
    return %c0_i32, %c0_i32_0 : i32, i32
  }
  func.func @transform_8(%arg0: i32) -> (i32, i32) {
    %c0_i32 = arith.constant 0 : i32
    %c0_i32_0 = arith.constant 0 : i32
    %c0_i32_1 = arith.constant 0 : i32
    return %c0_i32, %c0_i32_0 : i32, i32
  }
  func.func @transform_9(%arg0: i32) -> (i32, i32) {
    %c0_i32 = arith.constant 0 : i32
    %c0_i32_0 = arith.constant 0 : i32
    return %arg0, %c0_i32 : i32, i32
  }
}

module attributes {stable_mosaic.version = 11 : i64} {
  func.func @_matmul_res_ln_kernel(%arg0: i32, %arg1: i32, %arg2: memref<32x256xbf16, #tpu.memory_space<vmem>>, %arg3: memref<256x128xbf16, #tpu.memory_space<vmem>>, %arg4: memref<1x128xbf16, #tpu.memory_space<vmem>>, %arg5: memref<32x128xbf16, #tpu.memory_space<vmem>>, %arg6: memref<1x128xbf16, #tpu.memory_space<vmem>>, %arg7: memref<1x128xbf16, #tpu.memory_space<vmem>>, %arg8: memref<32x128xbf16, #tpu.memory_space<vmem>>, %arg9: memref<32x128xf32, #tpu.memory_space<vmem>>) attributes {dimension_semantics = [#tpu.dimension_semantics<parallel>, #tpu.dimension_semantics<arbitrary>], iteration_bounds = array<i64: 1, 1>, scalar_prefetch = 0 : i64, scratch_operands = 1 : i64, tpu.core_type = #tpu.core_type<tc>, window_params = [{transform_indices = @transform_0, window_bounds = array<i64: 32, 256>}, {transform_indices = @transform_1, window_bounds = array<i64: 256, 128>}, {pipeline_mode = #tpu.pipeline_mode<synchronous>, transform_indices = @transform_2, window_bounds = array<i64: 1, 128>}, {transform_indices = @transform_3, window_bounds = array<i64: 32, 128>}, {pipeline_mode = #tpu.pipeline_mode<synchronous>, transform_indices = @transform_4, window_bounds = array<i64: 1, 128>}, {pipeline_mode = #tpu.pipeline_mode<synchronous>, transform_indices = @transform_5, window_bounds = array<i64: 1, 128>}, {transform_indices = @transform_6, window_bounds = array<i64: 32, 128>}]} {
    %c0_i32 = arith.constant 0 : i32
    %0 = arith.cmpi eq, %arg1, %c0_i32 : i32
    %1 = arith.extui %0 : i1 to i32
    %c0_i32_0 = arith.constant 0 : i32
    %2 = arith.cmpi ne, %1, %c0_i32_0 : i32
    scf.if %2 {
      %cst_10 = arith.constant 0.000000e+00 : f32
      %12 = vector.broadcast %cst_10 : f32 to vector<32x128xf32>
      %c0_11 = arith.constant 0 : index
      %c0_12 = arith.constant 0 : index
      %13 = vector.load %arg9[%c0_11, %c0_12] : memref<32x128xf32, #tpu.memory_space<vmem>>, vector<32x128xf32>
      tpu.vector_store %arg9[%c0_11, %c0_12], %12 {strides = array<i32>} : memref<32x128xf32, #tpu.memory_space<vmem>>, vector<32x128xf32>,
    } else {
    }
    %c0 = arith.constant 0 : index
    %c0_1 = arith.constant 0 : index
    %3 = vector.load %arg9[%c0, %c0_1] : memref<32x128xf32, #tpu.memory_space<vmem>>, vector<32x128xf32>
    %c0_2 = arith.constant 0 : index
    %c0_3 = arith.constant 0 : index
    %4 = vector.load %arg2[%c0_2, %c0_3] : memref<32x256xbf16, #tpu.memory_space<vmem>>, vector<32x256xbf16>
    %c0_4 = arith.constant 0 : index
    %c0_5 = arith.constant 0 : index
    %5 = vector.load %arg3[%c0_4, %c0_5] : memref<256x128xbf16, #tpu.memory_space<vmem>>, vector<256x128xbf16>
    %cst = arith.constant dense<0.000000e+00> : vector<32x128xf32>
    %6 = tpu.matmul %4, %5, %cst {dimension_numbers = #tpu.dot_dimension_numbers<[1], [0], [0], [1], [0, 0, 1, 1], [], []>} : vector<32x256xbf16>, vector<256x128xbf16>, vector<32x128xf32> -> vector<32x128xf32>
    %7 = arith.addf %3, %6 : vector<32x128xf32>
    %c0_6 = arith.constant 0 : index
    %c0_7 = arith.constant 0 : index
    %8 = vector.load %arg9[%c0_6, %c0_7] : memref<32x128xf32, #tpu.memory_space<vmem>>, vector<32x128xf32>
    tpu.vector_store %arg9[%c0_6, %c0_7], %7 {strides = array<i32>} : memref<32x128xf32, #tpu.memory_space<vmem>>, vector<32x128xf32>,
    %c0_i32_8 = arith.constant 0 : i32
    %9 = arith.cmpi eq, %arg1, %c0_i32_8 : i32
    %10 = arith.extui %9 : i1 to i32
    %c0_i32_9 = arith.constant 0 : i32
    %11 = arith.cmpi ne, %10, %c0_i32_9 : i32
    scf.if %11 {
      %c0_10 = arith.constant 0 : index
      %c0_11 = arith.constant 0 : index
      %12 = vector.load %arg9[%c0_10, %c0_11] : memref<32x128xf32, #tpu.memory_space<vmem>>, vector<32x128xf32>
      %c0_12 = arith.constant 0 : index
      %c0_13 = arith.constant 0 : index
      %13 = vector.load %arg4[%c0_12, %c0_13] : memref<1x128xbf16, #tpu.memory_space<vmem>>, vector<1x128xbf16>
      %14 = arith.extf %13 : vector<1x128xbf16> to vector<1x128xf32>
      %15 = vector.broadcast %14 : vector<1x128xf32> to vector<32x128xf32>
      %16 = arith.addf %12, %15 : vector<32x128xf32>
      %c0_14 = arith.constant 0 : index
      %c0_15 = arith.constant 0 : index
      %17 = vector.load %arg5[%c0_14, %c0_15] : memref<32x128xbf16, #tpu.memory_space<vmem>>, vector<32x128xbf16>
      %18 = arith.extf %17 : vector<32x128xbf16> to vector<32x128xf32>
      %19 = arith.addf %16, %18 : vector<32x128xf32>
      %cst_16 = arith.constant dense<0.000000e+00> : vector<32xf32>
      %20 = vector.multi_reduction <add>, %19, %cst_16 [1] : vector<32x128xf32> to vector<32xf32>
      %21 = vector.shape_cast %20 : vector<32xf32> to vector<32x1xf32>
      %cst_17 = arith.constant 1.280000e+02 : f32
      %22 = vector.broadcast %cst_17 : f32 to vector<32x1xf32>
      %23 = arith.divf %21, %22 : vector<32x1xf32>
      %24 = vector.broadcast %23 : vector<32x1xf32> to vector<32x128xf32>
      %25 = arith.subf %19, %24 : vector<32x128xf32>
      %26 = arith.mulf %25, %25 : vector<32x128xf32>
      %cst_18 = arith.constant dense<0.000000e+00> : vector<32xf32>
      %27 = vector.multi_reduction <add>, %26, %cst_18 [1] : vector<32x128xf32> to vector<32xf32>
      %28 = vector.shape_cast %27 : vector<32xf32> to vector<32x1xf32>
      %cst_19 = arith.constant 1.280000e+02 : f32
      %29 = vector.broadcast %cst_19 : f32 to vector<32x1xf32>
      %30 = arith.divf %28, %29 : vector<32x1xf32>
      %31 = vector.broadcast %23 : vector<32x1xf32> to vector<32x128xf32>
      %32 = arith.subf %19, %31 : vector<32x128xf32>
      %cst_20 = arith.constant 9.99999974E-6 : f32
      %33 = vector.broadcast %cst_20 : f32 to vector<32x1xf32>
      %34 = arith.addf %30, %33 : vector<32x1xf32>
      %35 = math.rsqrt %34 : vector<32x1xf32>
      %36 = vector.broadcast %35 : vector<32x1xf32> to vector<32x128xf32>
      %37 = arith.mulf %32, %36 : vector<32x128xf32>
      %c0_21 = arith.constant 0 : index
      %c0_22 = arith.constant 0 : index
      %38 = vector.load %arg6[%c0_21, %c0_22] : memref<1x128xbf16, #tpu.memory_space<vmem>>, vector<1x128xbf16>
      %39 = arith.extf %38 : vector<1x128xbf16> to vector<1x128xf32>
      %40 = vector.broadcast %39 : vector<1x128xf32> to vector<32x128xf32>
      %41 = arith.mulf %37, %40 : vector<32x128xf32>
      %c0_23 = arith.constant 0 : index
      %c0_24 = arith.constant 0 : index
      %42 = vector.load %arg7[%c0_23, %c0_24] : memref<1x128xbf16, #tpu.memory_space<vmem>>, vector<1x128xbf16>
      %43 = arith.extf %42 : vector<1x128xbf16> to vector<1x128xf32>
      %44 = vector.broadcast %43 : vector<1x128xf32> to vector<32x128xf32>
      %45 = arith.addf %41, %44 : vector<32x128xf32>
      %46 = arith.truncf %45 : vector<32x128xf32> to vector<32x128xbf16>
      %c0_25 = arith.constant 0 : index
      %c0_26 = arith.constant 0 : index
      %47 = vector.load %arg8[%c0_25, %c0_26] : memref<32x128xbf16, #tpu.memory_space<vmem>>, vector<32x128xbf16>
      tpu.vector_store %arg8[%c0_25, %c0_26], %46 {strides = array<i32>} : memref<32x128xbf16, #tpu.memory_space<vmem>>, vector<32x128xbf16>,
    } else {
    }
    return
  }
  func.func @transform_0(%arg0: i32, %arg1: i32) -> (i32, i32) {
    %c0_i32 = arith.constant 0 : i32
    return %arg0, %arg1 : i32, i32
  }
  func.func @transform_1(%arg0: i32, %arg1: i32) -> (i32, i32) {
    %c0_i32 = arith.constant 0 : i32
    %c0_i32_0 = arith.constant 0 : i32
    return %arg1, %c0_i32 : i32, i32
  }
  func.func @transform_2(%arg0: i32, %arg1: i32) -> (i32, i32) {
    %c0_i32 = arith.constant 0 : i32
    %c0_i32_0 = arith.constant 0 : i32
    %c0_i32_1 = arith.constant 0 : i32
    return %c0_i32, %c0_i32_0 : i32, i32
  }
  func.func @transform_3(%arg0: i32, %arg1: i32) -> (i32, i32) {
    %c0_i32 = arith.constant 0 : i32
    %c0_i32_0 = arith.constant 0 : i32
    return %arg0, %c0_i32 : i32, i32
  }
  func.func @transform_4(%arg0: i32, %arg1: i32) -> (i32, i32) {
    %c0_i32 = arith.constant 0 : i32
    %c0_i32_0 = arith.constant 0 : i32
    %c0_i32_1 = arith.constant 0 : i32
    return %c0_i32, %c0_i32_0 : i32, i32
  }
  func.func @transform_5(%arg0: i32, %arg1: i32) -> (i32, i32) {
    %c0_i32 = arith.constant 0 : i32
    %c0_i32_0 = arith.constant 0 : i32
    %c0_i32_1 = arith.constant 0 : i32
    return %c0_i32, %c0_i32_0 : i32, i32
  }
  func.func @transform_6(%arg0: i32, %arg1: i32) -> (i32, i32) {
    %c0_i32 = arith.constant 0 : i32
    %c0_i32_0 = arith.constant 0 : i32
    return %arg0, %c0_i32 : i32, i32
  }
}

module attributes {stable_mosaic.version = 11 : i64} {
  func.func @_matmul_kernel(%arg0: i32, %arg1: i32, %arg2: i32, %arg3: i32, %arg4: memref<32x128xbf16, #tpu.memory_space<vmem>>, %arg5: memref<1x128x256xbf16, #tpu.memory_space<vmem>>, %arg6: memref<1x1x256xbf16, #tpu.memory_space<vmem>>, %arg7: memref<1x32x256xbf16, #tpu.memory_space<vmem>>, %arg8: memref<32x256xf32, #tpu.memory_space<vmem>>) attributes {dimension_semantics = [#tpu.dimension_semantics<parallel>, #tpu.dimension_semantics<parallel>, #tpu.dimension_semantics<parallel>, #tpu.dimension_semantics<arbitrary>], iteration_bounds = array<i64: 1, 1, 1, 1>, scalar_prefetch = 0 : i64, scratch_operands = 1 : i64, tpu.core_type = #tpu.core_type<tc>, window_params = [{transform_indices = @transform_0, window_bounds = array<i64: 32, 128>}, {transform_indices = @transform_1, window_bounds = array<i64: 1, 128, 256>}, {transform_indices = @transform_2, window_bounds = array<i64: 1, 1, 256>}, {transform_indices = @transform_3, window_bounds = array<i64: 1, 32, 256>}]} {
    %c0_i32 = arith.constant 0 : i32
    %0 = arith.cmpi eq, %arg3, %c0_i32 : i32
    %1 = arith.extui %0 : i1 to i32
    %c0_i32_0 = arith.constant 0 : i32
    %2 = arith.cmpi ne, %1, %c0_i32_0 : i32
    scf.if %2 {
      %cst_11 = arith.constant 0.000000e+00 : f32
      %13 = vector.broadcast %cst_11 : f32 to vector<32x256xf32>
      %c0_12 = arith.constant 0 : index
      %c0_13 = arith.constant 0 : index
      %14 = vector.load %arg8[%c0_12, %c0_13] : memref<32x256xf32, #tpu.memory_space<vmem>>, vector<32x256xf32>
      tpu.vector_store %arg8[%c0_12, %c0_13], %13 {strides = array<i32>} : memref<32x256xf32, #tpu.memory_space<vmem>>, vector<32x256xf32>,
    } else {
    }
    %c0 = arith.constant 0 : index
    %c0_1 = arith.constant 0 : index
    %3 = vector.load %arg8[%c0, %c0_1] : memref<32x256xf32, #tpu.memory_space<vmem>>, vector<32x256xf32>
    %c0_2 = arith.constant 0 : index
    %c0_3 = arith.constant 0 : index
    %4 = vector.load %arg4[%c0_2, %c0_3] : memref<32x128xbf16, #tpu.memory_space<vmem>>, vector<32x128xbf16>
    %c0_4 = arith.constant 0 : index
    %c0_5 = arith.constant 0 : index
    %c0_6 = arith.constant 0 : index
    %5 = vector.load %arg5[%c0_4, %c0_5, %c0_6] : memref<1x128x256xbf16, #tpu.memory_space<vmem>>, vector<1x128x256xbf16>
    %6 = vector.shape_cast %5 : vector<1x128x256xbf16> to vector<128x256xbf16>
    %cst = arith.constant dense<0.000000e+00> : vector<32x256xf32>
    %7 = tpu.matmul %4, %6, %cst {dimension_numbers = #tpu.dot_dimension_numbers<[1], [0], [0], [1], [0, 0, 1, 1], [], []>} : vector<32x128xbf16>, vector<128x256xbf16>, vector<32x256xf32> -> vector<32x256xf32>
    %8 = arith.addf %3, %7 : vector<32x256xf32>
    %c0_7 = arith.constant 0 : index
    %c0_8 = arith.constant 0 : index
    %9 = vector.load %arg8[%c0_7, %c0_8] : memref<32x256xf32, #tpu.memory_space<vmem>>, vector<32x256xf32>
    tpu.vector_store %arg8[%c0_7, %c0_8], %8 {strides = array<i32>} : memref<32x256xf32, #tpu.memory_space<vmem>>, vector<32x256xf32>,
    %c0_i32_9 = arith.constant 0 : i32
    %10 = arith.cmpi eq, %arg3, %c0_i32_9 : i32
    %11 = arith.extui %10 : i1 to i32
    %c0_i32_10 = arith.constant 0 : i32
    %12 = arith.cmpi ne, %11, %c0_i32_10 : i32
    scf.if %12 {
      %c0_11 = arith.constant 0 : index
      %c0_12 = arith.constant 0 : index
      %13 = vector.load %arg8[%c0_11, %c0_12] : memref<32x256xf32, #tpu.memory_space<vmem>>, vector<32x256xf32>
      %c0_13 = arith.constant 0 : index
      %c0_14 = arith.constant 0 : index
      %c0_15 = arith.constant 0 : index
      %14 = vector.load %arg6[%c0_13, %c0_14, %c0_15] : memref<1x1x256xbf16, #tpu.memory_space<vmem>>, vector<1x1x256xbf16>
      %15 = vector.shape_cast %14 : vector<1x1x256xbf16> to vector<1x256xbf16>
      %16 = arith.extf %15 : vector<1x256xbf16> to vector<1x256xf32>
      %17 = vector.broadcast %16 : vector<1x256xf32> to vector<32x256xf32>
      %18 = arith.addf %13, %17 : vector<32x256xf32>
      %19 = arith.mulf %18, %18 : vector<32x256xf32>
      %20 = arith.mulf %18, %19 : vector<32x256xf32>
      %cst_16 = arith.constant 4.471500e-02 : f32
      %21 = vector.broadcast %cst_16 : f32 to vector<32x256xf32>
      %22 = arith.mulf %21, %20 : vector<32x256xf32>
      %23 = arith.addf %18, %22 : vector<32x256xf32>
      %cst_17 = arith.constant 0.797884583 : f32
      %24 = vector.broadcast %cst_17 : f32 to vector<32x256xf32>
      %25 = arith.mulf %24, %23 : vector<32x256xf32>
      %26 = math.tanh %25 : vector<32x256xf32>
      %cst_18 = arith.constant 1.000000e+00 : f32
      %27 = vector.broadcast %cst_18 : f32 to vector<32x256xf32>
      %28 = arith.addf %27, %26 : vector<32x256xf32>
      %cst_19 = arith.constant 5.000000e-01 : f32
      %29 = vector.broadcast %cst_19 : f32 to vector<32x256xf32>
      %30 = arith.mulf %29, %28 : vector<32x256xf32>
      %31 = arith.mulf %18, %30 : vector<32x256xf32>
      %32 = arith.truncf %31 : vector<32x256xf32> to vector<32x256xbf16>
      %c0_20 = arith.constant 0 : index
      %c0_21 = arith.constant 0 : index
      %c0_22 = arith.constant 0 : index
      %33 = vector.load %arg7[%c0_20, %c0_21, %c0_22] : memref<1x32x256xbf16, #tpu.memory_space<vmem>>, vector<1x32x256xbf16>
      %34 = vector.shape_cast %33 : vector<1x32x256xbf16> to vector<32x256xbf16>
      %35 = vector.shape_cast %32 : vector<32x256xbf16> to vector<1x32x256xbf16>
      tpu.vector_store %arg7[%c0_20, %c0_21, %c0_22], %35 {strides = array<i32>} : memref<1x32x256xbf16, #tpu.memory_space<vmem>>, vector<1x32x256xbf16>,
    } else {
    }
    return
  }
  func.func @transform_0(%arg0: i32, %arg1: i32, %arg2: i32, %arg3: i32) -> (i32, i32) {
    %c0_i32 = arith.constant 0 : i32
    return %arg1, %arg3 : i32, i32
  }
  func.func @transform_1(%arg0: i32, %arg1: i32, %arg2: i32, %arg3: i32) -> (i32, i32, i32) {
    %c0_i32 = arith.constant 0 : i32
    return %arg0, %arg3, %arg2 : i32, i32, i32
  }
  func.func @transform_2(%arg0: i32, %arg1: i32, %arg2: i32, %arg3: i32) -> (i32, i32, i32) {
    %c0_i32 = arith.constant 0 : i32
    %c0_i32_0 = arith.constant 0 : i32
    return %arg0, %c0_i32, %arg2 : i32, i32, i32
  }
  func.func @transform_3(%arg0: i32, %arg1: i32, %arg2: i32, %arg3: i32) -> (i32, i32, i32) {
    %c0_i32 = arith.constant 0 : i32
    return %arg0, %arg1, %arg2 : i32, i32, i32
  }
}

module attributes {stable_mosaic.version = 11 : i64} {
  func.func @_matmul_kernel(%arg0: i32, %arg1: i32, %arg2: i32, %arg3: i32, %arg4: memref<32x128xbf16, #tpu.memory_space<vmem>>, %arg5: memref<1x128x256xbf16, #tpu.memory_space<vmem>>, %arg6: memref<1x1x256xbf16, #tpu.memory_space<vmem>>, %arg7: memref<1x32x256xf32, #tpu.memory_space<vmem>>, %arg8: memref<32x256xf32, #tpu.memory_space<vmem>>) attributes {dimension_semantics = [#tpu.dimension_semantics<parallel>, #tpu.dimension_semantics<parallel>, #tpu.dimension_semantics<parallel>, #tpu.dimension_semantics<arbitrary>], iteration_bounds = array<i64: 1, 1, 3, 1>, scalar_prefetch = 0 : i64, scratch_operands = 1 : i64, tpu.core_type = #tpu.core_type<tc>, window_params = [{transform_indices = @transform_0, window_bounds = array<i64: 32, 128>}, {transform_indices = @transform_1, window_bounds = array<i64: 1, 128, 256>}, {transform_indices = @transform_2, window_bounds = array<i64: 1, 1, 256>}, {transform_indices = @transform_3, window_bounds = array<i64: 1, 32, 256>}]} {
    %c0_i32 = arith.constant 0 : i32
    %0 = arith.cmpi eq, %arg3, %c0_i32 : i32
    %1 = arith.extui %0 : i1 to i32
    %c0_i32_0 = arith.constant 0 : i32
    %2 = arith.cmpi ne, %1, %c0_i32_0 : i32
    scf.if %2 {
      %cst_11 = arith.constant 0.000000e+00 : f32
      %13 = vector.broadcast %cst_11 : f32 to vector<32x256xf32>
      %c0_12 = arith.constant 0 : index
      %c0_13 = arith.constant 0 : index
      %14 = vector.load %arg8[%c0_12, %c0_13] : memref<32x256xf32, #tpu.memory_space<vmem>>, vector<32x256xf32>
      tpu.vector_store %arg8[%c0_12, %c0_13], %13 {strides = array<i32>} : memref<32x256xf32, #tpu.memory_space<vmem>>, vector<32x256xf32>,
    } else {
    }
    %c0 = arith.constant 0 : index
    %c0_1 = arith.constant 0 : index
    %3 = vector.load %arg8[%c0, %c0_1] : memref<32x256xf32, #tpu.memory_space<vmem>>, vector<32x256xf32>
    %c0_2 = arith.constant 0 : index
    %c0_3 = arith.constant 0 : index
    %4 = vector.load %arg4[%c0_2, %c0_3] : memref<32x128xbf16, #tpu.memory_space<vmem>>, vector<32x128xbf16>
    %c0_4 = arith.constant 0 : index
    %c0_5 = arith.constant 0 : index
    %c0_6 = arith.constant 0 : index
    %5 = vector.load %arg5[%c0_4, %c0_5, %c0_6] : memref<1x128x256xbf16, #tpu.memory_space<vmem>>, vector<1x128x256xbf16>
    %6 = vector.shape_cast %5 : vector<1x128x256xbf16> to vector<128x256xbf16>
    %cst = arith.constant dense<0.000000e+00> : vector<32x256xf32>
    %7 = tpu.matmul %4, %6, %cst {dimension_numbers = #tpu.dot_dimension_numbers<[1], [0], [0], [1], [0, 0, 1, 1], [], []>} : vector<32x128xbf16>, vector<128x256xbf16>, vector<32x256xf32> -> vector<32x256xf32>
    %8 = arith.addf %3, %7 : vector<32x256xf32>
    %c0_7 = arith.constant 0 : index
    %c0_8 = arith.constant 0 : index
    %9 = vector.load %arg8[%c0_7, %c0_8] : memref<32x256xf32, #tpu.memory_space<vmem>>, vector<32x256xf32>
    tpu.vector_store %arg8[%c0_7, %c0_8], %8 {strides = array<i32>} : memref<32x256xf32, #tpu.memory_space<vmem>>, vector<32x256xf32>,
    %c0_i32_9 = arith.constant 0 : i32
    %10 = arith.cmpi eq, %arg3, %c0_i32_9 : i32
    %11 = arith.extui %10 : i1 to i32
    %c0_i32_10 = arith.constant 0 : i32
    %12 = arith.cmpi ne, %11, %c0_i32_10 : i32
    scf.if %12 {
      %c0_11 = arith.constant 0 : index
      %c0_12 = arith.constant 0 : index
      %13 = vector.load %arg8[%c0_11, %c0_12] : memref<32x256xf32, #tpu.memory_space<vmem>>, vector<32x256xf32>
      %c0_13 = arith.constant 0 : index
      %c0_14 = arith.constant 0 : index
      %c0_15 = arith.constant 0 : index
      %14 = vector.load %arg6[%c0_13, %c0_14, %c0_15] : memref<1x1x256xbf16, #tpu.memory_space<vmem>>, vector<1x1x256xbf16>
      %15 = vector.shape_cast %14 : vector<1x1x256xbf16> to vector<1x256xbf16>
      %16 = arith.extf %15 : vector<1x256xbf16> to vector<1x256xf32>
      %17 = vector.broadcast %16 : vector<1x256xf32> to vector<32x256xf32>
      %18 = arith.addf %13, %17 : vector<32x256xf32>
      %c0_16 = arith.constant 0 : index
      %c0_17 = arith.constant 0 : index
      %c0_18 = arith.constant 0 : index
      %19 = vector.load %arg7[%c0_16, %c0_17, %c0_18] : memref<1x32x256xf32, #tpu.memory_space<vmem>>, vector<1x32x256xf32>
      %20 = vector.shape_cast %19 : vector<1x32x256xf32> to vector<32x256xf32>
      %21 = vector.shape_cast %18 : vector<32x256xf32> to vector<1x32x256xf32>
      tpu.vector_store %arg7[%c0_16, %c0_17, %c0_18], %21 {strides = array<i32>} : memref<1x32x256xf32, #tpu.memory_space<vmem>>, vector<1x32x256xf32>,
    } else {
    }
    return
  }
  func.func @transform_0(%arg0: i32, %arg1: i32, %arg2: i32, %arg3: i32) -> (i32, i32) {
    %c0_i32 = arith.constant 0 : i32
    return %arg1, %arg3 : i32, i32
  }
  func.func @transform_1(%arg0: i32, %arg1: i32, %arg2: i32, %arg3: i32) -> (i32, i32, i32) {
    %c0_i32 = arith.constant 0 : i32
    return %arg0, %arg3, %arg2 : i32, i32, i32
  }
  func.func @transform_2(%arg0: i32, %arg1: i32, %arg2: i32, %arg3: i32) -> (i32, i32, i32) {
    %c0_i32 = arith.constant 0 : i32
    %c0_i32_0 = arith.constant 0 : i32
    return %arg0, %c0_i32, %arg2 : i32, i32, i32
  }
  func.func @transform_3(%arg0: i32, %arg1: i32, %arg2: i32, %arg3: i32) -> (i32, i32, i32) {
    %c0_i32 = arith.constant 0 : i32
    return %arg0, %arg1, %arg2 : i32, i32, i32
  }
}

</mosaic_0001>

<bundles_post_ra>
// kernel: text_encoder_forward.15
= control target key start
LH: loop header
LB: loop body
LE: loop exit
PB: predicated region body
PF: predicated region fallthrough
CT: control target
= control target key end

     0   :  { %s775_s12 = smov 0   ;;  %s777_s13 = smov 0   ;;  %s822_s0 = inlined_call_operand.vmem [shape: bf16[32,128], index: 0, kind: input, shape index: {}]   ;;  %s823_s1 = inlined_call_operand.vmem [shape: bf16[3,128,128], index: 1, kind: input, shape index: {}]   ;;  %s824_s2 = inlined_call_operand.vmem [shape: bf16[3,1,128], index: 2, kind: input, shape index: {}]   ;;  %s825_s3 = inlined_call_operand.vmem [shape: bf16[3,32,128], index: 3, kind: output, shape index: {}]  }
   0x1   :  { %s779_s14 = smov 0  }
   0x2 LB: > { %s39_s15 = sadd.s32 1, %s749_s13  ;;  %p629_p0 = scmp.ge.s32.totalorder %s753_s14, 1  ;;  %s753_s14 = sphi %s779_s14, %s13_s14   ;;  %s749_s13 = sphi %s777_s13, %s827_s13   ;;  %s745_s12 = sphi %s775_s12, %s826_s12  }
   0x3   : > { %p41_p1 = scmp.ge.s32.totalorder %s39_s15, 3  ;;  %p208_p2 = scmp.lt.s32.totalorder %s753_s14, 4 }
   0x5   : > { %s829_s15 = smov (%p41_p1, %s39_s15), 0  ;;  %p209_p3 = pnand %p629_p0, %p208_p2 }
   0x6   : > { %p270_p4 = scmp.lt.s32.totalorder (!%p209_p3), %s745_s12, 2  ;;  %v729_v0 = vld [vmem:[%s822_s0] sm:$0xff] (!%p209_p3)   ;;  %v730_v9 = vld [vmem:[%s822_s0 + $0x8] sm:$0xff] (!%p209_p3)   ;;  %v460_v10 = vlaneseq (!%p209_p3) }
   0x7   : > { %212 = sbr.rel (%p209_p3) target bundleno = 270 (0x10e), region = 32  ;;  %693 = vmatprep.mubr.bf16.mxu0 (!%p209_p3), %v729_v0 }
   0x8   : > { %v461_v11 = vshrl.u32 (!%p209_p3), %v460_v10, 7 }
   0xa   : > { %v462_v14 = vsub.s32 (!%p209_p3), 0, %v461_v11 }
   0xe   : > { %s831_s12 = smov (!%p270_p4, %s745_s12), 2 }
   0xf   : > { %s650_s18 = sshll.u32 %s831_s12, 6  ;;  %s287_s26 = scalar_lea.vmem %s824_s2, %s831_s12 }
  0x10   : > { %s280_s21 = scalar_lea.vmem %s823_s1, %s650_s18  ;;  %v458_v12 = vld [vmem:[%s287_s26] sm:$0x1]  ;;  %s651_s27 = sshll.u32 %s831_s12, 4 }
  0x11   : > { %v721_v1 = vld [vmem:[%s280_s21] sm:$0xff]   ;;  %v722_v2 = vld [vmem:[%s280_s21 + $0x8] sm:$0xff]   ;;  %v723_v3 = vld [vmem:[%s280_s21 + $0x10] sm:$0xff]   ;;  %v459_v13 = vunpack.c.l.bf16 %v458_v12  ;;  %s299_s30 = scalar_lea.vmem %s825_s3, %s651_s27 }
  0x12   : > { %677 = vmatprep.subr.bf16.mxu0 %v721_v1  ;;  %v724_v4 = vld [vmem:[%s280_s21 + $0x18] sm:$0xff]   ;;  %v725_v5 = vld [vmem:[%s280_s21 + $0x20] sm:$0xff]   ;;  %v726_v6 = vld [vmem:[%s280_s21 + $0x28] sm:$0xff]  }
  0x13   : > { %678 = vmatpush3.bf16.msra.mxu0 %v721_v1  ;;  %v727_v7 = vld [vmem:[%s280_s21 + $0x30] sm:$0xff]   ;;  %v728_v8 = vld [vmem:[%s280_s21 + $0x38] sm:$0xff]   ;;  %v463_v15 = vrot.slane %v459_v13, %v462_v14 }
  0x14   : > { %679 = vmatprep.subr.bf16.mxu0 %v722_v2 }
  0x17   : > { %680 = vmatpush3.bf16.msra.mxu0 %v722_v2 }
  0x18   : > { %681 = vmatprep.subr.bf16.mxu0 %v723_v3 }
  0x1b   : > { %682 = vmatpush3.bf16.msra.mxu0 %v723_v3 }
  0x1c   : > { %683 = vmatprep.subr.bf16.mxu0 %v724_v4 }
  0x1f   : > { %684 = vmatpush3.bf16.msra.mxu0 %v724_v4 }
  0x20   : > { %685 = vmatprep.subr.bf16.mxu0 %v725_v5 }
  0x23   : > { %686 = vmatpush3.bf16.msra.mxu0 %v725_v5 }
  0x24   : > { %687 = vmatprep.subr.bf16.mxu0 %v726_v6 }
  0x27   : > { %688 = vmatpush3.bf16.msra.mxu0 %v726_v6 }
  0x28   : > { %689 = vmatprep.subr.bf16.mxu0 %v727_v7 }
  0x2b   : > { %690 = vmatpush3.bf16.msra.mxu0 %v727_v7 }
  0x2c   : > { %691 = vmatprep.subr.bf16.mxu0 %v728_v8 }
  0x2f   : > { %692 = vmatpush3.bf16.msra.mxu0 %v728_v8 }
  0x32   : > { %694 = vmatmul.mubr.bf16.vlgmr.msra.gmra.mrb[0].mxu0 %v730_v9 }
 0x105   : > { %v695_v16 = vpop.f32.mrb[0].mxu0 }
 0x106   : > { %v428_v17 = vpop.f32.mrb[1].mxu0  ;;  %v466_v19 = vadd.f32 %v695_v16, %v463_v15 }
 0x107   : > { %v696_v18 = vpop.f32.mrb[2].mxu0  ;;  %v464_v22 = vadd.f32 %v463_v15, %v428_v17 }
 0x108   : > { %v467_v20 = vadd.f32 %v696_v18, %v463_v15  ;;  %v431_v21 = vpop.f32.mrb[3].mxu0 }
 0x109   : > { %v465_v23 = vadd.f32 %v463_v15, %v431_v21 }
 0x10a   : > { %v664_v24 = vpack.c.bf16 %v467_v20, %v466_v19 }
 0x10b   : > { %v659_v25 = vpack.c.bf16 %v465_v23, %v464_v22 }
 0x10c   : > { %666 = vst [vmem:[%s299_s30 + $0x8] sm:$0xff] %v664_v24  }
 0x10d   : > { %660 = vst [vmem:[%s299_s30] sm:$0xff] %v659_v25  }
 0x10e PF: > { %s13_s14 = sadd.s32 1, %s753_s14   ;;  %s826_s12 = smov %s749_s13 }
 0x10f   : > { %p10_p5 = scmp.ge.s32.totalorder %s13_s14, 5   ;;  %s827_s13 = smov %s829_s15 }
 0x111   :  { %12 = sbr.rel (!%p10_p5) target bundleno = 2 (0x2), region = 76 }

// kernel: text_encoder_forward.12
= control target key start
LH: loop header
LB: loop body
LE: loop exit
PB: predicated region body
PF: predicated region fallthrough
CT: control target
= control target key end

     0   :  { %v231_v0 = vmov 0.0   ;;  %vm232_vm0 = vmmov 0   ;;  %v147_v10 = vlaneseq  ;;  %s286_s1 = inlined_call_operand.vmem [shape: bf16[1,128,128], index: 1, kind: input, shape index: {}]   ;;  %s287_s0 = inlined_call_operand.vmem [shape: bf16[16,128], index: 0, kind: input, shape index: {}]   ;;  %s288_s2 = inlined_call_operand.vmem [shape: bf16[1,1,128], index: 2, kind: input, shape index: {}]   ;;  %s289_s3 = inlined_call_operand.vmem [shape: bf16[1,16,128], index: 3, kind: output, shape index: {}]  }
   0x1   :  { %196 = vmatprep.subr.bf16.mxu0 %v231_v0  ;;  %v218_v1 = vld [vmem:[%s286_s1] sm:$0xff]   ;;  %212 = vmatprep.mubr.msk.bf16.mxu0 %vm232_vm0, %v231_v0  ;;  %v219_v2 = vld [vmem:[%s286_s1 + $0x8] sm:$0xff]   ;;  %v220_v3 = vld [vmem:[%s286_s1 + $0x10] sm:$0xff]  }
   0x2   :  { %197 = vmatpush3.bf16.msra.mxu0 %v218_v1  ;;  %v221_v4 = vld [vmem:[%s286_s1 + $0x18] sm:$0xff]   ;;  %v222_v5 = vld [vmem:[%s286_s1 + $0x20] sm:$0xff]   ;;  %v223_v6 = vld [vmem:[%s286_s1 + $0x28] sm:$0xff]   ;;  %v148_v11 = vshrl.u32 %v147_v10, 7 }
   0x3   :  { %198 = vmatprep.subr.bf16.mxu0 %v231_v0  ;;  %v224_v7 = vld [vmem:[%s286_s1 + $0x30] sm:$0xff]   ;;  %v225_v8 = vld [vmem:[%s286_s1 + $0x38] sm:$0xff]   ;;  %v226_v9 = vld [vmem:[%s287_s0] sm:$0xff]  }
   0x4   :  { %v145_v12 = vld [vmem:[%s288_s2] sm:$0x1]  ;;  %v149_v14 = vsub.s32 0, %v148_v11 }
   0x5   :  { %v146_v13 = vunpack.c.l.bf16 %v145_v12 }
   0x6   :  { %199 = vmatpush3.bf16.msra.mxu0 %v219_v2 }
   0x7   :  { %200 = vmatprep.subr.bf16.mxu0 %v231_v0  ;;  %v150_v15 = vrot.slane %v146_v13, %v149_v14 }
   0xa   :  { %201 = vmatpush3.bf16.msra.mxu0 %v220_v3 }
   0xb   :  { %202 = vmatprep.subr.bf16.mxu0 %v231_v0 }
   0xe   :  { %203 = vmatpush3.bf16.msra.mxu0 %v221_v4 }
   0xf   :  { %204 = vmatprep.subr.bf16.mxu0 %v231_v0 }
  0x12   :  { %205 = vmatpush3.bf16.msra.mxu0 %v222_v5 }
  0x13   :  { %206 = vmatprep.subr.bf16.mxu0 %v231_v0 }
  0x16   :  { %207 = vmatpush3.bf16.msra.mxu0 %v223_v6 }
  0x17   :  { %208 = vmatprep.subr.bf16.mxu0 %v231_v0 }
  0x1a   :  { %209 = vmatpush3.bf16.msra.mxu0 %v224_v7 }
  0x1b   :  { %210 = vmatprep.subr.bf16.mxu0 %v231_v0 }
  0x1e   :  { %211 = vmatpush3.bf16.msra.mxu0 %v225_v8 }
  0x21   :  { %213 = vmatmul.mubr.bf16.vlgmr.msra.gmra.mrb[0].mxu0 %v226_v9 }
  0xf4   :  { %v129_v16 = vpop.f32.mrb[0].mxu0 }
  0xf5   :  { %v151_v17 = vadd.f32 %v150_v15, %v129_v16  ;;  %v214_v18 = vpop.f32.mrb[1].mxu0 }
  0xf6   :  { %v132_v19 = vpop.f32.mrb[2].mxu0 }
  0xf7   :  { %v152_v20 = vadd.f32 %v150_v15, %v132_v19  ;;  %v215_v21 = vpop.f32.mrb[3].mxu0  ;;  %227 = vtanh.f32 %v151_v17 }
  0xf9   :  { %229 = vtanh.f32 %v152_v20 }
 0x101   :  { %v228_v22 = vpop.eup %227 }
 0x103   :  { %v230_v23 = vpop.eup %229 }
 0x104   :  { %v185_v24 = vpack.c.bf16 %v230_v23, %v228_v22 }
 0x106   :  { %186 = vst [vmem:[%s289_s3] sm:$0xff] %v185_v24  }

// kernel: text_encoder_forward.14
= control target key start
LH: loop header
LB: loop body
LE: loop exit
PB: predicated region body
PF: predicated region fallthrough
CT: control target
= control target key end

     0   :  { %s587_s18 = smov 0   ;;  %s589_s19 = smov 0   ;;  %s637_s0 = inlined_call_operand.vmem [shape: bf16[2,16,128], index: 0, kind: input, shape index: {}]   ;;  %s638_s1 = inlined_call_operand.vmem [shape: bf16[2,16,128], index: 1, kind: input, shape index: {}]   ;;  %s639_s2 = inlined_call_operand.vmem [shape: bf16[1,128], index: 2, kind: input, shape index: {}]   ;;  %s640_s3 = inlined_call_operand.vmem [shape: bf16[1,128], index: 3, kind: input, shape index: {}]   ;;  %s641_s4 = inlined_call_operand.vmem [shape: bf16[1,128], index: 4, kind: input, shape index: {}]   ;;  %s642_s5 = inlined_call_operand.vmem [shape: bf16[2,16,128], index: 5, kind: output, shape index: {}]  }
   0x1   :  { %s591_s20 = smov 0  }
   0x2 LB: > { %s27_s21 = sadd.s32 1, %s551_s19  ;;  %p476_p0 = scmp.ge.s32.totalorder %s555_s20, 1  ;;  %s555_s20 = sphi %s591_s20, %s15_s20   ;;  %s551_s19 = sphi %s589_s19, %s644_s19   ;;  %s547_s18 = sphi %s587_s18, %s643_s18  }
   0x3   : > { %p29_p1 = scmp.ge.s32.totalorder %s27_s21, 2  ;;  %p225_p2 = scmp.lt.s32.totalorder %s555_s20, 3 }
   0x5   : > { %s646_s21 = smov (%p29_p1, %s27_s21), 0  ;;  %p226_p3 = pnand %p476_p0, %p225_p2 }
   0x6   : > { %p271_p4 = scmp.lt.s32.totalorder (!%p226_p3), %s547_s18, 1  ;;  %v310_v0 = vld [vmem:[%s639_s2] sm:$0x1] (!%p226_p3)  ;;  %v312_v1 = vlaneseq (!%p226_p3) }
   0x7   : > { %229 = sbr.rel (%p226_p3) target bundleno = 343 (0x157), region = 40  ;;  %v311_v2 = vunpack.c.l.bf16 (!%p226_p3), %v310_v0  ;;  %v341_v30 = vld [vmem:[%s640_s3] sm:$0x1] (!%p226_p3) }
   0x8   : > { %v313_v3 = vshrl.u32 (!%p226_p3), %v312_v1, 7  ;;  %v342_v31 = vunpack.c.l.bf16 (!%p226_p3), %v341_v30  ;;  %v349_v32 = vld [vmem:[%s641_s4] sm:$0x1] (!%p226_p3) }
   0x9   : > { %v350_v35 = vunpack.c.l.bf16 (!%p226_p3), %v349_v32 }
   0xa   : > { %v314_v4 = vsub.s32 (!%p226_p3), 0, %v313_v3 }
   0xc   : > { %v315_v7 = vrot.slane (!%p226_p3), %v311_v2, %v314_v4  ;;  %v346_v34 = vrot.slane (!%p226_p3), %v342_v31, %v314_v4  ;;  %v354_v38 = vrot.slane (!%p226_p3), %v350_v35, %v314_v4 }
   0xe   : > { %s648_s18 = smov (!%p271_p4, %s547_s18), 1 }
   0xf   : > { %s608_s24 = sshll.u32 %s648_s18, 3 }
  0x10   : > { %s278_s27 = scalar_lea.vmem %s637_s0, %s608_s24  ;;  %s288_s30 = scalar_lea.vmem %s638_s1, %s608_s24 }
  0x11   : > { %v493_v5 = vld [vmem:[%s278_s27] sm:$0xff]   ;;  %s298_s12 = scalar_lea.vmem %s642_s5, %s608_s24 }
  0x12   : > { %v497_v6 = vld [vmem:[%s288_s30] sm:$0xff]   ;;  %v494_v8 = vunpack.c.l.bf16 %v493_v5  ;;  %v495_v10 = vunpack.c.h.bf16 %v493_v5 }
  0x13   : > { %v498_v9 = vunpack.c.l.bf16 %v497_v6  ;;  %v499_v11 = vunpack.c.h.bf16 %v497_v6 }
  0x15   : > { %v308_v12 = vadd.f32 %v498_v9, %v494_v8  ;;  %v309_v13 = vadd.f32 %v499_v11, %v495_v10 }
  0x17   : > { %v316_v14 = vadd.f32 %v315_v7, %v308_v12  ;;  %v317_v15 = vadd.f32 %v315_v7, %v309_v13 }
  0x19   : > { %318 = vadd.xlane.f32.xlu0 %v316_v14 }
  0x1d   : > { %320 = vadd.xlane.f32.xlu0 %v317_v15 }
  0xa6   : > { %v319_v16 = vpop.xlane.xlu0 %318 }
  0xa7   : > { %v323_v17 = vmul.f32 0.0078125, %v319_v16 }
  0xa9   : > { %v325_v18 = vsub.f32 %v316_v14, %v323_v17 }
  0xaa   : > { %v321_v19 = vpop.xlane.xlu0 %320 }
  0xab   : > { %v324_v20 = vmul.f32 0.0078125, %v321_v19  ;;  %v327_v21 = vmul.f32 %v325_v18, %v325_v18 }
  0xad   : > { %v326_v22 = vsub.f32 %v317_v15, %v324_v20  ;;  %329 = vadd.xlane.f32.xlu1 %v327_v21 }
  0xaf   : > { %v328_v23 = vmul.f32 %v326_v22, %v326_v22 }
  0xb1   : > { %331 = vadd.xlane.f32.xlu1 %v328_v23 }
 0x13a   : > { %v330_v24 = vpop.xlane.xlu1 %329 }
 0x13b   : > { %v333_v25 = vmul.f32 0.0078125, %v330_v24 }
 0x13d   : > { %v335_v26 = vadd.f32 1e-05, %v333_v25 }
 0x13e   : > { %v332_v27 = vpop.xlane.xlu1 %331 }
 0x13f   : > { %529 = vrsqrt.f32 %v335_v26  ;;  %v334_v28 = vmul.f32 0.0078125, %v332_v27 }
 0x141   : > { %v336_v29 = vadd.f32 1e-05, %v334_v28 }
 0x143   : > { %531 = vrsqrt.f32 %v336_v29 }
 0x149   : > { %v530_v33 = vpop.eup %529 }
 0x14a   : > { %v339_v36 = vmul.f32 %v530_v33, %v325_v18 }
 0x14c   : > { %v347_v39 = vmul.f32 %v346_v34, %v339_v36 }
 0x14d   : > { %v532_v37 = vpop.eup %531 }
 0x14e   : > { %v340_v40 = vmul.f32 %v532_v37, %v326_v22  ;;  %v355_v42 = vadd.f32 %v354_v38, %v347_v39 }
 0x150   : > { %v348_v41 = vmul.f32 %v346_v34, %v340_v40 }
 0x152   : > { %v356_v43 = vadd.f32 %v354_v38, %v348_v41 }
 0x154   : > { %v503_v44 = vpack.c.bf16 %v356_v43, %v355_v42 }
 0x156   : > { %504 = vst [vmem:[%s298_s12] sm:$0xff] %v503_v44  }
 0x157 PF: > { %s15_s20 = sadd.s32 1, %s555_s20   ;;  %s643_s18 = smov %s551_s19 }
 0x158   : > { %p12_p5 = scmp.ge.s32.totalorder %s15_s20, 4   ;;  %s644_s19 = smov %s646_s21 }
 0x15a   :  { %14 = sbr.rel (!%p12_p5) target bundleno = 2 (0x2), region = 73 }

// kernel: text_encoder_forward.13
= control target key start
LH: loop header
LB: loop body
LE: loop exit
PB: predicated region body
PF: predicated region fallthrough
CT: control target
= control target key end

     0   :  { %s915_s12 = smov 0   ;;  %s917_s13 = smov 0   ;;  %s1016_s0 = inlined_call_operand.vmem [shape: bf16[16,128], index: 0, kind: input, shape index: {}]   ;;  %s1017_s1 = inlined_call_operand.vmem [shape: bf16[1,128,512], index: 1, kind: input, shape index: {}]   ;;  %s1018_s2 = inlined_call_operand.vmem [shape: bf16[1,1,512], index: 2, kind: input, shape index: {}]   ;;  %s1019_s3 = inlined_call_operand.vmem [shape: bf16[1,16,512], index: 3, kind: output, shape index: {}]  }
   0x1   :  { %s919_s14 = smov 0   ;;  %s921_s15 = smov 0  }
   0x2   :  { %s923_s16 = smov 0  }
   0x3 LB: > { %s31_s17 = sadd.s32 1, %s888_s15  ;;  %s748_s18 = sadd.s32 4294967295, %s892_s16   ;;  %s892_s16 = sphi %s923_s16, %s13_s16   ;;  %s888_s15 = sphi %s921_s15, %s1024_s15   ;;  %s884_s14 = sphi %s919_s14, %s1023_s14   ;;  %s880_s13 = sphi %s917_s13, %s1022_s13   ;;  %s876_s12 = sphi %s915_s12, %s1021_s12  }
   0x4   : > { %p33_p0 = scmp.ge.s32.totalorder %s31_s17, 2  ;;  %p85_p1 = scmp.ne.s32.totalorder %s880_s13, %s876_s12 }
   0x5   : > { %p86_p2 = scmp.eq.s32.totalorder %s892_s16, 0  ;;  %p147_p4 = scmp.eq.s32.totalorder %s748_s18, 1 }
   0x6   : > { %s1026_s17 = smov (%p33_p0, %s31_s17), 0  ;;  %s78_s20 = sadd.s32 1, %s880_s13 }
   0x7   : > { %p87_p3 = por %p86_p2, %p85_p1  ;;  %s74_s19 = ssub.s32 %s888_s15, %s1026_s17 }
   0x8   : > { %p76_p5 = scmp.eq.s32.totalorder %s74_s19, 0  ;;  %p950_p6 = por %p147_p4, %p85_p1 }
   0x9   : > { %p752_p7 = scmp.ge.s32.totalorder %s892_s16, 2 }
   0xa   : > { %s955_s22 = scalar_select %p76_p5, %s880_s13, %s78_s20  }
   0xb   : > { %181 = sbr.rel (%p752_p7) target bundleno = 30 (0x1e), region = 20 }
  0x12   : > { %184 = sbr.rel (!%p87_p3) target bundleno = 30 (0x1e), region = 24  ;;  %s186_s23 = sand.u32 (%p87_p3), 1, %s880_s13  }
  0x13   : > { %s784_s24 = sshll.u32 (%p87_p3), %s888_s15, 3  ;;  %s753_s25 = sshll.u32 (%p87_p3), %s186_s23, 7 }
  0x14   : > { %s963_s28 = scalar_lea.vmem (%p87_p3), %s1017_s1, %s784_s24  ;;  %s188_s29 = scalar_lea.vmem (%p87_p3), [#allocation3], %s753_s25 }
  0x15   : > { %v254_v0 = vld [vmem:[%s963_s28] sm:$0xff] (%p87_p3)  ;;  %v256_v1 = vld [vmem:[%s963_s28 + $0x10] sm:$0xff] (%p87_p3) }
  0x16   : > { %v258_v2 = vld [vmem:[%s963_s28 + $0x20] sm:$0xff] (%p87_p3)  ;;  %255 = vst [vmem:[%s188_s29] sm:$0xff] (%p87_p3), %v254_v0  ;;  %257 = vst [vmem:[%s188_s29 + $0x8] sm:$0xff] (%p87_p3), %v256_v1  ;;  %v260_v3 = vld [vmem:[%s963_s28 + $0x30] sm:$0xff] (%p87_p3) }
  0x17   : > { %259 = vst [vmem:[%s188_s29 + $0x10] sm:$0xff] (%p87_p3), %v258_v2  ;;  %v262_v4 = vld [vmem:[%s963_s28 + $0x40] sm:$0xff] (%p87_p3)  ;;  %v264_v5 = vld [vmem:[%s963_s28 + $0x50] sm:$0xff] (%p87_p3)  ;;  %261 = vst [vmem:[%s188_s29 + $0x18] sm:$0xff] (%p87_p3), %v260_v3 }
  0x18   : > { %263 = vst [vmem:[%s188_s29 + $0x20] sm:$0xff] (%p87_p3), %v262_v4  ;;  %265 = vst [vmem:[%s188_s29 + $0x28] sm:$0xff] (%p87_p3), %v264_v5  ;;  %v266_v6 = vld [vmem:[%s963_s28 + $0x60] sm:$0xff] (%p87_p3)  ;;  %v268_v7 = vld [vmem:[%s963_s28 + $0x70] sm:$0xff] (%p87_p3) }
  0x19   : > { %v270_v8 = vld [vmem:[%s963_s28 + $0x80] sm:$0xff]  ;;  %267 = vst [vmem:[%s188_s29 + $0x30] sm:$0xff] %v266_v6  ;;  %269 = vst [vmem:[%s188_s29 + $0x38] sm:$0xff] %v268_v7  ;;  %v272_v9 = vld [vmem:[%s963_s28 + $0x90] sm:$0xff] }
  0x1a   : > { %271 = vst [vmem:[%s188_s29 + $0x40] sm:$0xff] %v270_v8  ;;  %v274_v10 = vld [vmem:[%s963_s28 + $0xa0] sm:$0xff]  ;;  %v276_v11 = vld [vmem:[%s963_s28 + $0xb0] sm:$0xff]  ;;  %273 = vst [vmem:[%s188_s29 + $0x48] sm:$0xff] %v272_v9 }
  0x1b   : > { %275 = vst [vmem:[%s188_s29 + $0x50] sm:$0xff] %v274_v10  ;;  %277 = vst [vmem:[%s188_s29 + $0x58] sm:$0xff] %v276_v11  ;;  %v278_v12 = vld [vmem:[%s963_s28 + $0xc0] sm:$0xff]  ;;  %v280_v13 = vld [vmem:[%s963_s28 + $0xd0] sm:$0xff] }
  0x1c   : > { %v282_v14 = vld [vmem:[%s963_s28 + $0xe0] sm:$0xff]  ;;  %279 = vst [vmem:[%s188_s29 + $0x60] sm:$0xff] %v278_v12  ;;  %281 = vst [vmem:[%s188_s29 + $0x68] sm:$0xff] %v280_v13  ;;  %v284_v15 = vld [vmem:[%s963_s28 + $0xf0] sm:$0xff] }
  0x1d   : > { %283 = vst [vmem:[%s188_s29 + $0x70] sm:$0xff] %v282_v14  ;;  %285 = vst [vmem:[%s188_s29 + $0x78] sm:$0xff] %v284_v15 }
  0x1e PF: > { %p756_p8 = scmp.ge.s32.totalorder %s892_s16, 1  ;;  %p302_p9 = scmp.lt.s32.totalorder %s892_s16, 3 }
  0x20   : > { %p303_p10 = pnand %p756_p8, %p302_p9 }
  0x21   : > { %s309_s30 = sand.u32 (!%p303_p10), 1, %s876_s12   ;;  %v894_v16 = vmov (!%p303_p10), 0   ;;  %v853_v33 = vld [vmem:[%s1016_s0] sm:$0xff] (!%p303_p10)   ;;  %s759_s8 = sshll.u32 (!%p303_p10), %s884_s14, 1  ;;  %v547_v34 = vlaneseq (!%p303_p10) }
  0x22   : > { %306 = sbr.rel (%p303_p10) target bundleno = 297 (0x129), region = 66  ;;  %s757_s4 = sshll.u32 (!%p303_p10), %s309_s30, 7  ;;  %518 = vmatprep.mubr.bf16.mxu0 (!%p303_p10), %v894_v16 }
  0x23   : > { %s311_s5 = scalar_lea.vmem (!%p303_p10), [#allocation3], %s757_s4  ;;  %p361_p11 = scmp.lt.s32.totalorder (!%p303_p10), %s759_s8, 3  ;;  %v548_v35 = vshrl.u32 (!%p303_p10), %v547_v34, 7 }
  0x24   : > { %v829_v17 = vld [vmem:[%s311_s5 + $0x4] ss:$8 sps:$4 sm:$0xff] (!%p303_p10)   ;;  %v831_v18 = vld [vmem:[%s311_s5] ss:$8 sps:$4 sm:$0xff] (!%p303_p10)   ;;  %v832_v19 = vld [vmem:[%s311_s5 + $0x14] ss:$8 sps:$4 sm:$0xff] (!%p303_p10)  }
  0x25   : > { %486 = vmatprep.subr.bf16.mxu0 (!%p303_p10), %v829_v17  ;;  %v834_v20 = vld [vmem:[%s311_s5 + $0x10] ss:$8 sps:$4 sm:$0xff] (!%p303_p10)   ;;  %v835_v21 = vld [vmem:[%s311_s5 + $0x24] ss:$8 sps:$4 sm:$0xff] (!%p303_p10)   ;;  %v837_v22 = vld [vmem:[%s311_s5 + $0x20] ss:$8 sps:$4 sm:$0xff] (!%p303_p10)  }
  0x26   : > { %487 = vmatpush1.bf16.msra.mxu0 (!%p303_p10), %v831_v18  ;;  %v838_v23 = vld [vmem:[%s311_s5 + $0x34] ss:$8 sps:$4 sm:$0xff] (!%p303_p10)   ;;  %v840_v24 = vld [vmem:[%s311_s5 + $0x30] ss:$8 sps:$4 sm:$0xff] (!%p303_p10)   ;;  %v841_v25 = vld [vmem:[%s311_s5 + $0x44] ss:$8 sps:$4 sm:$0xff] (!%p303_p10)  }
  0x27   : > { %488 = vmatprep.subr.bf16.mxu0 (!%p303_p10), %v832_v19  ;;  %v843_v26 = vld [vmem:[%s311_s5 + $0x40] ss:$8 sps:$4 sm:$0xff] (!%p303_p10)   ;;  %v844_v27 = vld [vmem:[%s311_s5 + $0x54] ss:$8 sps:$4 sm:$0xff] (!%p303_p10)   ;;  %v846_v28 = vld [vmem:[%s311_s5 + $0x50] ss:$8 sps:$4 sm:$0xff] (!%p303_p10)  }
  0x28   : > { %v847_v29 = vld [vmem:[%s311_s5 + $0x64] ss:$8 sps:$4 sm:$0xff] (!%p303_p10)   ;;  %v849_v30 = vld [vmem:[%s311_s5 + $0x60] ss:$8 sps:$4 sm:$0xff] (!%p303_p10)   ;;  %v850_v31 = vld [vmem:[%s311_s5 + $0x74] ss:$8 sps:$4 sm:$0xff] (!%p303_p10)  }
  0x29   : > { %v852_v32 = vld [vmem:[%s311_s5 + $0x70] ss:$8 sps:$4 sm:$0xff]   ;;  %s1028_s8 = smov (!%p361_p11, %s759_s8), 3  ;;  %v549_v38 = vsub.s32 0, %v548_v35  ;;  %v553_v39 = vsub.s32 2, %v548_v35  ;;  %s758_s18 = sshll.u32 %s309_s30, 4 }
  0x2a   : > { %489 = vmatpush1.bf16.msra.mxu0 %v834_v20  ;;  %s365_s11 = scalar_lea.vmem %s1018_s2, %s1028_s8  ;;  %s346_s19 = scalar_lea.vmem [#allocation4], %s758_s18 }
  0x2b   : > { %490 = vmatprep.subr.bf16.mxu0 %v835_v21  ;;  %v544_v36 = vld [vmem:[%s365_s11] sm:$0x3]  ;;  %s787_s20 = sshll.u32 (%p950_p6), %s884_s14, 3 }
  0x2c   : > { %v545_v37 = vunpack.c.l.bf16 %v544_v36  ;;  %s597_s24 = scalar_lea.vmem (%p950_p6), %s1019_s3, %s787_s20 }
  0x2e   : > { %491 = vmatpush1.bf16.msra.mxu0 %v837_v22  ;;  %v550_v40 = vrot.slane %v545_v37, %v549_v38  ;;  %v554_v41 = vrot.slane %v545_v37, %v553_v39 }
  0x2f   : > { %492 = vmatprep.subr.bf16.mxu0 %v838_v23 }
  0x30   : > { %v560_v42 = vrot.slane %v550_v40, %v549_v38  ;;  %v564_v43 = vrot.slane %v554_v41, %v549_v38 }
  0x32   : > { %493 = vmatpush1.bf16.msra.mxu0 %v840_v24 }
  0x33   : > { %494 = vmatprep.subr.bf16.mxu0 %v841_v25 }
  0x36   : > { %495 = vmatpush1.bf16.msra.mxu0 %v843_v26 }
  0x37   : > { %496 = vmatprep.subr.bf16.mxu0 %v844_v27 }
  0x3a   : > { %497 = vmatpush1.bf16.msra.mxu0 %v846_v28 }
  0x3b   : > { %498 = vmatprep.subr.bf16.mxu0 %v847_v29 }
  0x3e   : > { %499 = vmatpush1.bf16.msra.mxu0 %v849_v30 }
  0x3f   : > { %500 = vmatprep.subr.bf16.mxu0 %v850_v31 }
  0x42   : > { %501 = vmatpush1.bf16.msra.mxu0 %v852_v32 }
  0x45   : > { %519 = vmatmul.mubr.bf16.vlgmr.msra.gmra.mrb[0].mxu0 %v853_v33 }
 0x118   : > { %v520_v44 = vpop.f32.mrb[0].mxu0 }
 0x119   : > { %v565_v45 = vadd.f32 %v560_v42, %v520_v44  ;;  %v522_v46 = vpop.f32.mrb[1].mxu0 }
 0x11a   : > { %v566_v47 = vadd.f32 %v564_v43, %v522_v46  ;;  %v524_v48 = vpop.f32.mrb[2].mxu0  ;;  %589 = sbr.rel (!%p950_p6) target bundleno = 297 (0x129), region = 82 }
 0x11b   : > { %v567_v49 = vadd.f32 %v560_v42, %v524_v48  ;;  %v526_v50 = vpop.f32.mrb[3].mxu0 }
 0x11c   : > { %v785_v51 = vpack.c.bf16 %v566_v47, %v565_v45  ;;  %v568_v52 = vadd.f32 %v564_v43, %v526_v50 }
 0x11e   : > { %581 = vst [vmem:[%s346_s19] sm:$0xff] %v785_v51  ;;  %v786_v53 = vpack.c.bf16 %v568_v52, %v567_v49 }
 0x120   : > { %582 = vst [vmem:[%s346_s19 + $0x8] sm:$0xff] %v786_v53 }
 0x125   : > { %v627_v54 = vld [vmem:[%s346_s19] sm:$0xff] }
 0x126   : > { %628 = vst [vmem:[%s597_s24] sm:$0xff] %v627_v54 }
 0x127   : > { %v629_v55 = vld [vmem:[%s346_s19 + $0x8] sm:$0xff] }
 0x128   : > { %630 = vst [vmem:[%s597_s24 + $0x10] sm:$0xff] %v629_v55 }
 0x129 PF: > { %s13_s16 = sadd.s32 1, %s892_s16   ;;  %s1021_s12 = smov %s880_s13 }
 0x12a   : > { %p10_p12 = scmp.ge.s32.totalorder %s13_s16, 4   ;;  %s1022_s13 = smov %s955_s22 }
 0x12b   : > { %s1023_s14 = smov %s888_s15  ;;  %s1024_s15 = smov %s1026_s17 }
 0x12c   :  { %12 = sbr.rel (!%p10_p12) target bundleno = 3 (0x3), region = 157 }

// kernel: squeeze.10
= control target key start
LH: loop header
LB: loop body
LE: loop exit
PB: predicated region body
PF: predicated region fallthrough
CT: control target
= control target key end

     0   :  { %vm130_vm0 = vcmask 261120   ;;  %vm282_vm1 = vcmask 1047556   ;;  %s1258_s14 = smov 64   ;;  %s1259_s15 = smov 32   ;;  %s1708_s0 = inlined_call_operand.vmem [shape: bf16[1,16,512], index: 0, kind: input, shape index: {}]   ;;  %s1709_s1 = inlined_call_operand.vmem [shape: bf16[2,8,4,4,32], index: 1, kind: output, shape index: {}]  }
   0x1   :  { %v1192_v0 = vld [vmem:[%s1708_s0 + $0x8] sm:$0xff]   ;;  %v1187_v1 = vld [vmem:[%s1708_s0] sm:$0xff]   ;;  %v1190_v2 = vld [vmem:[%s1708_s0 + $0x18] sm:$0xff]  }
   0x2   :  { %v1184_v3 = vunpack.c.l.bf16 %v1192_v0  ;;  %v1185_v4 = vunpack.c.h.bf16 %v1192_v0  ;;  %v1188_v5 = vunpack.c.l.bf16 %v1187_v1  ;;  %v1189_v6 = vunpack.c.h.bf16 %v1187_v1  ;;  %v1191_v7 = vld [vmem:[%s1708_s0 + $0x10] sm:$0xff]   ;;  %s1257_s0 = smov 96  }
   0x3   :  { %v1283_v8 = vunpack.c.l.bf16 %v1190_v2  ;;  %v1285_v9 = vunpack.c.h.bf16 %v1190_v2  ;;  %v1180_v10 = vunpack.c.l.bf16 %v1191_v7  ;;  %v1287_v11 = vunpack.c.h.bf16 %v1191_v7 }
   0x4   :  { %84 = vst [vmem:[#allocation1 + $0x18] sm:$0xff] %v1185_v4  ;;  %100 = vst [vmem:[#allocation1 + $0x10] sm:$0xff] %v1184_v3 }
   0x5   :  { %115 = vst [vmem:[#allocation1 + $0x8] sm:$0xff] %v1189_v6  ;;  %128 = vst [vmem:[#allocation1] sm:$0xff] %v1188_v5 }
   0x6   :  { %20 = vst [vmem:[#allocation1 + $0x38] sm:$0xff] %v1285_v9  ;;  %36 = vst [vmem:[#allocation1 + $0x30] sm:$0xff] %v1283_v8 }
   0x7   :  { %52 = vst [vmem:[#allocation1 + $0x28] sm:$0xff] %v1287_v11  ;;  %68 = vst [vmem:[#allocation1 + $0x20] sm:$0xff] %v1180_v10 }
   0x8   :  { %137 = vst.msk [vmem:[#allocation0 + $0x5d] sm:$0x8] %vm130_vm0, %v1188_v5   ;;  %156 = vst.msk [vmem:[#allocation0 + $0x65] sm:$0x8] %vm130_vm0, %v1189_v6  }
   0x9   :  { %194 = vst.msk [vmem:[#allocation0 + $0x75] sm:$0x8] %vm130_vm0, %v1185_v4   ;;  %175 = vst.msk [vmem:[#allocation0 + $0x6d] sm:$0x8] %vm130_vm0, %v1184_v3  }
   0xa   :  { %131 = vst.msk [vmem:[#allocation0] sm:$0x1] %vm130_vm0, %v1188_v5   ;;  %133 = vst.msk [vmem:[#allocation0 + $0x1f] sm:$0x2] %vm130_vm0, %v1188_v5  }
   0xb   :  { %135 = vst.msk [vmem:[#allocation0 + $0x3e] sm:$0x4] %vm130_vm0, %v1188_v5   ;;  %139 = vst.msk [vmem:[#allocation0 + $0x7c] sm:$0x10] %vm130_vm0, %v1188_v5  }
   0xc   :  { %141 = vst.msk [vmem:[#allocation0 + $0x9b] sm:$0x20] %vm130_vm0, %v1188_v5   ;;  %143 = vst.msk [vmem:[#allocation0 + $0xba] sm:$0x40] %vm130_vm0, %v1188_v5  }
   0xd   :  { %145 = vst.msk [vmem:[#allocation0 + $0xd9] sm:$0x80] %vm130_vm0, %v1188_v5   ;;  %150 = vst.msk [vmem:[#allocation0 + $0x8] sm:$0x1] %vm130_vm0, %v1189_v6  }
   0xe   :  { %152 = vst.msk [vmem:[#allocation0 + $0x27] sm:$0x2] %vm130_vm0, %v1189_v6   ;;  %154 = vst.msk [vmem:[#allocation0 + $0x46] sm:$0x4] %vm130_vm0, %v1189_v6  }
   0xf   :  { %158 = vst.msk [vmem:[#allocation0 + $0x84] sm:$0x10] %vm130_vm0, %v1189_v6   ;;  %160 = vst.msk [vmem:[#allocation0 + $0xa3] sm:$0x20] %vm130_vm0, %v1189_v6  }
  0x10   :  { %162 = vst.msk [vmem:[#allocation0 + $0xc2] sm:$0x40] %vm130_vm0, %v1189_v6   ;;  %164 = vst.msk [vmem:[#allocation0 + $0xe1] sm:$0x80] %vm130_vm0, %v1189_v6  }
  0x11   :  { %169 = vst.msk [vmem:[#allocation0 + $0x10] sm:$0x1] %vm130_vm0, %v1184_v3   ;;  %171 = vst.msk [vmem:[#allocation0 + $0x2f] sm:$0x2] %vm130_vm0, %v1184_v3  }
  0x12   :  { %173 = vst.msk [vmem:[#allocation0 + $0x4e] sm:$0x4] %vm130_vm0, %v1184_v3   ;;  %177 = vst.msk [vmem:[#allocation0 + $0x8c] sm:$0x10] %vm130_vm0, %v1184_v3  }
  0x13   :  { %179 = vst.msk [vmem:[#allocation0 + $0xab] sm:$0x20] %vm130_vm0, %v1184_v3   ;;  %181 = vst.msk [vmem:[#allocation0 + $0xca] sm:$0x40] %vm130_vm0, %v1184_v3  }
  0x14   :  { %183 = vst.msk [vmem:[#allocation0 + $0xe9] sm:$0x80] %vm130_vm0, %v1184_v3   ;;  %188 = vst.msk [vmem:[#allocation0 + $0x18] sm:$0x1] %vm130_vm0, %v1185_v4  }
  0x15   :  { %190 = vst.msk [vmem:[#allocation0 + $0x37] sm:$0x2] %vm130_vm0, %v1185_v4   ;;  %192 = vst.msk [vmem:[#allocation0 + $0x56] sm:$0x4] %vm130_vm0, %v1185_v4  }
  0x16   :  { %196 = vst.msk [vmem:[#allocation0 + $0x94] sm:$0x10] %vm130_vm0, %v1185_v4   ;;  %198 = vst.msk [vmem:[#allocation0 + $0xb3] sm:$0x20] %vm130_vm0, %v1185_v4  }
  0x17   :  { %200 = vst.msk [vmem:[#allocation0 + $0xd2] sm:$0x40] %vm130_vm0, %v1185_v4   ;;  %202 = vst.msk [vmem:[#allocation0 + $0xf1] sm:$0x80] %vm130_vm0, %v1185_v4  }
  0x18   :  { %207 = vst.msk [vmem:[#allocation0 + $0x100] sm:$0x1] %vm130_vm0, %v1180_v10   ;;  %209 = vst.msk [vmem:[#allocation0 + $0x11f] sm:$0x2] %vm130_vm0, %v1180_v10  }
  0x19   :  { %211 = vst.msk [vmem:[#allocation0 + $0x13e] sm:$0x4] %vm130_vm0, %v1180_v10   ;;  %213 = vst.msk [vmem:[#allocation0 + $0x15d] sm:$0x8] %vm130_vm0, %v1180_v10  }
  0x1a   :  { %226 = vst.msk [vmem:[#allocation0 + $0x108] sm:$0x1] %vm130_vm0, %v1287_v11   ;;  %228 = vst.msk [vmem:[#allocation0 + $0x127] sm:$0x2] %vm130_vm0, %v1287_v11  }
  0x1b   :  { %230 = vst.msk [vmem:[#allocation0 + $0x146] sm:$0x4] %vm130_vm0, %v1287_v11   ;;  %232 = vst.msk [vmem:[#allocation0 + $0x165] sm:$0x8] %vm130_vm0, %v1287_v11  }
  0x1c   :  { %264 = vst.msk [vmem:[#allocation0 + $0x118] sm:$0x1] %vm130_vm0, %v1285_v9   ;;  %266 = vst.msk [vmem:[#allocation0 + $0x137] sm:$0x2] %vm130_vm0, %v1285_v9  }
  0x1d   :  { %268 = vst.msk [vmem:[#allocation0 + $0x156] sm:$0x4] %vm130_vm0, %v1285_v9   ;;  %270 = vst.msk [vmem:[#allocation0 + $0x175] sm:$0x8] %vm130_vm0, %v1285_v9  }
  0x1e   :  { %245 = vst.msk [vmem:[#allocation0 + $0x110] sm:$0x1] %vm130_vm0, %v1283_v8   ;;  %247 = vst.msk [vmem:[#allocation0 + $0x12f] sm:$0x2] %vm130_vm0, %v1283_v8  }
  0x1f   :  { %249 = vst.msk [vmem:[#allocation0 + $0x14e] sm:$0x4] %vm130_vm0, %v1283_v8   ;;  %251 = vst.msk [vmem:[#allocation0 + $0x16d] sm:$0x8] %vm130_vm0, %v1283_v8  }
  0x20   :  { %215 = vst.msk [vmem:[#allocation0 + $0x17c] sm:$0x10] %vm130_vm0, %v1180_v10   ;;  %217 = vst.msk [vmem:[#allocation0 + $0x19b] sm:$0x20] %vm130_vm0, %v1180_v10  }
  0x21   :  { %219 = vst.msk [vmem:[#allocation0 + $0x1ba] sm:$0x40] %vm130_vm0, %v1180_v10   ;;  %221 = vst.msk [vmem:[#allocation0 + $0x1d9] sm:$0x80] %vm130_vm0, %v1180_v10  }
  0x22   :  { %234 = vst.msk [vmem:[#allocation0 + $0x184] sm:$0x10] %vm130_vm0, %v1287_v11   ;;  %236 = vst.msk [vmem:[#allocation0 + $0x1a3] sm:$0x20] %vm130_vm0, %v1287_v11  }
  0x23   :  { %238 = vst.msk [vmem:[#allocation0 + $0x1c2] sm:$0x40] %vm130_vm0, %v1287_v11   ;;  %240 = vst.msk [vmem:[#allocation0 + $0x1e1] sm:$0x80] %vm130_vm0, %v1287_v11  }
  0x24   :  { %253 = vst.msk [vmem:[#allocation0 + $0x18c] sm:$0x10] %vm130_vm0, %v1283_v8   ;;  %255 = vst.msk [vmem:[#allocation0 + $0x1ab] sm:$0x20] %vm130_vm0, %v1283_v8  }
  0x25   :  { %257 = vst.msk [vmem:[#allocation0 + $0x1ca] sm:$0x40] %vm130_vm0, %v1283_v8   ;;  %259 = vst.msk [vmem:[#allocation0 + $0x1e9] sm:$0x80] %vm130_vm0, %v1283_v8  }
  0x26   :  { %272 = vst.msk [vmem:[#allocation0 + $0x194] sm:$0x10] %vm130_vm0, %v1285_v9   ;;  %274 = vst.msk [vmem:[#allocation0 + $0x1b3] sm:$0x20] %vm130_vm0, %v1285_v9  }
  0x27   :  { %276 = vst.msk [vmem:[#allocation0 + $0x1d2] sm:$0x40] %vm130_vm0, %v1285_v9   ;;  %278 = vst.msk [vmem:[#allocation0 + $0x1f1] sm:$0x80] %vm130_vm0, %v1285_v9  }
  0x28   :  { %v279_v12 = vld [vmem:[#allocation1] ss:$8 sm:$0xf]   ;;  %v281_v13 = vld [vmem:[#allocation1 - $0x1f] ss:$8 sm:$0xf0]  }
  0x29   :  { %v283_v14 = vsel %vm282_vm1, %v281_v13, %v279_v12  ;;  %v292_v15 = vld [vmem:[#allocation1 + $0x2] ss:$8 sm:$0xf]   ;;  %v294_v16 = vld [vmem:[#allocation1 - $0x1d] ss:$8 sm:$0xf0]  }
  0x2a   :  { %v296_v17 = vsel %vm282_vm1, %v294_v16, %v292_v15  ;;  %v331_v18 = vld [vmem:[#allocation1 + $0x20] ss:$8 sm:$0xf]   ;;  %v333_v19 = vld [vmem:[#allocation1 + $0x1] ss:$8 sm:$0xf0]  }
  0x2b   :  { %v1197_v20 = vpack.i.bf16 %v296_v17, %v283_v14  ;;  %v335_v21 = vsel %vm282_vm1, %v333_v19, %v331_v18  ;;  %v344_v22 = vld [vmem:[#allocation1 + $0x22] ss:$8 sm:$0xf]   ;;  %v346_v23 = vld [vmem:[#allocation1 + $0x3] ss:$8 sm:$0xf0]  }
  0x2c   :  { %v348_v24 = vsel %vm282_vm1, %v346_v23, %v344_v22  ;;  %v305_v25 = vld [vmem:[#allocation1 + $0x4] ss:$8 sm:$0xf]   ;;  %v307_v26 = vld [vmem:[#allocation1 - $0x1b] ss:$8 sm:$0xf0]  }
  0x2d   :  { %1198 = vrot.lane.b32.xlu0 %v1197_v20, %s1257_s0  ;;  %v1207_v27 = vpack.i.bf16 %v348_v24, %v335_v21  ;;  %v309_v28 = vsel %vm282_vm1, %v307_v26, %v305_v25  ;;  %v318_v29 = vld [vmem:[#allocation1 + $0x6] ss:$8 sm:$0xf]   ;;  %v320_v30 = vld [vmem:[#allocation1 - $0x19] ss:$8 sm:$0xf0]  }
  0x2e   :  { %v322_v31 = vsel %vm282_vm1, %v320_v30, %v318_v29  ;;  %v357_v32 = vld [vmem:[#allocation1 + $0x24] ss:$8 sm:$0xf]   ;;  %v359_v33 = vld [vmem:[#allocation1 + $0x5] ss:$8 sm:$0xf0]  }
  0x2f   :  { %1208 = vrot.lane.b32.xlu1 %v1207_v27, %s1257_s0  ;;  %v1202_v34 = vpack.i.bf16 %v322_v31, %v309_v28  ;;  %v361_v35 = vsel %vm282_vm1, %v359_v33, %v357_v32  ;;  %v370_v36 = vld [vmem:[#allocation1 + $0x26] ss:$8 sm:$0xf]   ;;  %v372_v37 = vld [vmem:[#allocation1 + $0x7] ss:$8 sm:$0xf0]  }
  0x30   :  { %v374_v38 = vsel %vm282_vm1, %v372_v37, %v370_v36  ;;  %v382_v39 = vld [vmem:[#allocation1] ss:$8 sm:$0xf]   ;;  %v384_v40 = vld [vmem:[#allocation1 - $0x1f] ss:$8 sm:$0xf0]  }
  0x31   :  { %1203 = vrot.lane.b32.xlu0 %v1202_v34, %s1257_s0  ;;  %v1212_v41 = vpack.i.bf16 %v374_v38, %v361_v35  ;;  %v386_v42 = vsel %vm282_vm1, %v384_v40, %v382_v39  ;;  %v395_v43 = vld [vmem:[#allocation1 + $0x2] ss:$8 sm:$0xf]   ;;  %v397_v44 = vld [vmem:[#allocation1 - $0x1d] ss:$8 sm:$0xf0]  }
  0x32   :  { %v399_v45 = vsel %vm282_vm1, %v397_v44, %v395_v43  ;;  %v408_v46 = vld [vmem:[#allocation1 + $0x4] ss:$8 sm:$0xf]   ;;  %v410_v47 = vld [vmem:[#allocation1 - $0x1b] ss:$8 sm:$0xf0]  }
  0x33   :  { %1213 = vrot.lane.b32.xlu1 %v1212_v41, %s1257_s0  ;;  %v1217_v48 = vpack.i.bf16 %v399_v45, %v386_v42  ;;  %v412_v49 = vsel %vm282_vm1, %v410_v47, %v408_v46  ;;  %v421_v50 = vld [vmem:[#allocation1 + $0x6] ss:$8 sm:$0xf]   ;;  %v423_v51 = vld [vmem:[#allocation1 - $0x19] ss:$8 sm:$0xf0]  }
  0x34   :  { %v425_v52 = vsel %vm282_vm1, %v423_v51, %v421_v50  ;;  %v434_v53 = vld [vmem:[#allocation1 + $0x20] ss:$8 sm:$0xf]   ;;  %v436_v54 = vld [vmem:[#allocation1 + $0x1] ss:$8 sm:$0xf0]  }
  0x35   :  { %1218 = vrot.lane.b32.xlu0 %v1217_v48, %s1258_s14  ;;  %v1222_v55 = vpack.i.bf16 %v425_v52, %v412_v49  ;;  %v438_v56 = vsel %vm282_vm1, %v436_v54, %v434_v53  ;;  %v447_v57 = vld [vmem:[#allocation1 + $0x22] ss:$8 sm:$0xf]   ;;  %v449_v58 = vld [vmem:[#allocation1 + $0x3] ss:$8 sm:$0xf0]  }
  0x36   :  { %v451_v59 = vsel %vm282_vm1, %v449_v58, %v447_v57  ;;  %v460_v60 = vld [vmem:[#allocation1 + $0x24] ss:$8 sm:$0xf]   ;;  %v462_v61 = vld [vmem:[#allocation1 + $0x5] ss:$8 sm:$0xf0]  }
  0x37   :  { %1223 = vrot.lane.b32.xlu1 %v1222_v55, %s1258_s14  ;;  %v1227_v62 = vpack.i.bf16 %v451_v59, %v438_v56  ;;  %v464_v63 = vsel %vm282_vm1, %v462_v61, %v460_v60  ;;  %v473_v0 = vld [vmem:[#allocation1 + $0x26] ss:$8 sm:$0xf]   ;;  %v475_v1 = vld [vmem:[#allocation1 + $0x7] ss:$8 sm:$0xf0]  }
  0x38   :  { %v477_v2 = vsel %vm282_vm1, %v475_v1, %v473_v0  ;;  %v485_v3 = vld [vmem:[#allocation1] ss:$8 sm:$0xf]   ;;  %v487_v4 = vld [vmem:[#allocation1 - $0x1f] ss:$8 sm:$0xf0]  }
  0x39   :  { %1228 = vrot.lane.b32.xlu0 %v1227_v62, %s1258_s14  ;;  %v1232_v5 = vpack.i.bf16 %v477_v2, %v464_v63  ;;  %v489_v6 = vsel %vm282_vm1, %v487_v4, %v485_v3  ;;  %v498_v7 = vld [vmem:[#allocation1 + $0x2] ss:$8 sm:$0xf]   ;;  %v500_v8 = vld [vmem:[#allocation1 - $0x1d] ss:$8 sm:$0xf0]  }
  0x3a   :  { %v502_v9 = vsel %vm282_vm1, %v500_v8, %v498_v7  ;;  %v511_v10 = vld [vmem:[#allocation1 + $0x4] ss:$8 sm:$0xf]   ;;  %v513_v11 = vld [vmem:[#allocation1 - $0x1b] ss:$8 sm:$0xf0]  }
  0x3b   :  { %1233 = vrot.lane.b32.xlu1 %v1232_v5, %s1258_s14  ;;  %v1237_v12 = vpack.i.bf16 %v502_v9, %v489_v6  ;;  %v515_v13 = vsel %vm282_vm1, %v513_v11, %v511_v10  ;;  %v524_v14 = vld [vmem:[#allocation1 + $0x6] ss:$8 sm:$0xf]   ;;  %v526_v15 = vld [vmem:[#allocation1 - $0x19] ss:$8 sm:$0xf0]  }
  0x3c   :  { %v528_v16 = vsel %vm282_vm1, %v526_v15, %v524_v14  ;;  %v537_v17 = vld [vmem:[#allocation1 + $0x20] ss:$8 sm:$0xf]   ;;  %v539_v18 = vld [vmem:[#allocation1 + $0x1] ss:$8 sm:$0xf0]  }
  0x3d   :  { %1238 = vrot.lane.b32.xlu0 %v1237_v12, %s1259_s15  ;;  %v1242_v19 = vpack.i.bf16 %v528_v16, %v515_v13  ;;  %v541_v20 = vsel %vm282_vm1, %v539_v18, %v537_v17  ;;  %v550_v21 = vld [vmem:[#allocation1 + $0x22] ss:$8 sm:$0xf]   ;;  %v552_v22 = vld [vmem:[#allocation1 + $0x3] ss:$8 sm:$0xf0]  }
  0x3e   :  { %v554_v23 = vsel %vm282_vm1, %v552_v22, %v550_v21  ;;  %v563_v24 = vld [vmem:[#allocation1 + $0x24] ss:$8 sm:$0xf]   ;;  %v565_v25 = vld [vmem:[#allocation1 + $0x5] ss:$8 sm:$0xf0]  }
  0x3f   :  { %1243 = vrot.lane.b32.xlu1 %v1242_v19, %s1259_s15  ;;  %v1247_v26 = vpack.i.bf16 %v554_v23, %v541_v20  ;;  %v567_v27 = vsel %vm282_vm1, %v565_v25, %v563_v24  ;;  %v576_v28 = vld [vmem:[#allocation1 + $0x26] ss:$8 sm:$0xf]   ;;  %v578_v29 = vld [vmem:[#allocation1 + $0x7] ss:$8 sm:$0xf0]  }
  0x40   :  { %v580_v30 = vsel %vm282_vm1, %v578_v29, %v576_v28  ;;  %v1260_v7 = vmov 0.0  }
  0x41   :  { %1248 = vrot.lane.b32.xlu0 %v1247_v26, %s1259_s15  ;;  %v1252_v31 = vpack.i.bf16 %v580_v30, %v567_v27 }
  0x43   :  { %1253 = vrot.lane.b32.xlu1 %v1252_v31, %s1259_s15 }
  0x9f   :  { %v1199_v32 = vpop.permute.xlu0 %1198 }
  0xa0   :  { %v1201_v33 = vunpack.i.h.bf16 %v1199_v32  ;;  %v1200_v34 = vunpack.i.l.bf16 %v1199_v32 }
  0xa1   :  { %v1209_v35 = vpop.permute.xlu1 %1208 }
  0xa2   :  { %301 = vst.msk [vmem:[#allocation0 + $0x41] ss:$8 sm:$0xf] %vm130_vm0, %v1201_v33   ;;  %303 = vst.msk [vmem:[#allocation0 + $0x41] ss:$8 sm:$0xf0] %vm130_vm0, %v1201_v33   ;;  %v1211_v36 = vunpack.i.h.bf16 %v1209_v35  ;;  %v1210_v37 = vunpack.i.l.bf16 %v1209_v35 }
  0xa3   :  { %288 = vst.msk [vmem:[#allocation0 + $0x1] ss:$8 sm:$0xf] %vm130_vm0, %v1200_v34   ;;  %290 = vst.msk [vmem:[#allocation0 + $0x1] ss:$8 sm:$0xf0] %vm130_vm0, %v1200_v34   ;;  %v1204_v38 = vpop.permute.xlu0 %1203 }
  0xa4   :  { %353 = vst.msk [vmem:[#allocation0 + $0x141] ss:$8 sm:$0xf] %vm130_vm0, %v1211_v36   ;;  %355 = vst.msk [vmem:[#allocation0 + $0x141] ss:$8 sm:$0xf0] %vm130_vm0, %v1211_v36   ;;  %v1206_v39 = vunpack.i.h.bf16 %v1204_v38  ;;  %v1205_v40 = vunpack.i.l.bf16 %v1204_v38 }
  0xa5   :  { %340 = vst.msk [vmem:[#allocation0 + $0x101] ss:$8 sm:$0xf] %vm130_vm0, %v1210_v37   ;;  %342 = vst.msk [vmem:[#allocation0 + $0x101] ss:$8 sm:$0xf0] %vm130_vm0, %v1210_v37   ;;  %v1214_v41 = vpop.permute.xlu1 %1213 }
  0xa6   :  { %327 = vst.msk [vmem:[#allocation0 + $0xc1] ss:$8 sm:$0xf] %vm130_vm0, %v1206_v39   ;;  %329 = vst.msk [vmem:[#allocation0 + $0xc1] ss:$8 sm:$0xf0] %vm130_vm0, %v1206_v39   ;;  %v1216_v42 = vunpack.i.h.bf16 %v1214_v41  ;;  %v1215_v43 = vunpack.i.l.bf16 %v1214_v41 }
  0xa7   :  { %314 = vst.msk [vmem:[#allocation0 + $0x81] ss:$8 sm:$0xf] %vm130_vm0, %v1205_v40   ;;  %316 = vst.msk [vmem:[#allocation0 + $0x81] ss:$8 sm:$0xf0] %vm130_vm0, %v1205_v40   ;;  %v1219_v44 = vpop.permute.xlu0 %1218 }
  0xa8   :  { %379 = vst.msk [vmem:[#allocation0 + $0x1c1] ss:$8 sm:$0xf] %vm130_vm0, %v1216_v42   ;;  %381 = vst.msk [vmem:[#allocation0 + $0x1c1] ss:$8 sm:$0xf0] %vm130_vm0, %v1216_v42   ;;  %v1221_v45 = vunpack.i.h.bf16 %v1219_v44  ;;  %v1220_v46 = vunpack.i.l.bf16 %v1219_v44 }
  0xa9   :  { %366 = vst.msk [vmem:[#allocation0 + $0x181] ss:$8 sm:$0xf] %vm130_vm0, %v1215_v43   ;;  %368 = vst.msk [vmem:[#allocation0 + $0x181] ss:$8 sm:$0xf0] %vm130_vm0, %v1215_v43   ;;  %v1224_v47 = vpop.permute.xlu1 %1223 }
  0xaa   :  { %404 = vst.msk [vmem:[#allocation0 + $0x42] ss:$8 sm:$0xf] %vm130_vm0, %v1221_v45   ;;  %406 = vst.msk [vmem:[#allocation0 + $0x42] ss:$8 sm:$0xf0] %vm130_vm0, %v1221_v45   ;;  %v1226_v48 = vunpack.i.h.bf16 %v1224_v47  ;;  %v1225_v49 = vunpack.i.l.bf16 %v1224_v47 }
  0xab   :  { %391 = vst.msk [vmem:[#allocation0 + $0x2] ss:$8 sm:$0xf] %vm130_vm0, %v1220_v46   ;;  %393 = vst.msk [vmem:[#allocation0 + $0x2] ss:$8 sm:$0xf0] %vm130_vm0, %v1220_v46   ;;  %v1229_v50 = vpop.permute.xlu0 %1228 }
  0xac   :  { %430 = vst.msk [vmem:[#allocation0 + $0xc2] ss:$8 sm:$0xf] %vm130_vm0, %v1226_v48   ;;  %432 = vst.msk [vmem:[#allocation0 + $0xc2] ss:$8 sm:$0xf0] %vm130_vm0, %v1226_v48   ;;  %v1231_v51 = vunpack.i.h.bf16 %v1229_v50  ;;  %v1230_v52 = vunpack.i.l.bf16 %v1229_v50 }
  0xad   :  { %417 = vst.msk [vmem:[#allocation0 + $0x82] ss:$8 sm:$0xf] %vm130_vm0, %v1225_v49   ;;  %419 = vst.msk [vmem:[#allocation0 + $0x82] ss:$8 sm:$0xf0] %vm130_vm0, %v1225_v49   ;;  %v1234_v53 = vpop.permute.xlu1 %1233 }
  0xae   :  { %456 = vst.msk [vmem:[#allocation0 + $0x142] ss:$8 sm:$0xf] %vm130_vm0, %v1231_v51   ;;  %458 = vst.msk [vmem:[#allocation0 + $0x142] ss:$8 sm:$0xf0] %vm130_vm0, %v1231_v51   ;;  %v1236_v54 = vunpack.i.h.bf16 %v1234_v53  ;;  %v1235_v55 = vunpack.i.l.bf16 %v1234_v53 }
  0xaf   :  { %443 = vst.msk [vmem:[#allocation0 + $0x102] ss:$8 sm:$0xf] %vm130_vm0, %v1230_v52   ;;  %445 = vst.msk [vmem:[#allocation0 + $0x102] ss:$8 sm:$0xf0] %vm130_vm0, %v1230_v52   ;;  %v1239_v56 = vpop.permute.xlu0 %1238 }
  0xb0   :  { %482 = vst.msk [vmem:[#allocation0 + $0x1c2] ss:$8 sm:$0xf] %vm130_vm0, %v1236_v54   ;;  %484 = vst.msk [vmem:[#allocation0 + $0x1c2] ss:$8 sm:$0xf0] %vm130_vm0, %v1236_v54   ;;  %v1241_v57 = vunpack.i.h.bf16 %v1239_v56  ;;  %v1240_v58 = vunpack.i.l.bf16 %v1239_v56 }
  0xb1   :  { %469 = vst.msk [vmem:[#allocation0 + $0x182] ss:$8 sm:$0xf] %vm130_vm0, %v1235_v55   ;;  %471 = vst.msk [vmem:[#allocation0 + $0x182] ss:$8 sm:$0xf0] %vm130_vm0, %v1235_v55   ;;  %v1244_v59 = vpop.permute.xlu1 %1243 }
  0xb2   :  { %507 = vst.msk [vmem:[#allocation0 + $0x43] ss:$8 sm:$0xf] %vm130_vm0, %v1241_v57   ;;  %509 = vst.msk [vmem:[#allocation0 + $0x43] ss:$8 sm:$0xf0] %vm130_vm0, %v1241_v57   ;;  %v1246_v60 = vunpack.i.h.bf16 %v1244_v59  ;;  %v1245_v61 = vunpack.i.l.bf16 %v1244_v59 }
  0xb3   :  { %494 = vst.msk [vmem:[#allocation0 + $0x3] ss:$8 sm:$0xf] %vm130_vm0, %v1240_v58   ;;  %496 = vst.msk [vmem:[#allocation0 + $0x3] ss:$8 sm:$0xf0] %vm130_vm0, %v1240_v58   ;;  %v1249_v62 = vpop.permute.xlu0 %1248 }
  0xb4   :  { %533 = vst.msk [vmem:[#allocation0 + $0xc3] ss:$8 sm:$0xf] %vm130_vm0, %v1246_v60   ;;  %535 = vst.msk [vmem:[#allocation0 + $0xc3] ss:$8 sm:$0xf0] %vm130_vm0, %v1246_v60   ;;  %v1251_v63 = vunpack.i.h.bf16 %v1249_v62  ;;  %v1250_v0 = vunpack.i.l.bf16 %v1249_v62 }
  0xb5   :  { %520 = vst.msk [vmem:[#allocation0 + $0x83] ss:$8 sm:$0xf] %vm130_vm0, %v1245_v61   ;;  %522 = vst.msk [vmem:[#allocation0 + $0x83] ss:$8 sm:$0xf0] %vm130_vm0, %v1245_v61   ;;  %v1254_v1 = vpop.permute.xlu1 %1253 }
  0xb6   :  { %559 = vst.msk [vmem:[#allocation0 + $0x143] ss:$8 sm:$0xf] %vm130_vm0, %v1251_v63   ;;  %561 = vst.msk [vmem:[#allocation0 + $0x143] ss:$8 sm:$0xf0] %vm130_vm0, %v1251_v63   ;;  %v1256_v2 = vunpack.i.h.bf16 %v1254_v1  ;;  %v1255_v3 = vunpack.i.l.bf16 %v1254_v1 }
  0xb7   :  { %546 = vst.msk [vmem:[#allocation0 + $0x103] ss:$8 sm:$0xf] %vm130_vm0, %v1250_v0   ;;  %548 = vst.msk [vmem:[#allocation0 + $0x103] ss:$8 sm:$0xf0] %vm130_vm0, %v1250_v0  }
  0xb8   :  { %585 = vst.msk [vmem:[#allocation0 + $0x1c3] ss:$8 sm:$0xf] %vm130_vm0, %v1256_v2   ;;  %587 = vst.msk [vmem:[#allocation0 + $0x1c3] ss:$8 sm:$0xf0] %vm130_vm0, %v1256_v2  }
  0xb9   :  { %572 = vst.msk [vmem:[#allocation0 + $0x183] ss:$8 sm:$0xf] %vm130_vm0, %v1255_v3   ;;  %574 = vst.msk [vmem:[#allocation0 + $0x183] ss:$8 sm:$0xf0] %vm130_vm0, %v1255_v3  }
  0xba   :  { %v592_v4 = vld [vmem:[#allocation0] sm:$0xf]  ;;  %v597_v5 = vld [vmem:[#allocation0 + $0x8] sm:$0xf]  ;;  %v603_v6 = vld [vmem:[#allocation0 + $0x10] sm:$0xf] }
  0xbb   :  { %v593_v8 = vpack.c.bf16 %v1260_v7, %v592_v4  ;;  %v598_v9 = vpack.c.bf16 %v1260_v7, %v597_v5  ;;  %v604_v10 = vpack.c.bf16 %v1260_v7, %v603_v6  ;;  %v610_v11 = vld [vmem:[#allocation0 + $0x18] sm:$0xf]  ;;  %v617_v12 = vld [vmem:[#allocation0 + $0x20] sm:$0xf]  ;;  %v624_v13 = vld [vmem:[#allocation0 + $0x28] sm:$0xf] }
  0xbc   :  { %v611_v14 = vpack.c.bf16 %v1260_v7, %v610_v11  ;;  %v618_v15 = vpack.c.bf16 %v1260_v7, %v617_v12  ;;  %v625_v16 = vpack.c.bf16 %v1260_v7, %v624_v13  ;;  %v631_v17 = vld [vmem:[#allocation0 + $0x30] sm:$0xf]  ;;  %v638_v18 = vld [vmem:[#allocation0 + $0x38] sm:$0xf]  ;;  %v645_v19 = vld [vmem:[#allocation0 + $0x40] sm:$0xf] }
  0xbd   :  { %595 = vst [vmem:[%s1709_s1] sm:$0x3] %v593_v8  ;;  %1111 = vst [vmem:[%s1709_s1 + $0x2] sm:$0x3] %v598_v9  ;;  %v632_v20 = vpack.c.bf16 %v1260_v7, %v631_v17  ;;  %v639_v21 = vpack.c.bf16 %v1260_v7, %v638_v18  ;;  %v652_v22 = vld [vmem:[#allocation0 + $0x48] sm:$0xf]  ;;  %v646_v25 = vpack.c.bf16 %v1260_v7, %v645_v19 }
  0xbe   :  { %1112 = vst [vmem:[%s1709_s1 + $0x4] sm:$0x3] %v604_v10  ;;  %v659_v23 = vld [vmem:[#allocation0 + $0x50] sm:$0xf]  ;;  %v666_v24 = vld [vmem:[#allocation0 + $0x58] sm:$0xf]  ;;  %v653_v29 = vpack.c.bf16 %v1260_v7, %v652_v22 }
  0xbf   :  { %1113 = vst [vmem:[%s1709_s1 + $0x6] sm:$0x3] %v611_v14  ;;  %1114 = vst [vmem:[%s1709_s1 + $0x8] sm:$0x3] %v618_v15  ;;  %v673_v26 = vld [vmem:[#allocation0 + $0x60] sm:$0xf]  ;;  %v660_v30 = vpack.c.bf16 %v1260_v7, %v659_v23  ;;  %v667_v31 = vpack.c.bf16 %v1260_v7, %v666_v24 }
  0xc0   :  { %1115 = vst [vmem:[%s1709_s1 + $0xa] sm:$0x3] %v625_v16  ;;  %v680_v27 = vld [vmem:[#allocation0 + $0x68] sm:$0xf]  ;;  %v687_v28 = vld [vmem:[#allocation0 + $0x70] sm:$0xf]  ;;  %v674_v35 = vpack.c.bf16 %v1260_v7, %v673_v26 }
  0xc1   :  { %1116 = vst [vmem:[%s1709_s1 + $0xc] sm:$0x3] %v632_v20  ;;  %1117 = vst [vmem:[%s1709_s1 + $0xe] sm:$0x3] %v639_v21  ;;  %v694_v32 = vld [vmem:[#allocation0 + $0x78] sm:$0xf]  ;;  %v681_v36 = vpack.c.bf16 %v1260_v7, %v680_v27  ;;  %v688_v37 = vpack.c.bf16 %v1260_v7, %v687_v28 }
  0xc2   :  { %v701_v33 = vld [vmem:[#allocation0 + $0x80] sm:$0xf]  ;;  %v708_v34 = vld [vmem:[#allocation0 + $0x88] sm:$0xf]  ;;  %1118 = vst [vmem:[%s1709_s1 + $0x10] sm:$0x3] %v646_v25  ;;  %v695_v43 = vpack.c.bf16 %v1260_v7, %v694_v32 }
  0xc3   :  { %v702_v38 = vpack.c.bf16 %v1260_v7, %v701_v33  ;;  %v709_v39 = vpack.c.bf16 %v1260_v7, %v708_v34  ;;  %v715_v40 = vld [vmem:[#allocation0 + $0x90] sm:$0xf]  ;;  %v722_v41 = vld [vmem:[#allocation0 + $0x98] sm:$0xf]  ;;  %v757_v42 = vld [vmem:[#allocation0 + $0xc0] sm:$0xf] }
  0xc4   :  { %1119 = vst [vmem:[%s1709_s1 + $0x12] sm:$0x3] %v653_v29  ;;  %1120 = vst [vmem:[%s1709_s1 + $0x14] sm:$0x3] %v660_v30  ;;  %v716_v44 = vpack.c.bf16 %v1260_v7, %v715_v40  ;;  %v723_v45 = vpack.c.bf16 %v1260_v7, %v722_v41  ;;  %v758_v46 = vpack.c.bf16 %v1260_v7, %v757_v42  ;;  %v764_v47 = vld [vmem:[#allocation0 + $0xc8] sm:$0xf] }
  0xc5   :  { %1121 = vst [vmem:[%s1709_s1 + $0x16] sm:$0x3] %v667_v31  ;;  %v771_v48 = vld [vmem:[#allocation0 + $0xd0] sm:$0xf]  ;;  %v778_v49 = vld [vmem:[#allocation0 + $0xd8] sm:$0xf]  ;;  %v765_v50 = vpack.c.bf16 %v1260_v7, %v764_v47 }
  0xc6   :  { %1122 = vst [vmem:[%s1709_s1 + $0x18] sm:$0x3] %v674_v35  ;;  %1123 = vst [vmem:[%s1709_s1 + $0x1a] sm:$0x3] %v681_v36  ;;  %v772_v51 = vpack.c.bf16 %v1260_v7, %v771_v48  ;;  %v779_v52 = vpack.c.bf16 %v1260_v7, %v778_v49  ;;  %v785_v53 = vld [vmem:[#allocation0 + $0xe0] sm:$0xf] }
  0xc7   :  { %1124 = vst [vmem:[%s1709_s1 + $0x1c] sm:$0x3] %v688_v37  ;;  %1126 = vst [vmem:[%s1709_s1 + $0x20] sm:$0x3] %v702_v38  ;;  %v792_v54 = vld [vmem:[#allocation0 + $0xe8] sm:$0xf]  ;;  %v786_v56 = vpack.c.bf16 %v1260_v7, %v785_v53 }
  0xc8   :  { %1127 = vst [vmem:[%s1709_s1 + $0x22] sm:$0x3] %v709_v39  ;;  %v799_v55 = vld [vmem:[#allocation0 + $0xf0] sm:$0xf]  ;;  %1125 = vst [vmem:[%s1709_s1 + $0x1e] sm:$0x3] %v695_v43  ;;  %v793_v57 = vpack.c.bf16 %v1260_v7, %v792_v54 }
  0xc9   :  { %1128 = vst [vmem:[%s1709_s1 + $0x24] sm:$0x3] %v716_v44  ;;  %1129 = vst [vmem:[%s1709_s1 + $0x26] sm:$0x3] %v723_v45  ;;  %v800_v58 = vpack.c.bf16 %v1260_v7, %v799_v55  ;;  %v806_v59 = vld [vmem:[#allocation0 + $0xf8] sm:$0xf] }
  0xca   :  { %1134 = vst [vmem:[%s1709_s1 + $0x30] sm:$0x3] %v758_v46  ;;  %v729_v60 = vld [vmem:[#allocation0 + $0xa0] sm:$0xf]  ;;  %v736_v61 = vld [vmem:[#allocation0 + $0xa8] sm:$0xf]  ;;  %v807_v62 = vpack.c.bf16 %v1260_v7, %v806_v59 }
  0xcb   :  { %1135 = vst [vmem:[%s1709_s1 + $0x32] sm:$0x3] %v765_v50  ;;  %1136 = vst [vmem:[%s1709_s1 + $0x34] sm:$0x3] %v772_v51  ;;  %v743_v63 = vld [vmem:[#allocation0 + $0xb0] sm:$0xf]  ;;  %v730_v2 = vpack.c.bf16 %v1260_v7, %v729_v60  ;;  %v737_v3 = vpack.c.bf16 %v1260_v7, %v736_v61 }
  0xcc   :  { %1137 = vst [vmem:[%s1709_s1 + $0x36] sm:$0x3] %v779_v52  ;;  %v750_v0 = vld [vmem:[#allocation0 + $0xb8] sm:$0xf]  ;;  %v813_v1 = vld [vmem:[#allocation0 + $0x100] sm:$0xf]  ;;  %v744_v9 = vpack.c.bf16 %v1260_v7, %v743_v63 }
  0xcd   :  { %1138 = vst [vmem:[%s1709_s1 + $0x38] sm:$0x3] %v786_v56  ;;  %1139 = vst [vmem:[%s1709_s1 + $0x3a] sm:$0x3] %v793_v57  ;;  %v814_v4 = vpack.c.bf16 %v1260_v7, %v813_v1  ;;  %v820_v5 = vld [vmem:[#allocation0 + $0x108] sm:$0xf]  ;;  %v751_v10 = vpack.c.bf16 %v1260_v7, %v750_v0 }
  0xce   :  { %1140 = vst [vmem:[%s1709_s1 + $0x3c] sm:$0x3] %v800_v58  ;;  %v827_v6 = vld [vmem:[#allocation0 + $0x110] sm:$0xf]  ;;  %v834_v8 = vld [vmem:[#allocation0 + $0x118] sm:$0xf]  ;;  %v821_v11 = vpack.c.bf16 %v1260_v7, %v820_v5 }
  0xcf   :  { %1141 = vst [vmem:[%s1709_s1 + $0x3e] sm:$0x3] %v807_v62  ;;  %v828_v12 = vpack.c.bf16 %v1260_v7, %v827_v6  ;;  %v835_v13 = vpack.c.bf16 %v1260_v7, %v834_v8  ;;  %v841_v14 = vld [vmem:[#allocation0 + $0x120] sm:$0xf]  ;;  %v848_v15 = vld [vmem:[#allocation0 + $0x128] sm:$0xf] }
  0xd0   :  { %v855_v16 = vld [vmem:[#allocation0 + $0x130] sm:$0xf]  ;;  %1130 = vst [vmem:[%s1709_s1 + $0x28] sm:$0x3] %v730_v2  ;;  %1131 = vst [vmem:[%s1709_s1 + $0x2a] sm:$0x3] %v737_v3  ;;  %v842_v17 = vpack.c.bf16 %v1260_v7, %v841_v14  ;;  %v849_v18 = vpack.c.bf16 %v1260_v7, %v848_v15 }
  0xd1   :  { %1142 = vst [vmem:[%s1709_s1 + $0x40] sm:$0x3] %v814_v4  ;;  %v856_v19 = vpack.c.bf16 %v1260_v7, %v855_v16  ;;  %v862_v20 = vld [vmem:[#allocation0 + $0x138] sm:$0xf]  ;;  %v869_v21 = vld [vmem:[#allocation0 + $0x140] sm:$0xf] }
  0xd2   :  { %v876_v22 = vld [vmem:[#allocation0 + $0x148] sm:$0xf]  ;;  %1132 = vst [vmem:[%s1709_s1 + $0x2c] sm:$0x3] %v744_v9  ;;  %1133 = vst [vmem:[%s1709_s1 + $0x2e] sm:$0x3] %v751_v10  ;;  %v863_v23 = vpack.c.bf16 %v1260_v7, %v862_v20  ;;  %v870_v24 = vpack.c.bf16 %v1260_v7, %v869_v21 }
  0xd3   :  { %1143 = vst [vmem:[%s1709_s1 + $0x42] sm:$0x3] %v821_v11  ;;  %1144 = vst [vmem:[%s1709_s1 + $0x44] sm:$0x3] %v828_v12  ;;  %v877_v25 = vpack.c.bf16 %v1260_v7, %v876_v22  ;;  %v883_v26 = vld [vmem:[#allocation0 + $0x150] sm:$0xf] }
  0xd4   :  { %1145 = vst [vmem:[%s1709_s1 + $0x46] sm:$0x3] %v835_v13  ;;  %v890_v27 = vld [vmem:[#allocation0 + $0x158] sm:$0xf]  ;;  %v897_v28 = vld [vmem:[#allocation0 + $0x160] sm:$0xf]  ;;  %v884_v29 = vpack.c.bf16 %v1260_v7, %v883_v26 }
  0xd5   :  { %1146 = vst [vmem:[%s1709_s1 + $0x48] sm:$0x3] %v842_v17  ;;  %1147 = vst [vmem:[%s1709_s1 + $0x4a] sm:$0x3] %v849_v18  ;;  %v891_v30 = vpack.c.bf16 %v1260_v7, %v890_v27  ;;  %v898_v31 = vpack.c.bf16 %v1260_v7, %v897_v28  ;;  %v904_v32 = vld [vmem:[#allocation0 + $0x168] sm:$0xf] }
  0xd6   :  { %1148 = vst [vmem:[%s1709_s1 + $0x4c] sm:$0x3] %v856_v19  ;;  %v911_v33 = vld [vmem:[#allocation0 + $0x170] sm:$0xf]  ;;  %v918_v34 = vld [vmem:[#allocation0 + $0x178] sm:$0xf]  ;;  %v905_v35 = vpack.c.bf16 %v1260_v7, %v904_v32 }
  0xd7   :  { %1149 = vst [vmem:[%s1709_s1 + $0x4e] sm:$0x3] %v863_v23  ;;  %1150 = vst [vmem:[%s1709_s1 + $0x50] sm:$0x3] %v870_v24  ;;  %v912_v36 = vpack.c.bf16 %v1260_v7, %v911_v33  ;;  %v919_v37 = vpack.c.bf16 %v1260_v7, %v918_v34  ;;  %v925_v38 = vld [vmem:[#allocation0 + $0x180] sm:$0xf] }
  0xd8   :  { %1151 = vst [vmem:[%s1709_s1 + $0x52] sm:$0x3] %v877_v25  ;;  %v932_v39 = vld [vmem:[#allocation0 + $0x188] sm:$0xf]  ;;  %v939_v40 = vld [vmem:[#allocation0 + $0x190] sm:$0xf]  ;;  %v926_v41 = vpack.c.bf16 %v1260_v7, %v925_v38 }
  0xd9   :  { %1152 = vst [vmem:[%s1709_s1 + $0x54] sm:$0x3] %v884_v29  ;;  %1153 = vst [vmem:[%s1709_s1 + $0x56] sm:$0x3] %v891_v30  ;;  %v933_v42 = vpack.c.bf16 %v1260_v7, %v932_v39  ;;  %v940_v43 = vpack.c.bf16 %v1260_v7, %v939_v40  ;;  %v946_v44 = vld [vmem:[#allocation0 + $0x198] sm:$0xf] }
  0xda   :  { %1154 = vst [vmem:[%s1709_s1 + $0x58] sm:$0x3] %v898_v31  ;;  %v953_v45 = vld [vmem:[#allocation0 + $0x1a0] sm:$0xf]  ;;  %v960_v46 = vld [vmem:[#allocation0 + $0x1a8] sm:$0xf]  ;;  %v947_v47 = vpack.c.bf16 %v1260_v7, %v946_v44 }
  0xdb   :  { %1155 = vst [vmem:[%s1709_s1 + $0x5a] sm:$0x3] %v905_v35  ;;  %1156 = vst [vmem:[%s1709_s1 + $0x5c] sm:$0x3] %v912_v36  ;;  %v954_v48 = vpack.c.bf16 %v1260_v7, %v953_v45  ;;  %v961_v49 = vpack.c.bf16 %v1260_v7, %v960_v46  ;;  %v967_v50 = vld [vmem:[#allocation0 + $0x1b0] sm:$0xf] }
  0xdc   :  { %1157 = vst [vmem:[%s1709_s1 + $0x5e] sm:$0x3] %v919_v37  ;;  %v974_v51 = vld [vmem:[#allocation0 + $0x1b8] sm:$0xf]  ;;  %v981_v52 = vld [vmem:[#allocation0 + $0x1c0] sm:$0xf]  ;;  %v968_v53 = vpack.c.bf16 %v1260_v7, %v967_v50 }
  0xdd   :  { %1158 = vst [vmem:[%s1709_s1 + $0x60] sm:$0x3] %v926_v41  ;;  %1159 = vst [vmem:[%s1709_s1 + $0x62] sm:$0x3] %v933_v42  ;;  %v975_v54 = vpack.c.bf16 %v1260_v7, %v974_v51  ;;  %v982_v55 = vpack.c.bf16 %v1260_v7, %v981_v52  ;;  %v988_v56 = vld [vmem:[#allocation0 + $0x1c8] sm:$0xf] }
  0xde   :  { %1160 = vst [vmem:[%s1709_s1 + $0x64] sm:$0x3] %v940_v43  ;;  %v995_v57 = vld [vmem:[#allocation0 + $0x1d0] sm:$0xf]  ;;  %v1002_v58 = vld [vmem:[#allocation0 + $0x1d8] sm:$0xf]  ;;  %v989_v59 = vpack.c.bf16 %v1260_v7, %v988_v56 }
  0xdf   :  { %1161 = vst [vmem:[%s1709_s1 + $0x66] sm:$0x3] %v947_v47  ;;  %1162 = vst [vmem:[%s1709_s1 + $0x68] sm:$0x3] %v954_v48  ;;  %v996_v60 = vpack.c.bf16 %v1260_v7, %v995_v57  ;;  %v1003_v61 = vpack.c.bf16 %v1260_v7, %v1002_v58  ;;  %v1009_v62 = vld [vmem:[#allocation0 + $0x1e0] sm:$0xf] }
  0xe0   :  { %1163 = vst [vmem:[%s1709_s1 + $0x6a] sm:$0x3] %v961_v49  ;;  %v1016_v63 = vld [vmem:[#allocation0 + $0x1e8] sm:$0xf]  ;;  %v1023_v0 = vld [vmem:[#allocation0 + $0x1f0] sm:$0xf]  ;;  %v1010_v1 = vpack.c.bf16 %v1260_v7, %v1009_v62 }
  0xe1   :  { %1164 = vst [vmem:[%s1709_s1 + $0x6c] sm:$0x3] %v968_v53  ;;  %1165 = vst [vmem:[%s1709_s1 + $0x6e] sm:$0x3] %v975_v54  ;;  %v1017_v2 = vpack.c.bf16 %v1260_v7, %v1016_v63  ;;  %v1024_v3 = vpack.c.bf16 %v1260_v7, %v1023_v0  ;;  %v1030_v4 = vld [vmem:[#allocation0 + $0x1f8] sm:$0xf] }
  0xe2   :  { %1166 = vst [vmem:[%s1709_s1 + $0x70] sm:$0x3] %v982_v55  ;;  %1167 = vst [vmem:[%s1709_s1 + $0x72] sm:$0x3] %v989_v59  ;;  %v1031_v7 = vpack.c.bf16 %v1260_v7, %v1030_v4 }
  0xe3   :  { %1168 = vst [vmem:[%s1709_s1 + $0x74] sm:$0x3] %v996_v60  ;;  %1169 = vst [vmem:[%s1709_s1 + $0x76] sm:$0x3] %v1003_v61 }
  0xe4   :  { %1170 = vst [vmem:[%s1709_s1 + $0x78] sm:$0x3] %v1010_v1  ;;  %1171 = vst [vmem:[%s1709_s1 + $0x7a] sm:$0x3] %v1017_v2 }
  0xe5   :  { %1172 = vst [vmem:[%s1709_s1 + $0x7c] sm:$0x3] %v1024_v3  ;;  %1173 = vst [vmem:[%s1709_s1 + $0x7e] sm:$0x3] %v1031_v7 }

// kernel: text_encoder_forward.18
= control target key start
LH: loop header
LB: loop body
LE: loop exit
PB: predicated region body
PF: predicated region fallthrough
CT: control target
= control target key end

     0   :  { %v254_v20 = vlaneseq  ;;  %s606_s1 = inlined_call_operand.vmem [shape: bf16[256,128], index: 1, kind: input, shape index: {}]   ;;  %s607_s0 = inlined_call_operand.vmem [shape: bf16[32,256], index: 0, kind: input, shape index: {}]   ;;  %s608_s2 = inlined_call_operand.vmem [shape: bf16[1,128], index: 2, kind: input, shape index: {}]   ;;  %s609_s3 = inlined_call_operand.vmem [shape: bf16[32,128], index: 3, kind: input, shape index: {}]   ;;  %s610_s4 = inlined_call_operand.vmem [shape: bf16[1,128], index: 4, kind: input, shape index: {}]   ;;  %s611_s5 = inlined_call_operand.vmem [shape: bf16[1,128], index: 5, kind: input, shape index: {}]   ;;  %s612_s6 = inlined_call_operand.vmem [shape: bf16[32,128], index: 6, kind: output, shape index: {}]  }
   0x1   :  { %v455_v0 = vld [vmem:[%s606_s1 + $0x40] sm:$0xff]   ;;  %v457_v2 = vld [vmem:[%s606_s1 + $0x48] sm:$0xff]   ;;  %v459_v4 = vld [vmem:[%s606_s1 + $0x50] sm:$0xff]  }
   0x2   :  { %v456_v1 = vld [vmem:[%s606_s1] sm:$0xff]   ;;  %411 = vmatprep.subr.bf16.mxu0 %v455_v0  ;;  %439 = vmatprep.subr.bf16.mxu1 %v455_v0  ;;  %v458_v3 = vld [vmem:[%s606_s1 + $0x8] sm:$0xff]   ;;  %v460_v5 = vld [vmem:[%s606_s1 + $0x10] sm:$0xff]   ;;  %v255_v21 = vshrl.u32 %v254_v20, 7 }
   0x3   :  { %412 = vmatpush3.bf16.msra.mxu0 %v456_v1  ;;  %447 = vmatpush3.bf16.msra.mxu1 %v456_v1  ;;  %v461_v6 = vld [vmem:[%s606_s1 + $0x58] sm:$0xff]   ;;  %v463_v8 = vld [vmem:[%s606_s1 + $0x60] sm:$0xff]   ;;  %v465_v10 = vld [vmem:[%s606_s1 + $0x68] sm:$0xff]  }
   0x4   :  { %413 = vmatprep.subr.bf16.mxu0 %v457_v2  ;;  %440 = vmatprep.subr.bf16.mxu1 %v457_v2  ;;  %v462_v7 = vld [vmem:[%s606_s1 + $0x18] sm:$0xff]   ;;  %v464_v9 = vld [vmem:[%s606_s1 + $0x20] sm:$0xff]   ;;  %v466_v13 = vld [vmem:[%s606_s1 + $0x28] sm:$0xff]   ;;  %v583_v24 = vsub.s32 0, %v255_v21 }
   0x5   :  { %v473_v11 = vld [vmem:[%s607_s0 + $0x4] ss:$8 sps:$4 sm:$0xff]   ;;  %v476_v12 = vld [vmem:[%s607_s0 + $0x14] ss:$8 sps:$4 sm:$0xff]   ;;  %v471_v18 = vld [vmem:[%s607_s0] ss:$8 sps:$4 sm:$0xff]  }
   0x6   :  { %v467_v14 = vld [vmem:[%s606_s1 + $0x70] sm:$0xff]   ;;  %220 = vmatprep.mubr.bf16.mxu0 %v473_v11  ;;  %228 = vmatprep.mubr.bf16.mxu1 %v476_v12  ;;  %v469_v16 = vld [vmem:[%s606_s1 + $0x78] sm:$0xff]   ;;  %v252_v22 = vld [vmem:[%s608_s2] sm:$0x1] }
   0x7   :  { %414 = vmatpush3.bf16.msra.mxu0 %v458_v3  ;;  %448 = vmatpush3.bf16.msra.mxu1 %v458_v3  ;;  %v468_v15 = vld [vmem:[%s606_s1 + $0x30] sm:$0xff]   ;;  %v470_v17 = vld [vmem:[%s606_s1 + $0x38] sm:$0xff]   ;;  %v253_v23 = vunpack.c.l.bf16 %v252_v22  ;;  %v409_v25 = vld [vmem:[%s609_s3 + $0x8] sm:$0xff]  }
   0x8   :  { %415 = vmatprep.subr.bf16.mxu0 %v459_v4  ;;  %441 = vmatprep.subr.bf16.mxu1 %v459_v4  ;;  %v474_v19 = vld [vmem:[%s607_s0 + $0x10] ss:$8 sps:$4 sm:$0xff]   ;;  %v392_v26 = vld [vmem:[%s609_s3] sm:$0xff]   ;;  %v397_v36 = vunpack.c.l.bf16 %v409_v25  ;;  %v398_v40 = vunpack.c.h.bf16 %v409_v25 }
   0x9   :  { %v257_v29 = vrot.slane %v253_v23, %v583_v24  ;;  %v393_v37 = vunpack.c.l.bf16 %v392_v26  ;;  %v394_v45 = vunpack.c.h.bf16 %v392_v26 }
   0xb   :  { %416 = vmatpush3.bf16.msra.mxu0 %v460_v5  ;;  %449 = vmatpush3.bf16.msra.mxu1 %v460_v5 }
   0xc   :  { %417 = vmatprep.subr.bf16.mxu0 %v461_v6  ;;  %442 = vmatprep.subr.bf16.mxu1 %v461_v6 }
   0xf   :  { %418 = vmatpush3.bf16.msra.mxu0 %v462_v7  ;;  %450 = vmatpush3.bf16.msra.mxu1 %v462_v7 }
  0x10   :  { %419 = vmatprep.subr.bf16.mxu0 %v463_v8  ;;  %443 = vmatprep.subr.bf16.mxu1 %v463_v8 }
  0x13   :  { %420 = vmatpush3.bf16.msra.mxu0 %v464_v9  ;;  %451 = vmatpush3.bf16.msra.mxu1 %v464_v9 }
  0x14   :  { %421 = vmatprep.subr.bf16.mxu0 %v465_v10  ;;  %444 = vmatprep.subr.bf16.mxu1 %v465_v10 }
  0x17   :  { %422 = vmatpush3.bf16.msra.mxu0 %v466_v13  ;;  %452 = vmatpush3.bf16.msra.mxu1 %v466_v13 }
  0x18   :  { %423 = vmatprep.subr.bf16.mxu0 %v467_v14  ;;  %445 = vmatprep.subr.bf16.mxu1 %v467_v14  ;;  %v319_v14 = vld [vmem:[%s610_s4] sm:$0x1] }
  0x1b   :  { %424 = vmatpush3.bf16.msra.mxu0 %v468_v15  ;;  %453 = vmatpush3.bf16.msra.mxu1 %v468_v15 }
  0x1c   :  { %425 = vmatprep.subr.bf16.mxu0 %v469_v16  ;;  %446 = vmatprep.subr.bf16.mxu1 %v469_v16 }
  0x1f   :  { %426 = vmatpush3.bf16.msra.mxu0 %v470_v17  ;;  %454 = vmatpush3.bf16.msra.mxu1 %v470_v17  ;;  %v320_v17 = vunpack.c.l.bf16 %v319_v14 }
  0x21   :  { %v324_v20 = vrot.slane %v320_v17, %v583_v24 }
  0x22   :  { %221 = vmatmul.mubr.bf16.vlgmr.msra.gmra.mrb[0].mxu0 %v471_v18  ;;  %229 = vmatmul.mubr.bf16.vlgmr.msra.gmra.mrb[0].mxu1 %v474_v19  ;;  %v329_v18 = vld [vmem:[%s611_s5] sm:$0x1] }
  0x23   :  { %v330_v21 = vunpack.c.l.bf16 %v329_v18 }
  0x25   :  { %v334_v26 = vrot.slane %v330_v21, %v583_v24 }
  0xf5   :  { %v427_v27 = vpop.f32.mrb[0].mxu0  ;;  %v433_v28 = vpop.f32.mrb[0].mxu1 }
  0xf6   :  { %v428_v30 = vpop.f32.mrb[1].mxu0  ;;  %v434_v31 = vpop.f32.mrb[1].mxu1 }
  0xf7   :  { %v429_v32 = vadd.f32 %v428_v30, %v427_v27  ;;  %v435_v33 = vadd.f32 %v434_v31, %v433_v28  ;;  %v430_v34 = vpop.f32.mrb[2].mxu0  ;;  %v436_v35 = vpop.f32.mrb[2].mxu1 }
  0xf8   :  { %v431_v38 = vpop.f32.mrb[3].mxu0  ;;  %v437_v39 = vpop.f32.mrb[3].mxu1 }
  0xf9   :  { %v258_v41 = vadd.f32 %v429_v32, %v257_v29  ;;  %v260_v42 = vadd.f32 %v435_v33, %v257_v29  ;;  %v432_v43 = vadd.f32 %v431_v38, %v430_v34  ;;  %v438_v44 = vadd.f32 %v437_v39, %v436_v35 }
  0xfb   :  { %v259_v46 = vadd.f32 %v432_v43, %v257_v29  ;;  %v261_v47 = vadd.f32 %v438_v44, %v257_v29  ;;  %v272_v48 = vadd.f32 %v397_v36, %v260_v42  ;;  %v270_v49 = vadd.f32 %v393_v37, %v258_v41 }
  0xfd   :  { %278 = vadd.xlane.f32.xlu1 %v272_v48  ;;  %274 = vadd.xlane.f32.xlu0 %v270_v49  ;;  %v273_v50 = vadd.f32 %v398_v40, %v261_v47  ;;  %v271_v51 = vadd.f32 %v394_v45, %v259_v46 }
 0x101   :  { %280 = vadd.xlane.f32.xlu1 %v273_v50  ;;  %276 = vadd.xlane.f32.xlu0 %v271_v51 }
 0x18a   :  { %v279_v52 = vpop.xlane.xlu1 %278  ;;  %v275_v53 = vpop.xlane.xlu0 %274 }
 0x18b   :  { %v285_v54 = vmul.f32 0.0078125, %v279_v52  ;;  %v283_v55 = vmul.f32 0.0078125, %v275_v53 }
 0x18d   :  { %v287_v56 = vsub.f32 %v270_v49, %v283_v55  ;;  %v289_v59 = vsub.f32 %v272_v48, %v285_v54 }
 0x18e   :  { %v281_v57 = vpop.xlane.xlu1 %280  ;;  %v277_v58 = vpop.xlane.xlu0 %276 }
 0x18f   :  { %v286_v60 = vmul.f32 0.0078125, %v281_v57  ;;  %v284_v61 = vmul.f32 0.0078125, %v277_v58  ;;  %v291_v62 = vmul.f32 %v287_v56, %v287_v56  ;;  %v293_v1 = vmul.f32 %v289_v59, %v289_v59 }
 0x191   :  { %v288_v63 = vsub.f32 %v271_v51, %v284_v61  ;;  %295 = vadd.xlane.f32.xlu0 %v291_v62  ;;  %v290_v0 = vsub.f32 %v273_v50, %v286_v60 }
 0x193   :  { %v292_v2 = vmul.f32 %v288_v63, %v288_v63  ;;  %v294_v3 = vmul.f32 %v290_v0, %v290_v0 }
 0x195   :  { %299 = vadd.xlane.f32.xlu0 %v293_v1  ;;  %297 = vadd.xlane.f32.xlu1 %v292_v2 }
 0x199   :  { %301 = vadd.xlane.f32.xlu1 %v294_v3 }
 0x21e   :  { %v296_v4 = vpop.xlane.xlu0 %295 }
 0x21f   :  { %v303_v5 = vmul.f32 0.0078125, %v296_v4 }
 0x221   :  { %v307_v6 = vadd.f32 1e-05, %v303_v5 }
 0x222   :  { %v298_v7 = vpop.xlane.xlu1 %297  ;;  %v300_v8 = vpop.xlane.xlu0 %299 }
 0x223   :  { %477 = vrsqrt.f32 %v307_v6  ;;  %v304_v9 = vmul.f32 0.0078125, %v298_v7  ;;  %v305_v10 = vmul.f32 0.0078125, %v300_v8 }
 0x225   :  { %v308_v11 = vadd.f32 1e-05, %v304_v9  ;;  %v309_v12 = vadd.f32 1e-05, %v305_v10 }
 0x226   :  { %v302_v13 = vpop.xlane.xlu1 %301 }
 0x227   :  { %479 = vrsqrt.f32 %v308_v11  ;;  %v306_v15 = vmul.f32 0.0078125, %v302_v13 }
 0x228   :  { %481 = vrsqrt.f32 %v309_v12 }
 0x229   :  { %v310_v16 = vadd.f32 1e-05, %v306_v15 }
 0x22b   :  { %483 = vrsqrt.f32 %v310_v16 }
 0x22d   :  { %v478_v19 = vpop.eup %477 }
 0x22e   :  { %v315_v22 = vmul.f32 %v478_v19, %v287_v56 }
 0x230   :  { %v325_v27 = vmul.f32 %v324_v20, %v315_v22 }
 0x231   :  { %v480_v23 = vpop.eup %479 }
 0x232   :  { %v482_v25 = vpop.eup %481  ;;  %v316_v28 = vmul.f32 %v480_v23, %v288_v63  ;;  %v335_v32 = vadd.f32 %v334_v26, %v325_v27 }
 0x233   :  { %v317_v29 = vmul.f32 %v482_v25, %v289_v59 }
 0x234   :  { %v326_v30 = vmul.f32 %v324_v20, %v316_v28 }
 0x235   :  { %v484_v31 = vpop.eup %483  ;;  %v327_v34 = vmul.f32 %v324_v20, %v317_v29 }
 0x236   :  { %v336_v33 = vadd.f32 %v334_v26, %v326_v30  ;;  %v318_v35 = vmul.f32 %v484_v31, %v290_v0 }
 0x237   :  { %v337_v38 = vadd.f32 %v334_v26, %v327_v34 }
 0x238   :  { %v402_v36 = vpack.c.bf16 %v336_v33, %v335_v32  ;;  %v328_v37 = vmul.f32 %v324_v20, %v318_v35 }
 0x23a   :  { %403 = vst [vmem:[%s612_s6] sm:$0xff] %v402_v36   ;;  %v338_v39 = vadd.f32 %v334_v26, %v328_v37 }
 0x23c   :  { %v407_v40 = vpack.c.bf16 %v338_v39, %v337_v38 }
 0x23e   :  { %410 = vst [vmem:[%s612_s6 + $0x8] sm:$0xff] %v407_v40  }

// kernel: text_encoder_forward.23
= control target key start
LH: loop header
LB: loop body
LE: loop exit
PB: predicated region body
PF: predicated region fallthrough
CT: control target
= control target key end

     0   :  { %8 = vsyncpa [#allocation5], 0  ;;  %s1177_s0 = inlined_call_operand.vmem [shape: bf16[32,128], index: 0, kind: input, shape index: {}]   ;;  %s1178_s1 = inlined_call_operand.vmem [shape: bf16[1,128,768], index: 1, kind: input, shape index: {}]   ;;  %s1179_s2 = inlined_call_operand.vmem [shape: bf16[1,1,768], index: 2, kind: input, shape index: {}]   ;;  %s1180_s3 = inlined_call_operand.hbm [shape: f32[1,32,768], index: 3, kind: output, shape index: {}]  }
   0x1   :  { %10 = vsyncpa [#allocation5 + $0x1], 0  ;;  %s1010_s12 = smov 0   ;;  %s1012_s13 = smov 0  }
   0x2   :  { %s1014_s14 = smov 0   ;;  %s1016_s15 = smov 0  }
   0x3   :  { %s1018_s16 = smov 0   ;;  %s1020_s17 = smov 0  }
   0x4 LB: > { %s767_s18 = sadd.s32 4294967295, %s983_s17   ;;  %s768_s19 = sadd.s32 4294967294, %s983_s17   ;;  %s983_s17 = sphi %s1020_s17, %s16_s17   ;;  %s979_s16 = sphi %s1018_s16, %s1187_s16   ;;  %s975_s15 = sphi %s1016_s15, %s1186_s15   ;;  %s971_s14 = sphi %s1014_s14, %s1185_s14   ;;  %s967_s13 = sphi %s1012_s13, %s1184_s13   ;;  %s963_s12 = sphi %s1010_s12, %s1183_s12  }
   0x5   : > { %s34_s20 = sadd.s32 1, %s979_s16  ;;  %s81_s21 = sadd.s32 1, %s971_s14 }
   0x6   : > { %p36_p0 = scmp.ge.s32.totalorder %s34_s20, 3  ;;  %p88_p1 = scmp.ne.s32.totalorder %s971_s14, %s967_s13 }
   0x7   : > { %p89_p2 = scmp.eq.s32.totalorder %s983_s17, 0  ;;  %p150_p3 = scmp.eq.s32.totalorder %s767_s18, 2 }
   0x8   : > { %s1189_s20 = smov (%p36_p0, %s34_s20), 0  ;;  %p155_p6 = scmp.ne.s32.totalorder %s967_s13, %s963_s12 }
   0x9   : > { %p90_p4 = por %p89_p2, %p88_p1  ;;  %p1049_p5 = por %p150_p3, %p88_p1 }
   0xa   : > { %s77_s23 = ssub.s32 %s979_s16, %s1189_s20  ;;  %p156_p8 = scmp.eq.s32.totalorder %s768_s19, 2 }
   0xb   : > { %p79_p7 = scmp.eq.s32.totalorder %s77_s23, 0  ;;  %p771_p10 = scmp.ge.s32.totalorder %s983_s17, 3 }
   0xc   : > { %p1060_p9 = por %p156_p8, %p155_p6 }
   0xd   : > { %s1058_s24 = scalar_select %p79_p7, %s971_s14, %s81_s21  }
   0xe   : > { %184 = sbr.rel (%p771_p10) target bundleno = 33 (0x21), region = 20 }
  0x15   : > { %187 = sbr.rel (!%p90_p4) target bundleno = 33 (0x21), region = 24  ;;  %s189_s26 = sand.u32 (%p90_p4), 1, %s971_s14  }
  0x16   : > { %s802_s27 = sshll.u32 (%p90_p4), %s979_s16, 3  ;;  %s772_s28 = sshll.u32 (%p90_p4), %s189_s26, 7 }
  0x17   : > { %s1070_s4 = scalar_lea.vmem (%p90_p4), %s1178_s1, %s802_s27  ;;  %s191_s5 = scalar_lea.vmem (%p90_p4), [#allocation3], %s772_s28 }
  0x18   : > { %v257_v0 = vld [vmem:[%s1070_s4] sm:$0xff] (%p90_p4)  ;;  %v259_v1 = vld [vmem:[%s1070_s4 + $0x18] sm:$0xff] (%p90_p4)  ;;  %v261_v2 = vld [vmem:[%s1070_s4 + $0x30] sm:$0xff] (%p90_p4) }
  0x19   : > { %258 = vst [vmem:[%s191_s5] sm:$0xff] (%p90_p4), %v257_v0  ;;  %260 = vst [vmem:[%s191_s5 + $0x8] sm:$0xff] (%p90_p4), %v259_v1  ;;  %v263_v3 = vld [vmem:[%s1070_s4 + $0x48] sm:$0xff] (%p90_p4)  ;;  %v265_v4 = vld [vmem:[%s1070_s4 + $0x60] sm:$0xff] (%p90_p4) }
  0x1a   : > { %262 = vst [vmem:[%s191_s5 + $0x10] sm:$0xff] (%p90_p4), %v261_v2  ;;  %v267_v5 = vld [vmem:[%s1070_s4 + $0x78] sm:$0xff] (%p90_p4)  ;;  %264 = vst [vmem:[%s191_s5 + $0x18] sm:$0xff] (%p90_p4), %v263_v3  ;;  %v269_v6 = vld [vmem:[%s1070_s4 + $0x90] sm:$0xff] (%p90_p4) }
  0x1b   : > { %266 = vst [vmem:[%s191_s5 + $0x20] sm:$0xff] (%p90_p4), %v265_v4  ;;  %268 = vst [vmem:[%s191_s5 + $0x28] sm:$0xff] (%p90_p4), %v267_v5  ;;  %v271_v7 = vld [vmem:[%s1070_s4 + $0xa8] sm:$0xff] (%p90_p4)  ;;  %v273_v8 = vld [vmem:[%s1070_s4 + $0xc0] sm:$0xff] (%p90_p4) }
  0x1c   : > { %270 = vst [vmem:[%s191_s5 + $0x30] sm:$0xff] %v269_v6  ;;  %272 = vst [vmem:[%s191_s5 + $0x38] sm:$0xff] %v271_v7  ;;  %v275_v9 = vld [vmem:[%s1070_s4 + $0xd8] sm:$0xff]  ;;  %v277_v10 = vld [vmem:[%s1070_s4 + $0xf0] sm:$0xff] }
  0x1d   : > { %274 = vst [vmem:[%s191_s5 + $0x40] sm:$0xff] %v273_v8  ;;  %v279_v11 = vld [vmem:[%s1070_s4 + $0x108] sm:$0xff]  ;;  %276 = vst [vmem:[%s191_s5 + $0x48] sm:$0xff] %v275_v9  ;;  %v281_v12 = vld [vmem:[%s1070_s4 + $0x120] sm:$0xff] }
  0x1e   : > { %278 = vst [vmem:[%s191_s5 + $0x50] sm:$0xff] %v277_v10  ;;  %280 = vst [vmem:[%s191_s5 + $0x58] sm:$0xff] %v279_v11  ;;  %v283_v13 = vld [vmem:[%s1070_s4 + $0x138] sm:$0xff]  ;;  %v285_v14 = vld [vmem:[%s1070_s4 + $0x150] sm:$0xff] }
  0x1f   : > { %282 = vst [vmem:[%s191_s5 + $0x60] sm:$0xff] %v281_v12  ;;  %284 = vst [vmem:[%s191_s5 + $0x68] sm:$0xff] %v283_v13  ;;  %v287_v15 = vld [vmem:[%s1070_s4 + $0x168] sm:$0xff] }
  0x20   : > { %286 = vst [vmem:[%s191_s5 + $0x70] sm:$0xff] %v285_v14  ;;  %288 = vst [vmem:[%s191_s5 + $0x78] sm:$0xff] %v287_v15 }
  0x21 PF: > { %p775_p11 = scmp.ge.s32.totalorder %s983_s17, 1  ;;  %p305_p12 = scmp.lt.s32.totalorder %s983_s17, 4 }
  0x23   : > { %p306_p13 = pnand %p775_p11, %p305_p12 }
  0x24   : > { %s1091_s6 = sand.u32 (!%p306_p13), 1, %s967_s13   ;;  %v985_v16 = vmov (!%p306_p13), 0   ;;  %v903_v33 = vld [vmem:[%s1177_s0] sm:$0xff] (!%p306_p13)   ;;  %v904_v34 = vld [vmem:[%s1177_s0 + $0x8] sm:$0xff] (!%p306_p13)   ;;  %s778_s19 = sshll.u32 (!%p306_p13), %s975_s15, 1  ;;  %v589_v35 = vlaneseq (!%p306_p13) }
  0x25   : > { %309 = sbr.rel (%p306_p13) target bundleno = 305 (0x131), region = 66  ;;  %s776_s7 = sshll.u32 (!%p306_p13), %s1091_s6, 7  ;;  %538 = vmatprep.mubr.bf16.mxu0 (!%p306_p13), %v985_v16  ;;  %548 = vmatprep.mubr.bf16.mxu1 (!%p306_p13), %v985_v16 }
  0x26   : > { %s1094_s8 = scalar_lea.vmem (!%p306_p13), [#allocation3], %s776_s7  ;;  %p365_p0 = scmp.lt.s32.totalorder (!%p306_p13), %s778_s19, 5  ;;  %v590_v36 = vshrl.u32 (!%p306_p13), %v589_v35, 7 }
  0x27   : > { %v879_v17 = vld [vmem:[%s1094_s8 + $0x4] ss:$8 sps:$4 sm:$0xff] (!%p306_p13)   ;;  %v881_v18 = vld [vmem:[%s1094_s8] ss:$8 sps:$4 sm:$0xff] (!%p306_p13)   ;;  %v882_v19 = vld [vmem:[%s1094_s8 + $0x14] ss:$8 sps:$4 sm:$0xff] (!%p306_p13)  }
  0x28   : > { %506 = vmatprep.subr.bf16.mxu0 (!%p306_p13), %v879_v17  ;;  %804 = vmatprep.subr.bf16.mxu1 (!%p306_p13), %v879_v17  ;;  %v884_v20 = vld [vmem:[%s1094_s8 + $0x10] ss:$8 sps:$4 sm:$0xff] (!%p306_p13)   ;;  %v885_v21 = vld [vmem:[%s1094_s8 + $0x24] ss:$8 sps:$4 sm:$0xff] (!%p306_p13)   ;;  %v887_v22 = vld [vmem:[%s1094_s8 + $0x20] ss:$8 sps:$4 sm:$0xff] (!%p306_p13)  }
  0x29   : > { %507 = vmatpush1.bf16.msra.mxu0 (!%p306_p13), %v881_v18  ;;  %812 = vmatpush1.bf16.msra.mxu1 (!%p306_p13), %v881_v18  ;;  %v888_v23 = vld [vmem:[%s1094_s8 + $0x34] ss:$8 sps:$4 sm:$0xff] (!%p306_p13)   ;;  %v890_v24 = vld [vmem:[%s1094_s8 + $0x30] ss:$8 sps:$4 sm:$0xff] (!%p306_p13)   ;;  %v891_v25 = vld [vmem:[%s1094_s8 + $0x44] ss:$8 sps:$4 sm:$0xff] (!%p306_p13)  }
  0x2a   : > { %508 = vmatprep.subr.bf16.mxu0 (!%p306_p13), %v882_v19  ;;  %805 = vmatprep.subr.bf16.mxu1 (!%p306_p13), %v882_v19  ;;  %v893_v26 = vld [vmem:[%s1094_s8 + $0x40] ss:$8 sps:$4 sm:$0xff] (!%p306_p13)   ;;  %v894_v27 = vld [vmem:[%s1094_s8 + $0x54] ss:$8 sps:$4 sm:$0xff] (!%p306_p13)   ;;  %v896_v28 = vld [vmem:[%s1094_s8 + $0x50] ss:$8 sps:$4 sm:$0xff] (!%p306_p13)  }
  0x2b   : > { %v897_v29 = vld [vmem:[%s1094_s8 + $0x64] ss:$8 sps:$4 sm:$0xff] (!%p306_p13)   ;;  %v899_v30 = vld [vmem:[%s1094_s8 + $0x60] ss:$8 sps:$4 sm:$0xff] (!%p306_p13)   ;;  %v900_v31 = vld [vmem:[%s1094_s8 + $0x74] ss:$8 sps:$4 sm:$0xff] (!%p306_p13)  }
  0x2c   : > { %v902_v32 = vld [vmem:[%s1094_s8 + $0x70] ss:$8 sps:$4 sm:$0xff]   ;;  %s1191_s19 = smov (!%p365_p0, %s778_s19), 5  ;;  %v591_v39 = vsub.s32 0, %v590_v36  ;;  %v595_v40 = vsub.s32 2, %v590_v36  ;;  %s777_s27 = sshll.u32 %s1091_s6, 6 }
  0x2d   : > { %509 = vmatpush1.bf16.msra.mxu0 %v884_v20  ;;  %813 = vmatpush1.bf16.msra.mxu1 %v884_v20  ;;  %s369_s26 = scalar_lea.vmem %s1179_s2, %s1191_s19  ;;  %s350_s28 = scalar_lea.vmem [#allocation4], %s777_s27 }
  0x2e   : > { %510 = vmatprep.subr.bf16.mxu0 %v885_v21  ;;  %806 = vmatprep.subr.bf16.mxu1 %v885_v21  ;;  %v586_v37 = vld [vmem:[%s369_s26] sm:$0x3]  ;;  %s642_s29 = sshll.u32 %s350_s28, 4  ;;  %s803_s30 = sshll.u32 %s975_s15, 8  ;;  %s1124_s29 = int_to_ptr.vmem [resolvable:$true] %s642_s29 }
  0x2f   : > { %v587_v38 = vunpack.c.l.bf16 %v586_v37  ;;  %s1129_s5 = scalar_lea.hbm %s1180_s3, %s803_s30  ;;  %s624_s7 = scalar_lea.sflag [#allocation5], %s1091_s6 }
  0x30   : > { %s905_s8 = scalar_lea.vmem %s1124_s29, 1024  ;;  %s986_s9 = smov [#allocation4]  }
  0x31   : > { %511 = vmatpush1.bf16.msra.mxu0 %v887_v22  ;;  %814 = vmatpush1.bf16.msra.mxu1 %v887_v22  ;;  %v592_v41 = vrot.slane %v587_v38, %v591_v39  ;;  %v596_v42 = vrot.slane %v587_v38, %v595_v40  ;;  %p906_p1 = scmp.ne.s32.totalorder %s1124_s29, %s905_s8  ;;  %s909_s10 = sshll.u32 %s986_s9, 4  ;;  %s910_s10 = int_to_ptr.vmem [resolvable:$false] %s909_s10 }
  0x32   : > { %512 = vmatprep.subr.bf16.mxu0 %v888_v23  ;;  %807 = vmatprep.subr.bf16.mxu1 %v888_v23  ;;  %s911_s11 = scalar_lea.vmem %s910_s10, 2048  ;;  %p912_p4 = scmp.lt.s32.totalorder %s1124_s29, %s910_s10 }
  0x33   : > { %v602_v43 = vrot.slane %v592_v41, %v591_v39  ;;  %v606_v44 = vrot.slane %v596_v42, %v591_v39  ;;  %p907_p2 = pnand %p906_p1, %p1049_p5  ;;  %p913_p6 = scmp.lt.s32.totalorder %s911_s11, %s905_s8 }
  0x35   : > { %513 = vmatpush1.bf16.msra.mxu0 %v890_v24  ;;  %815 = vmatpush1.bf16.msra.mxu1 %v890_v24  ;;  %p908_p3 = pneg %p907_p2  ;;  %p914_p7 = por %p913_p6, %p912_p4 }
  0x36   : > { %514 = vmatprep.subr.bf16.mxu0 %v891_v25  ;;  %808 = vmatprep.subr.bf16.mxu1 %v891_v25 }
  0x37   : > { %p915_p8 = pnand %p914_p7, %p908_p3 }
  0x39   : > { %515 = vmatpush1.bf16.msra.mxu0 %v893_v26  ;;  %816 = vmatpush1.bf16.msra.mxu1 %v893_v26 }
  0x3a   : > { %516 = vmatprep.subr.bf16.mxu0 %v894_v27  ;;  %809 = vmatprep.subr.bf16.mxu1 %v894_v27 }
  0x3d   : > { %517 = vmatpush1.bf16.msra.mxu0 %v896_v28  ;;  %817 = vmatpush1.bf16.msra.mxu1 %v896_v28 }
  0x3e   : > { %518 = vmatprep.subr.bf16.mxu0 %v897_v29  ;;  %810 = vmatprep.subr.bf16.mxu1 %v897_v29 }
  0x41   : > { %519 = vmatpush1.bf16.msra.mxu0 %v899_v30  ;;  %818 = vmatpush1.bf16.msra.mxu1 %v899_v30 }
  0x42   : > { %520 = vmatprep.subr.bf16.mxu0 %v900_v31  ;;  %811 = vmatprep.subr.bf16.mxu1 %v900_v31 }
  0x45   : > { %521 = vmatpush1.bf16.msra.mxu0 %v902_v32  ;;  %819 = vmatpush1.bf16.msra.mxu1 %v902_v32 }
  0x48   : > { %539 = vmatmul.mubr.bf16.vlgmr.msra.gmra.mrb[0].mxu0 %v903_v33  ;;  %549 = vmatmul.mubr.bf16.vlgmr.msra.gmra.mrb[0].mxu1 %v904_v34 }
 0x11b   : > { %v540_v45 = vpop.f32.mrb[0].mxu0  ;;  %v550_v46 = vpop.f32.mrb[0].mxu1 }
 0x11c   : > { %v607_v47 = vadd.f32 %v602_v43, %v540_v45  ;;  %v611_v48 = vadd.f32 %v602_v43, %v550_v46  ;;  %v542_v49 = vpop.f32.mrb[1].mxu0  ;;  %v552_v50 = vpop.f32.mrb[1].mxu1 }
 0x11d   : > { %v608_v51 = vadd.f32 %v606_v44, %v542_v49  ;;  %v612_v52 = vadd.f32 %v606_v44, %v552_v50  ;;  %v544_v53 = vpop.f32.mrb[2].mxu0  ;;  %v554_v54 = vpop.f32.mrb[2].mxu1 }
 0x11e   : > { %615 = vst [vmem:[%s350_s28] sm:$0xff] %v607_v47  ;;  %619 = vst [vmem:[%s350_s28 + $0x20] sm:$0xff] %v611_v48  ;;  %v609_v55 = vadd.f32 %v602_v43, %v544_v53  ;;  %v613_v56 = vadd.f32 %v602_v43, %v554_v54  ;;  %v546_v57 = vpop.f32.mrb[3].mxu0  ;;  %v556_v58 = vpop.f32.mrb[3].mxu1 }
 0x11f   : > { %616 = vst [vmem:[%s350_s28 + $0x8] sm:$0xff] %v608_v51  ;;  %620 = vst [vmem:[%s350_s28 + $0x28] sm:$0xff] %v612_v52  ;;  %v610_v59 = vadd.f32 %v606_v44, %v546_v57  ;;  %v614_v60 = vadd.f32 %v606_v44, %v556_v58 }
 0x120   : > { %617 = vst [vmem:[%s350_s28 + $0x10] sm:$0xff] %v609_v55  ;;  %621 = vst [vmem:[%s350_s28 + $0x30] sm:$0xff] %v613_v56 }
 0x121   : > { %618 = vst [vmem:[%s350_s28 + $0x18] sm:$0xff] %v610_v59  ;;  %622 = vst [vmem:[%s350_s28 + $0x38] sm:$0xff] %v614_v60 }
 0x122   : > { %918 = shalt.err (!%p915_p8)
}
 0x123   : > { %s919_s18 = scalar_lea.hbm %s1129_s5, 1024  ;;  %s923_s23 = scalar_lea.hbm %s1180_s3, 3072 }
 0x124   : > { %p920_p10 = scmp.ne.s32.totalorder %s1129_s5, %s919_s18  ;;  %p924_p13 = scmp.lt.u32.totalorder %s1129_s5, %s1180_s3 }
 0x125   : > { %p925_p0 = scmp.lt.u32.totalorder %s923_s23, %s919_s18  ;;  %p927_p2 = scmp.lt.u32.totalorder %s919_s18, %s1129_s5 }
 0x126   : > { %p921_p11 = pnand %p920_p10, %p1049_p5 }
 0x127   : > { %p926_p1 = por %p925_p0, %p924_p13 }
 0x128   : > { %p922_p12 = pneg %p921_p11 }
 0x129   : > { %p928_p3 = por %p927_p2, %p926_p1 }
 0x12b   : > { %p929_p4 = pnand %p928_p3, %p922_p12 }
 0x12d   : > { %932 = shalt.err (!%p929_p4)
}
 0x12e   : > { %s987_s28 = smov 256   ;;  %s988_s30 = smov 768  }
 0x12f   : > { %s989_s15 = smov 16  }
 0x130   : > { %820 = dma.vmem_to_hbm [thread:$0]  (%p1049_p5), %s1124_s29, 1024, %s1129_s5, %s624_s7, %s987_s28, %s988_s30, %s989_s15  }
 0x131 PF: > { %p826_p6 = scmp.ge.s32.totalorder %s983_s17, 2  ;;  %s657_s4 = sand.u32 1, %s963_s12  }
 0x132   : > { %s658_s8 = scalar_lea.sflag [#allocation5], %s657_s4 }
 0x133   : > { %p823_p7 = pnand %p826_p6, %p1060_p9 }
 0x135   : > { %958 = dma.done.wait (!%p823_p7), %s658_s8, 1024  }
 0x136   : > { %960 = vsyncadd (!%p823_p7), %s658_s8, 4294966272  ;;  %s16_s17 = sadd.s32 1, %s983_s17   ;;  %s1183_s12 = smov %s967_s13 }
 0x137   : > { %p13_p8 = scmp.ge.s32.totalorder %s16_s17, 5   ;;  %s1184_s13 = smov %s971_s14 }
 0x138   : > { %s1185_s14 = smov %s1058_s24  ;;  %s1186_s15 = smov %s979_s16 }
 0x139   : > { %s1187_s16 = smov %s1189_s20  ;;  %15 = sbr.rel (!%p13_p8) target bundleno = 4 (0x4), region = 124 }
 0x140   :  { %663 = vsyncpa [#allocation5], 1 }
 0x141   :  { %665 = vsyncpa [#allocation5 + $0x1], 1 }

// kernel: text_encoder_forward.17
= control target key start
LH: loop header
LB: loop body
LE: loop exit
PB: predicated region body
PF: predicated region fallthrough
CT: control target
= control target key end

     0   :  { %v445_v1 = vmov 0   ;;  %v230_v19 = vlaneseq  ;;  %s591_s1 = inlined_call_operand.vmem [shape: bf16[1,128,256], index: 1, kind: input, shape index: {}]   ;;  %s592_s0 = inlined_call_operand.vmem [shape: bf16[32,128], index: 0, kind: input, shape index: {}]   ;;  %s593_s2 = inlined_call_operand.vmem [shape: bf16[1,1,256], index: 2, kind: input, shape index: {}]   ;;  %s594_s3 = inlined_call_operand.vmem [shape: bf16[1,32,256], index: 3, kind: output, shape index: {}]  }
   0x1   :  { %v403_v0 = vld [vmem:[%s591_s1 + $0x4] ss:$8 sps:$4 sm:$0xff]   ;;  %179 = vmatprep.mubr.bf16.mxu0 %v445_v1  ;;  %189 = vmatprep.mubr.bf16.mxu1 %v445_v1  ;;  %v405_v2 = vld [vmem:[%s591_s1] ss:$8 sps:$4 sm:$0xff]   ;;  %v406_v3 = vld [vmem:[%s591_s1 + $0x14] ss:$8 sps:$4 sm:$0xff]  }
   0x2   :  { %147 = vmatprep.subr.bf16.mxu0 %v403_v0  ;;  %386 = vmatprep.subr.bf16.mxu1 %v403_v0  ;;  %v408_v4 = vld [vmem:[%s591_s1 + $0x10] ss:$8 sps:$4 sm:$0xff]   ;;  %v409_v5 = vld [vmem:[%s591_s1 + $0x24] ss:$8 sps:$4 sm:$0xff]   ;;  %v411_v6 = vld [vmem:[%s591_s1 + $0x20] ss:$8 sps:$4 sm:$0xff]  }
   0x3   :  { %148 = vmatpush1.bf16.msra.mxu0 %v405_v2  ;;  %394 = vmatpush1.bf16.msra.mxu1 %v405_v2  ;;  %v412_v7 = vld [vmem:[%s591_s1 + $0x34] ss:$8 sps:$4 sm:$0xff]   ;;  %v414_v8 = vld [vmem:[%s591_s1 + $0x30] ss:$8 sps:$4 sm:$0xff]   ;;  %v415_v9 = vld [vmem:[%s591_s1 + $0x44] ss:$8 sps:$4 sm:$0xff]  }
   0x4   :  { %149 = vmatprep.subr.bf16.mxu0 %v406_v3  ;;  %387 = vmatprep.subr.bf16.mxu1 %v406_v3  ;;  %v417_v10 = vld [vmem:[%s591_s1 + $0x40] ss:$8 sps:$4 sm:$0xff]   ;;  %v418_v11 = vld [vmem:[%s591_s1 + $0x54] ss:$8 sps:$4 sm:$0xff]   ;;  %v420_v12 = vld [vmem:[%s591_s1 + $0x50] ss:$8 sps:$4 sm:$0xff]  }
   0x5   :  { %v421_v13 = vld [vmem:[%s591_s1 + $0x64] ss:$8 sps:$4 sm:$0xff]   ;;  %v423_v14 = vld [vmem:[%s591_s1 + $0x60] ss:$8 sps:$4 sm:$0xff]   ;;  %v424_v15 = vld [vmem:[%s591_s1 + $0x74] ss:$8 sps:$4 sm:$0xff]  }
   0x6   :  { %v426_v16 = vld [vmem:[%s591_s1 + $0x70] ss:$8 sps:$4 sm:$0xff]   ;;  %v427_v17 = vld [vmem:[%s592_s0] sm:$0xff]   ;;  %v428_v18 = vld [vmem:[%s592_s0 + $0x8] sm:$0xff]   ;;  %v231_v20 = vshrl.u32 %v230_v19, 7 }
   0x7   :  { %150 = vmatpush1.bf16.msra.mxu0 %v408_v4  ;;  %395 = vmatpush1.bf16.msra.mxu1 %v408_v4  ;;  %v227_v21 = vld [vmem:[%s593_s2] sm:$0x3] }
   0x8   :  { %151 = vmatprep.subr.bf16.mxu0 %v409_v5  ;;  %388 = vmatprep.subr.bf16.mxu1 %v409_v5  ;;  %v228_v22 = vunpack.c.l.bf16 %v227_v21  ;;  %v232_v23 = vsub.s32 0, %v231_v20  ;;  %v236_v24 = vsub.s32 2, %v231_v20 }
   0xa   :  { %v233_v25 = vrot.slane %v228_v22, %v232_v23  ;;  %v237_v26 = vrot.slane %v228_v22, %v236_v24 }
   0xb   :  { %152 = vmatpush1.bf16.msra.mxu0 %v411_v6  ;;  %396 = vmatpush1.bf16.msra.mxu1 %v411_v6 }
   0xc   :  { %153 = vmatprep.subr.bf16.mxu0 %v412_v7  ;;  %389 = vmatprep.subr.bf16.mxu1 %v412_v7  ;;  %v243_v27 = vrot.slane %v233_v25, %v232_v23  ;;  %v247_v28 = vrot.slane %v237_v26, %v232_v23 }
   0xf   :  { %154 = vmatpush1.bf16.msra.mxu0 %v414_v8  ;;  %397 = vmatpush1.bf16.msra.mxu1 %v414_v8 }
  0x10   :  { %155 = vmatprep.subr.bf16.mxu0 %v415_v9  ;;  %390 = vmatprep.subr.bf16.mxu1 %v415_v9 }
  0x13   :  { %156 = vmatpush1.bf16.msra.mxu0 %v417_v10  ;;  %398 = vmatpush1.bf16.msra.mxu1 %v417_v10 }
  0x14   :  { %157 = vmatprep.subr.bf16.mxu0 %v418_v11  ;;  %391 = vmatprep.subr.bf16.mxu1 %v418_v11 }
  0x17   :  { %158 = vmatpush1.bf16.msra.mxu0 %v420_v12  ;;  %399 = vmatpush1.bf16.msra.mxu1 %v420_v12 }
  0x18   :  { %159 = vmatprep.subr.bf16.mxu0 %v421_v13  ;;  %392 = vmatprep.subr.bf16.mxu1 %v421_v13 }
  0x1b   :  { %160 = vmatpush1.bf16.msra.mxu0 %v423_v14  ;;  %400 = vmatpush1.bf16.msra.mxu1 %v423_v14 }
  0x1c   :  { %161 = vmatprep.subr.bf16.mxu0 %v424_v15  ;;  %393 = vmatprep.subr.bf16.mxu1 %v424_v15 }
  0x1f   :  { %162 = vmatpush1.bf16.msra.mxu0 %v426_v16  ;;  %401 = vmatpush1.bf16.msra.mxu1 %v426_v16 }
  0x22   :  { %180 = vmatmul.mubr.bf16.vlgmr.msra.gmra.mrb[0].mxu0 %v427_v17  ;;  %190 = vmatmul.mubr.bf16.vlgmr.msra.gmra.mrb[0].mxu1 %v428_v18 }
  0xf5   :  { %v181_v29 = vpop.f32.mrb[0].mxu0  ;;  %v191_v30 = vpop.f32.mrb[0].mxu1 }
  0xf6   :  { %v523_v31 = vadd.f32 %v243_v27, %v181_v29  ;;  %v525_v32 = vadd.f32 %v243_v27, %v191_v30  ;;  %v183_v33 = vpop.f32.mrb[1].mxu0  ;;  %v193_v34 = vpop.f32.mrb[1].mxu1 }
  0xf7   :  { %v527_v35 = vadd.f32 %v247_v28, %v183_v33  ;;  %v529_v36 = vadd.f32 %v247_v28, %v193_v34  ;;  %v185_v37 = vpop.f32.mrb[2].mxu0  ;;  %v195_v38 = vpop.f32.mrb[2].mxu1 }
  0xf8   :  { %v256_v39 = vmul.f32 %v523_v31, %v523_v31  ;;  %v260_v40 = vmul.f32 %v525_v32, %v525_v32  ;;  %v535_v41 = vadd.f32 %v243_v27, %v185_v37  ;;  %v537_v42 = vadd.f32 %v243_v27, %v195_v38  ;;  %v187_v43 = vpop.f32.mrb[3].mxu0  ;;  %v197_v44 = vpop.f32.mrb[3].mxu1 }
  0xf9   :  { %v257_v45 = vmul.f32 %v527_v35, %v527_v35  ;;  %v261_v46 = vmul.f32 %v529_v36, %v529_v36  ;;  %v543_v47 = vadd.f32 %v247_v28, %v187_v43  ;;  %v545_v48 = vadd.f32 %v247_v28, %v197_v44 }
  0xfa   :  { %v264_v49 = vmul.f32 %v256_v39, %v523_v31  ;;  %v268_v50 = vmul.f32 %v260_v40, %v525_v32  ;;  %v258_v51 = vmul.f32 %v535_v41, %v535_v41  ;;  %v262_v52 = vmul.f32 %v537_v42, %v537_v42 }
  0xfb   :  { %v265_v53 = vmul.f32 %v257_v45, %v527_v35  ;;  %v269_v54 = vmul.f32 %v261_v46, %v529_v36  ;;  %v259_v55 = vmul.f32 %v543_v47, %v543_v47  ;;  %v263_v56 = vmul.f32 %v545_v48, %v545_v48 }
  0xfc   :  { %v272_v57 = vmul.f32 0.044715, %v264_v49  ;;  %v276_v58 = vmul.f32 0.044715, %v268_v50  ;;  %v266_v59 = vmul.f32 %v258_v51, %v535_v41  ;;  %v270_v60 = vmul.f32 %v262_v52, %v537_v42 }
  0xfd   :  { %v273_v61 = vmul.f32 0.044715, %v265_v53  ;;  %v277_v62 = vmul.f32 0.044715, %v269_v54  ;;  %v267_v63 = vmul.f32 %v259_v55, %v543_v47  ;;  %v271_v0 = vmul.f32 %v263_v56, %v545_v48 }
  0xfe   :  { %v280_v1 = vadd.f32 %v272_v57, %v523_v31  ;;  %v284_v2 = vadd.f32 %v276_v58, %v525_v32  ;;  %v274_v3 = vmul.f32 0.044715, %v266_v59  ;;  %v278_v4 = vmul.f32 0.044715, %v270_v60 }
  0xff   :  { %v281_v5 = vadd.f32 %v273_v61, %v527_v35  ;;  %v285_v6 = vadd.f32 %v277_v62, %v529_v36  ;;  %v275_v7 = vmul.f32 0.044715, %v267_v63  ;;  %v279_v8 = vmul.f32 0.044715, %v271_v0 }
 0x100   :  { %v288_v9 = vmul.f32 0.7978846, %v280_v1  ;;  %v292_v10 = vmul.f32 0.7978846, %v284_v2  ;;  %v282_v11 = vadd.f32 %v274_v3, %v535_v41  ;;  %v286_v12 = vadd.f32 %v278_v4, %v537_v42 }
 0x101   :  { %v289_v13 = vmul.f32 0.7978846, %v281_v5  ;;  %v293_v14 = vmul.f32 0.7978846, %v285_v6  ;;  %v283_v15 = vadd.f32 %v275_v7, %v543_v47  ;;  %v287_v16 = vadd.f32 %v279_v8, %v545_v48 }
 0x102   :  { %429 = vtanh.f32 %v288_v9  ;;  %v290_v17 = vmul.f32 0.7978846, %v282_v11  ;;  %v294_v18 = vmul.f32 0.7978846, %v286_v12 }
 0x103   :  { %431 = vtanh.f32 %v292_v10  ;;  %v291_v19 = vmul.f32 0.7978846, %v283_v15  ;;  %v295_v20 = vmul.f32 0.7978846, %v287_v16 }
 0x104   :  { %433 = vtanh.f32 %v289_v13 }
 0x105   :  { %435 = vtanh.f32 %v293_v14 }
 0x106   :  { %437 = vtanh.f32 %v290_v17 }
 0x107   :  { %439 = vtanh.f32 %v294_v18 }
 0x108   :  { %441 = vtanh.f32 %v291_v19 }
 0x109   :  { %443 = vtanh.f32 %v295_v20 }
 0x10c   :  { %v430_v21 = vpop.eup %429 }
 0x10d   :  { %v432_v22 = vpop.eup %431  ;;  %v304_v23 = vadd.f32 1.0, %v430_v21 }
 0x10e   :  { %v434_v24 = vpop.eup %433  ;;  %v308_v25 = vadd.f32 1.0, %v432_v22 }
 0x10f   :  { %v436_v26 = vpop.eup %435  ;;  %v312_v27 = vmul.f32 0.5, %v304_v23  ;;  %v305_v28 = vadd.f32 1.0, %v434_v24 }
 0x110   :  { %v438_v29 = vpop.eup %437  ;;  %v316_v30 = vmul.f32 0.5, %v308_v25  ;;  %v309_v33 = vadd.f32 1.0, %v436_v26 }
 0x111   :  { %v440_v34 = vpop.eup %439  ;;  %v320_v37 = vmul.f32 %v312_v27, %v523_v31  ;;  %v313_v38 = vmul.f32 0.5, %v305_v28  ;;  %v306_v39 = vadd.f32 1.0, %v438_v29 }
 0x112   :  { %v442_v40 = vpop.eup %441  ;;  %v324_v43 = vmul.f32 %v316_v30, %v525_v32  ;;  %v317_v44 = vmul.f32 0.5, %v309_v33  ;;  %v310_v45 = vadd.f32 1.0, %v440_v34 }
 0x113   :  { %v444_v46 = vpop.eup %443  ;;  %v321_v49 = vmul.f32 %v313_v38, %v527_v35  ;;  %v314_v50 = vmul.f32 0.5, %v306_v39  ;;  %v307_v51 = vadd.f32 1.0, %v442_v40 }
 0x114   :  { %v325_v52 = vmul.f32 %v317_v44, %v529_v36  ;;  %v318_v53 = vmul.f32 0.5, %v310_v45  ;;  %v311_v54 = vadd.f32 1.0, %v444_v46 }
 0x115   :  { %v382_v55 = vpack.c.bf16 %v321_v49, %v320_v37  ;;  %v322_v56 = vmul.f32 %v314_v50, %v535_v41  ;;  %v315_v31 = vmul.f32 0.5, %v307_v51 }
 0x116   :  { %v384_v57 = vpack.c.bf16 %v325_v52, %v324_v43  ;;  %v326_v58 = vmul.f32 %v318_v53, %v537_v42  ;;  %v319_v59 = vmul.f32 0.5, %v311_v54 }
 0x117   :  { %352 = vst [vmem:[%s594_s3] sm:$0xff] %v382_v55  ;;  %v323_v32 = vmul.f32 %v315_v31, %v543_v47 }
 0x118   :  { %354 = vst [vmem:[%s594_s3 + $0x10] sm:$0xff] %v384_v57  ;;  %v327_v35 = vmul.f32 %v319_v59, %v545_v48 }
 0x119   :  { %v383_v36 = vpack.c.bf16 %v323_v32, %v322_v56 }
 0x11a   :  { %v385_v60 = vpack.c.bf16 %v327_v35, %v326_v58 }
 0x11b   :  { %353 = vst [vmem:[%s594_s3 + $0x8] sm:$0xff] %v383_v36 }
 0x11c   :  { %355 = vst [vmem:[%s594_s3 + $0x18] sm:$0xff] %v385_v60 }

// kernel: text_encoder_forward.16
= control target key start
LH: loop header
LB: loop body
LE: loop exit
PB: predicated region body
PF: predicated region fallthrough
CT: control target
= control target key end

     0   :  { %s2218_s30 = smov 0   ;;  %s2220_s10 = smov 0   ;;  %s2574_s0 = inlined_call_operand.vmem [shape: bf16[3,32,128], index: 0, kind: input, shape index: {}]   ;;  %s2575_s1 = inlined_call_operand.vmem [shape: bf16[2,4,8,32], index: 1, kind: input, shape index: {}]   ;;  %s2576_s2 = inlined_call_operand.vmem [shape: bf16[2,4,8,32], index: 2, kind: input, shape index: {}]   ;;  %s2577_s3 = inlined_call_operand.vmem [shape: f32[2,1,16], index: 3, kind: input, shape index: {}]   ;;  %s2578_s4 = inlined_call_operand.vmem [shape: bf16[128,128], index: 4, kind: input, shape index: {}]   ;;  %s2579_s5 = inlined_call_operand.vmem [shape: bf16[1,128], index: 5, kind: input, shape index: {}]   ;;  %s2580_s6 = inlined_call_operand.vmem [shape: bf16[32,128], index: 6, kind: input, shape index: {}]   ;;  %s2581_s7 = inlined_call_operand.vmem [shape: bf16[1,128], index: 7, kind: input, shape index: {}]   ;;  %s2582_s8 = inlined_call_operand.vmem [shape: bf16[1,128], index: 8, kind: input, shape index: {}]   ;;  %s2583_s9 = inlined_call_operand.vmem [shape: bf16[32,128], index: 9, kind: output, shape index: {}]  }
   0x1   :  { %s2222_s11 = smov 0  }
   0x2 LB: > { %s2231_s12 = sadd.s32 4294967295, %s2161_s11   ;;  %s2233_s13 = sadd.s32 1, %s2161_s11   ;;  %s2161_s11 = sphi %s2222_s11, %s2586_s11   ;;  %s2157_s10 = sphi %s2220_s10, %s2585_s10   ;;  %s2153_s30 = sphi %s2218_s30, %s2584_s30  }
   0x3   : > { %s23_s14 = ssub.s32 %s2161_s11, %s2233_s13  ;;  %s26_s15 = sadd.s32 1, %s2157_s10 }
   0x4   : > { %p24_p0 = scmp.eq.s32.totalorder %s23_s14, 0  ;;  %p33_p1 = scmp.ne.s32.totalorder %s2157_s10, %s2153_s30 }
   0x5   : > { %p34_p2 = scmp.eq.s32.totalorder %s2161_s11, 0  ;;  %p1789_p4 = scmp.ge.s32.totalorder %s2161_s11, 2 }
   0x6   : > { %s2240_s16 = scalar_select %p24_p0, %s2157_s10, %s26_s15  }
   0x7   : > { %p35_p3 = por %p34_p2, %p33_p1  ;;  %285 = sbr.rel (%p1789_p4) target bundleno = 21 (0x15), region = 32 }
   0xe   : > { %288 = sbr.rel (!%p35_p3) target bundleno = 21 (0x15), region = 36  ;;  %s290_s17 = sand.u32 (%p35_p3), 1, %s2157_s10  }
   0xf   : > { %s1843_s18 = sshll.u32 (%p35_p3), %s2161_s11, 3  ;;  %s2030_s19 = smul.u32 (%p35_p3), 24, %s290_s17 }
  0x10   : > { %s295_s22 = scalar_lea.vmem (%p35_p3), %s2574_s0, %s1843_s18 }
  0x11   : > { %v311_v0 = vld [vmem:[%s295_s22] sm:$0xff] (%p35_p3)   ;;  %v315_v1 = vld [vmem:[%s295_s22 + $0x10] sm:$0xff] (%p35_p3)   ;;  %s292_s23 = scalar_lea.vmem (%p35_p3), [#allocation2], %s2030_s19 }
  0x12   : > { %v319_v2 = vld [vmem:[%s295_s22 + $0x20] sm:$0xff] (%p35_p3)   ;;  %312 = vst [vmem:[%s292_s23] sm:$0xff] (%p35_p3), %v311_v0   ;;  %316 = vst [vmem:[%s292_s23 + $0x8] sm:$0xff] (%p35_p3), %v315_v1  }
  0x13   : > { %320 = vst [vmem:[%s292_s23 + $0x10] sm:$0xff] (%p35_p3), %v319_v2  }
  0x15 PF: > { %p1792_p5 = scmp.ge.s32.totalorder %s2161_s11, 1  ;;  %p387_p6 = scmp.lt.s32.totalorder %s2161_s11, 3 }
  0x17   : > { %p388_p7 = pnand %p1792_p5, %p387_p6 }
  0x18   : > { %s394_s24 = sand.u32 (!%p388_p7), 1, %s2153_s30   ;;  %v2163_v3 = vmov (!%p388_p7), 0.0   ;;  %vm2164_vm0 = vmmov (!%p388_p7), 0   ;;  %p448_p8 = scmp.lt.s32.totalorder (!%p388_p7), %s2231_s12, 1  ;;  %vm495_vm1 = vcmask (!%p388_p7), 261120   ;;  %vm599_vm2 = vcmask (!%p388_p7), 130048  }
  0x19   : > { %391 = sbr.rel (%p388_p7) target bundleno = 1465 (0x5b9), region = 93  ;;  %1898 = vmatprep.subr.bf16.mxu0 (!%p388_p7), %v2163_v3  ;;  %1900 = vmatprep.mubr.msk.bf16.mxu0 (!%p388_p7), %vm2164_vm0, %v2163_v3  ;;  %s2165_s28 = smov (!%p388_p7), 96   ;;  %vm606_vm3 = vcmask (!%p388_p7), 64512   ;;  %vm696_vm4 = vcmask (!%p388_p7), 1043456   ;;  %vm1506_vm5 = vcmask (!%p388_p7), 523264   ;;  %vm1509_vm6 = vcmask (!%p388_p7), 785408  }
  0x1a   : > { %s2031_s25 = smul.u32 (!%p388_p7), 24, %s394_s24  ;;  %1922 = vmatprep.subr.bf16.mxu1 (!%p388_p7), %v2163_v3  ;;  %1924 = vmatprep.mubr.msk.bf16.mxu1 (!%p388_p7), %vm2164_vm0, %v2163_v3  ;;  %s2166_s30 = smov (!%p388_p7), 64  }
  0x1b   : > { %s2167_s17 = smov (!%p388_p7), 32  }
  0x1c   : > { %s2254_s26 = scalar_lea.vmem (!%p388_p7), [#allocation2], %s2031_s25 }
  0x1d   : > { %v2076_v4 = vld [vmem:[%s2254_s26 + $0x8] sm:$0xff] (!%p388_p7)   ;;  %v2077_v5 = vld [vmem:[%s2254_s26] sm:$0xff] (!%p388_p7)   ;;  %v2344_v43 = vld [vmem:[%s2254_s26 + $0x10] sm:$0xff] (!%p388_p7)  }
  0x1e   : > { %751 = vrot.lane.b32.xlu0 (!%p388_p7), %v2076_v4, %s2165_s28  ;;  %v500_v6 = vsel (!%p388_p7), %vm495_vm1, %v2076_v4, 0  ;;  %996 = vrot.lane.b32.xlu1 (!%p388_p7), %v2076_v4, %s2166_s30 }
  0x1f   : > { %1899 = vmatpush3.bf16.xpose.msra.mxu0 (!%p388_p7), %v500_v6 }
  0x20   : > { %s2258_s27 = scalar_select %p448_p8, %s2231_s12, 1  ;;  %1904 = vmatprep.subr.bf16.mxu0 %v2163_v3 }
  0x22   : > { %s1844_s29 = sshll.u32 %s2258_s27, 4  ;;  %749 = vrot.lane.b32.xlu0 %v2077_v5, %s2165_s28  ;;  %994 = vrot.lane.b32.xlu1 %v2077_v5, %s2166_s30  ;;  %s460_s20 = scalar_lea.vmem %s2577_s3, %s2258_s27 }
  0x23   : > { %s2270_s15 = scalar_lea.vmem %s2575_s1, %s1844_s29  ;;  %v2323_v24 = vld [vmem:[%s460_s20] ss:$0 sm:$0xff]  ;;  %s2415_s23 = scalar_lea.vmem %s2576_s2, %s1844_s29 }
  0x24   : > { %v483_v7 = vld [vmem:[%s2270_s15] sm:$0xf]  ;;  %v1813_v11 = vld [vmem:[%s2270_s15 + $0x4] sm:$0xf]  ;;  %v1819_v16 = vld [vmem:[%s2270_s15 + $0x8] sm:$0xf] }
  0x25   : > { %v554_v8 = vsel %vm495_vm1, %v483_v7, 0  ;;  %v805_v13 = vsel %vm495_vm1, %v1813_v11, 0  ;;  %v1050_v18 = vsel %vm495_vm1, %v1819_v16, 0  ;;  %v1825_v21 = vld [vmem:[%s2270_s15 + $0xc] sm:$0xf] }
  0x26   : > { %1901 = vmatmul.mubr.msk.bf16.vlgmr.msra.gmra.mrb[0].mxu0 %vm495_vm1, %v2077_v5  ;;  %1241 = vrot.lane.b32.xlu0 %v2076_v4, %s2167_s17  ;;  %v1295_v23 = vsel %vm495_vm1, %v1825_v21, 0 }
  0x27   : > { %1905 = vmatpush3.bf16.xpose.msra.mxu0 %v554_v8  ;;  %1906 = vmatprep.mubr.msk.bf16.mxu0 %vm2164_vm0, %v2163_v3 }
  0x28   : > { %1239 = vrot.lane.b32.xlu1 %v2077_v5, %s2167_s17  ;;  %1910 = vmatprep.subr.bf16.mxu0 %v2163_v3 }
  0x2e   : > { %1907 = vmatmul.mubr.msk.bf16.vlgmr.msra.gmra.mrb[4].mxu0 %vm495_vm1, %v2077_v5 }
  0x2f   : > { %1912 = vmatprep.mubr.msk.bf16.mxu0 %vm2164_vm0, %v2163_v3  ;;  %1911 = vmatpush3.bf16.msra.mxu0 %v2344_v43 }
  0x30   : > { %1916 = vmatprep.subr.bf16.mxu0 %v2163_v3 }
  0x90   : > { %v752_v9 = vpop.permute.xlu0 %751  ;;  %v997_v14 = vpop.permute.xlu1 %996 }
  0x91   : > { %v757_v10 = vsel %vm495_vm1, %v752_v9, 0  ;;  %v1002_v15 = vsel %vm495_vm1, %v997_v14, 0 }
  0x92   : > { %1923 = vmatpush3.bf16.xpose.msra.mxu1 %v757_v10 }
  0x93   : > { %1928 = vmatprep.subr.bf16.mxu1 %v2163_v3 }
  0x94   : > { %v750_v12 = vpop.permute.xlu0 %749  ;;  %v995_v17 = vpop.permute.xlu1 %994 }
  0x98   : > { %v1242_v19 = vpop.permute.xlu0 %1241 }
  0x99   : > { %1925 = vmatmul.mubr.msk.bf16.vlgmr.msra.gmra.mrb[0].mxu1 %vm495_vm1, %v750_v12  ;;  %v1247_v20 = vsel %vm495_vm1, %v1242_v19, 0 }
  0x9a   : > { %1929 = vmatpush3.bf16.xpose.msra.mxu1 %v805_v13  ;;  %1930 = vmatprep.mubr.msk.bf16.mxu1 %vm2164_vm0, %v2163_v3  ;;  %v1240_v22 = vpop.permute.xlu1 %1239 }
  0x9b   : > { %1946 = vmatprep.subr.bf16.mxu1 %v2163_v3 }
  0xa1   : > { %1931 = vmatmul.mubr.msk.bf16.vlgmr.msra.gmra.mrb[4].mxu1 %vm495_vm1, %v750_v12 }
  0xa2   : > { %1947 = vmatpush3.bf16.xpose.msra.mxu1 %v1002_v15  ;;  %1948 = vmatprep.mubr.msk.bf16.mxu1 %vm2164_vm0, %v2163_v3 }
  0xa3   : > { %1952 = vmatprep.subr.bf16.mxu1 %v2163_v3 }
  0xa9   : > { %1949 = vmatmul.mubr.msk.bf16.vlgmr.msra.gmra.mrb[8].mxu1 %vm495_vm1, %v995_v17 }
  0xaa   : > { %1953 = vmatpush3.bf16.xpose.msra.mxu1 %v1050_v18  ;;  %1954 = vmatprep.mubr.msk.bf16.mxu1 %vm2164_vm0, %v2163_v3 }
  0xab   : > { %1970 = vmatprep.subr.bf16.mxu1 %v2163_v3 }
  0xb1   : > { %1955 = vmatmul.mubr.msk.bf16.vlgmr.msra.gmra.mrb[12].mxu1 %vm495_vm1, %v995_v17 }
  0xb2   : > { %1971 = vmatpush3.bf16.xpose.msra.mxu1 %v1247_v20  ;;  %1972 = vmatprep.mubr.msk.bf16.mxu1 %vm2164_vm0, %v2163_v3 }
  0xb3   : > { %1976 = vmatprep.subr.bf16.mxu1 %v2163_v3 }
  0xb9   : > { %1973 = vmatmul.mubr.msk.bf16.vlgmr.msra.gmra.mrb[16].mxu1 %vm495_vm1, %v1240_v22 }
  0xba   : > { %1977 = vmatpush3.bf16.xpose.msra.mxu1 %v1295_v23  ;;  %1978 = vmatprep.mubr.msk.bf16.mxu1 %vm2164_vm0, %v2163_v3 }
  0xbb   : > { %1994 = vmatprep.subr.bf16.mxu1 %v2163_v3 }
  0xc1   : > { %1979 = vmatmul.mubr.msk.bf16.vlgmr.msra.gmra.mrb[20].mxu1 %vm495_vm1, %v1240_v22 }
  0xc2   : > { %2010 = vmatprep.mubr.msk.bf16.mxu1 %vm2164_vm0, %v2163_v3 }
  0xf9   : > { %v536_v25 = vpop.f32.mrb[0].mxu0 }
  0xfa   : > { %v543_v26 = vmul.f32 0.17677669, %v536_v25  ;;  %v1902_v27 = vpop.f32.mrb[1].mxu0 }
  0xfb   : > { %v539_v28 = vpop.f32.mrb[2].mxu0 }
  0xfc   : > { %v544_v29 = vmul.f32 0.17677669, %v539_v28  ;;  %v1903_v30 = vpop.f32.mrb[3].mxu0  ;;  %v2326_v31 = vadd.f32 %v2323_v24, %v543_v26 }
  0xfe   : > { %v600_v32 = vsel %vm599_vm2, %v2326_v31, -inf  ;;  %v2331_v33 = vadd.f32 %v2323_v24, %v544_v29 }
  0xff   : > { %601 = vmax.xlane.f32.xlu0 %v600_v32 }
 0x100   : > { %v603_v34 = vsel %vm599_vm2, %v2331_v33, -inf }
 0x101   : > { %v590_v35 = vpop.f32.mrb[4].mxu0  ;;  %604 = vmax.xlane.f32.xlu1 %v603_v34 }
 0x102   : > { %v2335_v36 = vmul.f32 0.17677669, %v590_v35  ;;  %v1908_v37 = vpop.f32.mrb[5].mxu0 }
 0x103   : > { %v593_v38 = vpop.f32.mrb[6].mxu0 }
 0x104   : > { %v607_v39 = vsel %vm606_vm3, %v2335_v36, -inf  ;;  %v2339_v40 = vmul.f32 0.17677669, %v593_v38  ;;  %v1909_v41 = vpop.f32.mrb[7].mxu0 }
 0x105   : > { %608 = vmax.xlane.f32.xlu0 %v607_v39 }
 0x106   : > { %v610_v42 = vsel %vm606_vm3, %v2339_v40, -inf }
 0x109   : > { %611 = vmax.xlane.f32.xlu0 %v610_v42 }
 0x16c   : > { %v793_v44 = vpop.f32.mrb[0].mxu1 }
 0x16d   : > { %v800_v45 = vmul.f32 0.17677669, %v793_v44  ;;  %v1926_v46 = vpop.f32.mrb[1].mxu1 }
 0x16e   : > { %v796_v47 = vpop.f32.mrb[2].mxu1 }
 0x16f   : > { %v801_v48 = vmul.f32 0.17677669, %v796_v47  ;;  %v1927_v49 = vpop.f32.mrb[3].mxu1  ;;  %v2349_v50 = vadd.f32 %v2323_v24, %v800_v45 }
 0x171   : > { %v850_v51 = vsel %vm599_vm2, %v2349_v50, -inf  ;;  %v2354_v52 = vadd.f32 %v2323_v24, %v801_v48 }
 0x172   : > { %851 = vmax.xlane.f32.xlu1 %v850_v51 }
 0x173   : > { %v853_v53 = vsel %vm599_vm2, %v2354_v52, -inf }
 0x174   : > { %v841_v54 = vpop.f32.mrb[4].mxu1  ;;  %854 = vmax.xlane.f32.xlu0 %v853_v53 }
 0x175   : > { %v2358_v55 = vmul.f32 0.17677669, %v841_v54  ;;  %v1932_v56 = vpop.f32.mrb[5].mxu1  ;;  %v484_v54 = vld [vmem:[%s2415_s23] sm:$0xf] }
 0x176   : > { %v844_v57 = vpop.f32.mrb[6].mxu1 }
 0x177   : > { %v2360_v58 = vmul.f32 0.17677669, %v844_v57  ;;  %v1933_v59 = vpop.f32.mrb[7].mxu1  ;;  %v856_v60 = vsel %vm606_vm3, %v2358_v55, -inf }
 0x178   : > { %857 = vmax.xlane.f32.xlu1 %v856_v60 }
 0x179   : > { %v859_v61 = vsel %vm606_vm3, %v2360_v58, -inf }
 0x17a   : > { %860 = vmax.xlane.f32.xlu0 %v859_v61 }
 0x17c   : > { %v1038_v62 = vpop.f32.mrb[8].mxu1 }
 0x17d   : > { %v1045_v63 = vmul.f32 0.17677669, %v1038_v62  ;;  %v1950_v0 = vpop.f32.mrb[9].mxu1 }
 0x17e   : > { %v1041_v1 = vpop.f32.mrb[10].mxu1 }
 0x17f   : > { %v1046_v2 = vmul.f32 0.17677669, %v1041_v1  ;;  %v1951_v4 = vpop.f32.mrb[11].mxu1  ;;  %v2367_v5 = vadd.f32 %v2323_v24, %v1045_v63 }
 0x181   : > { %v1095_v6 = vsel %vm599_vm2, %v2367_v5, -inf  ;;  %v2372_v7 = vadd.f32 %v2323_v24, %v1046_v2 }
 0x182   : > { %1096 = vmax.xlane.f32.xlu1 %v1095_v6 }
 0x183   : > { %v1098_v8 = vsel %vm599_vm2, %v2372_v7, -inf }
 0x184   : > { %v1086_v9 = vpop.f32.mrb[12].mxu1  ;;  %1099 = vmax.xlane.f32.xlu0 %v1098_v8 }
 0x185   : > { %v2376_v10 = vmul.f32 0.17677669, %v1086_v9  ;;  %v1956_v11 = vpop.f32.mrb[13].mxu1 }
 0x186   : > { %v1089_v12 = vpop.f32.mrb[14].mxu1 }
 0x187   : > { %v2378_v13 = vmul.f32 0.17677669, %v1089_v12  ;;  %v1957_v14 = vpop.f32.mrb[15].mxu1  ;;  %v1101_v15 = vsel %vm606_vm3, %v2376_v10, -inf }
 0x188   : > { %1102 = vmax.xlane.f32.xlu1 %v1101_v15 }
 0x189   : > { %v1104_v16 = vsel %vm606_vm3, %v2378_v13, -inf }
 0x18a   : > { %1105 = vmax.xlane.f32.xlu0 %v1104_v16 }
 0x18c   : > { %v1283_v17 = vpop.f32.mrb[16].mxu1  ;;  %v602_v18 = vpop.xlane.xlu0 %601 }
 0x18d   : > { %v1290_v19 = vmul.f32 0.17677669, %v1283_v17  ;;  %v1974_v20 = vpop.f32.mrb[17].mxu1 }
 0x18e   : > { %v1286_v21 = vpop.f32.mrb[18].mxu1  ;;  %v605_v34 = vpop.xlane.xlu1 %604 }
 0x18f   : > { %v1291_v22 = vmul.f32 0.17677669, %v1286_v21  ;;  %v2385_v23 = vadd.f32 %v2323_v24, %v1290_v19  ;;  %v1975_v25 = vpop.f32.mrb[19].mxu1 }
 0x191   : > { %v1340_v26 = vsel %vm599_vm2, %v2385_v23, -inf  ;;  %v2390_v27 = vadd.f32 %v2323_v24, %v1291_v22 }
 0x192   : > { %v609_v28 = vpop.xlane.xlu0 %608  ;;  %1341 = vmax.xlane.f32.xlu0 %v1340_v26  ;;  %v1814_v26 = vld [vmem:[%s2415_s23 + $0x4] sm:$0xf] }
 0x193   : > { %v613_v29 = vmax.f32 %v602_v18, %v609_v28  ;;  %v1343_v30 = vsel %vm599_vm2, %v2390_v27, -inf }
 0x194   : > { %v1331_v32 = vpop.f32.mrb[20].mxu1 }
 0x195   : > { %v615_v35 = vsub.f32 %v2326_v31, %v613_v29  ;;  %v2395_v37 = vmul.f32 0.17677669, %v1331_v32  ;;  %v1980_v38 = vpop.f32.mrb[21].mxu1 }
 0x196   : > { %v1334_v39 = vpop.f32.mrb[22].mxu1  ;;  %1344 = vmax.xlane.f32.xlu0 %v1343_v30  ;;  %v612_v41 = vpop.xlane.xlu0 %611 }
 0x197   : > { %v614_v42 = vmax.f32 %v605_v34, %v612_v41  ;;  %v617_v24 = vmul.f32 1.442695, %v615_v35  ;;  %v1981_v44 = vpop.f32.mrb[23].mxu1  ;;  %v2397_v45 = vmul.f32 0.17677669, %v1334_v39  ;;  %v1346_v47 = vsel %vm606_vm3, %v2395_v37, -inf }
 0x199   : > { %v616_v46 = vsub.f32 %v2331_v33, %v614_v42  ;;  %892 = vrot.lane.b32.xlu1 %v2344_v43, %s2165_s28  ;;  %2087 = vpow2.f32 %v617_v24  ;;  %v1349_v48 = vsel %vm606_vm3, %v2397_v45, -inf  ;;  %v622_v49 = vsub.f32 %v2339_v40, %v614_v42 }
 0x19a   : > { %1347 = vmax.xlane.f32.xlu0 %v1346_v47  ;;  %v621_v33 = vsub.f32 %v2335_v36, %v613_v29  ;;  %v698_v36 = vsel %vm696_vm4, %v484_v54, 0 }
 0x19b   : > { %v619_v31 = vmul.f32 1.442695, %v616_v46  ;;  %v625_v51 = vmul.f32 1.442695, %v622_v49 }
 0x19c   : > { %v623_v53 = vmul.f32 1.442695, %v621_v33 }
 0x19d   : > { %2089 = vpow2.f32 %v619_v31  ;;  %1137 = vrot.lane.b32.xlu1 %v2344_v43, %s2166_s30 }
 0x19e   : > { %1350 = vmax.xlane.f32.xlu0 %v1349_v48  ;;  %2091 = vpow2.f32 %v625_v51 }
 0x19f   : > { %2093 = vpow2.f32 %v623_v53 }
 0x1a3   : > { %v2418_v56 = vpop.eup %2087 }
 0x1a7   : > { %v2420_v57 = vpop.eup %2089 }
 0x1a8   : > { %v642_v40 = vpack.c.bf16 %v2420_v57, %v2418_v56  ;;  %v2429_v59 = vpop.eup %2091 }
 0x1a9   : > { %v2431_v60 = vpop.eup %2093 }
 0x1aa   : > { %1913 = vmatmul.mubr.msk.bf16.vlgmr.msra.gmra.mrb[8].mxu0 %vm599_vm2, %v642_v40  ;;  %v641_v61 = vpack.c.bf16 %v2429_v59, %v2431_v60 }
 0x1ab   : > { %1917 = vmatpush3.bf16.msra.mxu0 %v698_v36  ;;  %1918 = vmatprep.mubr.msk.bf16.mxu0 %vm2164_vm0, %v2163_v3 }
 0x1ac   : > { %1934 = vmatprep.subr.bf16.mxu0 %v2163_v3 }
 0x1b4   : > { %1382 = vrot.lane.b32.xlu0 %v2344_v43, %s2167_s17 }
 0x1b6   : > { %1919 = vmatmul.mubr.msk.bf16.vlgmr.msra.gmra.mrb[8].mxu0 %vm606_vm3, %v641_v61 }
 0x1b7   : > { %1936 = vmatprep.mubr.msk.bf16.mxu0 %vm2164_vm0, %v2163_v3 }
 0x1ff   : > { %v852_v62 = vpop.xlane.xlu1 %851 }
 0x201   : > { %v855_v63 = vpop.xlane.xlu0 %854 }
 0x205   : > { %v858_v0 = vpop.xlane.xlu1 %857 }
 0x206   : > { %v862_v1 = vmax.f32 %v852_v62, %v858_v0 }
 0x207   : > { %v861_v2 = vpop.xlane.xlu0 %860 }
 0x208   : > { %v864_v4 = vsub.f32 %v2349_v50, %v862_v1  ;;  %v870_v6 = vsub.f32 %v2358_v55, %v862_v1  ;;  %v863_v8 = vmax.f32 %v855_v63, %v861_v2  ;;  %v1820_v2 = vld [vmem:[%s2415_s23 + $0x8] sm:$0xf] }
 0x20a   : > { %v866_v9 = vmul.f32 1.442695, %v864_v4  ;;  %v872_v11 = vmul.f32 1.442695, %v870_v6  ;;  %v865_v12 = vsub.f32 %v2354_v52, %v863_v8  ;;  %v871_v43 = vsub.f32 %v2360_v58, %v863_v8 }
 0x20b   : > { %v1188_v8 = vsel %vm696_vm4, %v1820_v2, 0 }
 0x20c   : > { %2095 = vpow2.f32 %v866_v9  ;;  %v868_v14 = vmul.f32 1.442695, %v865_v12  ;;  %v874_v15 = vmul.f32 1.442695, %v871_v43 }
 0x20d   : > { %2097 = vpow2.f32 %v872_v11 }
 0x20e   : > { %2099 = vpow2.f32 %v868_v14 }
 0x20f   : > { %v1097_v16 = vpop.xlane.xlu1 %1096  ;;  %2101 = vpow2.f32 %v874_v15 }
 0x211   : > { %v1100_v17 = vpop.xlane.xlu0 %1099 }
 0x215   : > { %v1103_v18 = vpop.xlane.xlu1 %1102 }
 0x216   : > { %v2096_v50 = vpop.eup %2095  ;;  %v1107_v19 = vmax.f32 %v1097_v16, %v1103_v18 }
 0x217   : > { %v2098_v55 = vpop.eup %2097  ;;  %v1106_v20 = vpop.xlane.xlu0 %1105  ;;  %v876_v21 = vsel %vm599_vm2, %v2096_v50, 0.0 }
 0x218   : > { %v2100_v22 = vpop.eup %2099  ;;  %v1109_v52 = vsub.f32 %v2367_v5, %v1107_v19  ;;  %v1115_v58 = vsub.f32 %v2376_v10, %v1107_v19  ;;  %v1108_v25 = vmax.f32 %v1100_v17, %v1106_v20  ;;  %877 = vadd.xlane.f32.xlu1 %v876_v21  ;;  %v882_v38 = vsel %vm606_vm3, %v2098_v55, 0.0 }
 0x219   : > { %v893_v28 = vpop.permute.xlu1 %892  ;;  %v879_v29 = vsel %vm599_vm2, %v2100_v22, 0.0  ;;  %v891_v39 = vpack.c.bf16 %v2100_v22, %v2096_v50  ;;  %v943_v5 = vsel %vm696_vm4, %v1814_v26, 0  ;;  %v2102_v10 = vpop.eup %2101  ;;  %v627_v50 = vsel %vm599_vm2, %v2418_v56, 0.0 }
 0x21a   : > { %v1111_v30 = vmul.f32 1.442695, %v1109_v52  ;;  %v1117_v32 = vmul.f32 1.442695, %v1115_v58  ;;  %v1110_v34 = vsub.f32 %v2372_v7, %v1108_v25  ;;  %v1116_v35 = vsub.f32 %v2378_v13, %v1108_v25  ;;  %1935 = vmatpush3.bf16.msra.mxu0 %v893_v28  ;;  %880 = vadd.xlane.f32.xlu0 %v879_v29 }
 0x21b   : > { %1940 = vmatprep.subr.bf16.mxu0 %v2163_v3  ;;  %v885_v42 = vsel %vm606_vm3, %v2102_v10, 0.0  ;;  %v890_v48 = vpack.c.bf16 %v2102_v10, %v2098_v55  ;;  %v1826_v55 = vld [vmem:[%s2415_s23 + $0xc] sm:$0xf]  ;;  %v633_v22 = vsel %vm606_vm3, %v2431_v60, 0.0  ;;  %v630_v52 = vsel %vm599_vm2, %v2420_v57, 0.0 }
 0x21c   : > { %2103 = vpow2.f32 %v1111_v30  ;;  %v1113_v41 = vmul.f32 1.442695, %v1110_v34  ;;  %883 = vadd.xlane.f32.xlu1 %v882_v38  ;;  %v1119_v7 = vmul.f32 1.442695, %v1116_v35  ;;  %v1433_v21 = vsel %vm696_vm4, %v1826_v55, 0 }
 0x21d   : > { %2105 = vpow2.f32 %v1117_v32  ;;  %1937 = vmatmul.mubr.msk.bf16.vlgmr.msra.gmra.mrb[12].mxu0 %vm599_vm2, %v891_v39  ;;  %v1138_v49 = vpop.permute.xlu1 %1137  ;;  %v636_v56 = vsel %vm606_vm3, %v2429_v59, 0.0  ;;  %v2079_v59 = vld [vmem:[%s2578_s4] sm:$0xff]   ;;  %v2080_v39 = vld [vmem:[%s2578_s4 + $0x8] sm:$0xff]  }
 0x21e   : > { %2107 = vpow2.f32 %v1113_v41  ;;  %1941 = vmatpush3.bf16.msra.mxu0 %v943_v5  ;;  %1942 = vmatprep.mubr.msk.bf16.mxu0 %vm2164_vm0, %v2163_v3 }
 0x21f   : > { %v1342_v13 = vpop.xlane.xlu0 %1341  ;;  %1958 = vmatprep.subr.bf16.mxu0 %v2163_v3  ;;  %2109 = vpow2.f32 %v1119_v7  ;;  %1995 = vmatpush3.bf16.msra.mxu1 %v2079_v59 }
 0x220   : > { %886 = vadd.xlane.f32.xlu1 %v885_v42  ;;  %1996 = vmatprep.subr.bf16.mxu1 %v2163_v3 }
 0x223   : > { %v1345_v24 = vpop.xlane.xlu0 %1344  ;;  %1997 = vmatpush3.bf16.msra.mxu1 %v2080_v39 }
 0x224   : > { %1998 = vmatprep.subr.bf16.mxu1 %v2163_v3 }
 0x226   : > { %v2104_v44 = vpop.eup %2103 }
 0x227   : > { %v2106_v46 = vpop.eup %2105  ;;  %v1348_v47 = vpop.xlane.xlu0 %1347  ;;  %v1121_v31 = vsel %vm599_vm2, %v2104_v44, 0.0 }
 0x228   : > { %v2108_v33 = vpop.eup %2107  ;;  %v1352_v51 = vmax.f32 %v1342_v13, %v1348_v47  ;;  %1122 = vadd.xlane.f32.xlu1 %v1121_v31  ;;  %v1127_v53 = vsel %vm606_vm3, %v2106_v46, 0.0 }
 0x229   : > { %1128 = vadd.xlane.f32.xlu0 %v1127_v53  ;;  %1943 = vmatmul.mubr.msk.bf16.vlgmr.msra.gmra.mrb[12].mxu0 %vm606_vm3, %v890_v48  ;;  %v1124_v61 = vsel %vm599_vm2, %v2108_v33, 0.0  ;;  %v2110_v62 = vpop.eup %2109  ;;  %v1136_v6 = vpack.c.bf16 %v2108_v33, %v2104_v44 }
 0x22a   : > { %v1354_v54 = vsub.f32 %v2385_v23, %v1352_v51  ;;  %v1360_v40 = vsub.f32 %v2395_v37, %v1352_v51  ;;  %1959 = vmatpush3.bf16.msra.mxu0 %v1138_v49  ;;  %1960 = vmatprep.mubr.msk.bf16.mxu0 %vm2164_vm0, %v2163_v3  ;;  %v1130_v4 = vsel %vm606_vm3, %v2110_v62, 0.0  ;;  %v1135_v43 = vpack.c.bf16 %v2110_v62, %v2106_v46  ;;  %v2081_v51 = vld [vmem:[%s2578_s4 + $0x10] sm:$0xff]  }
 0x22b   : > { %v1351_v36 = vpop.xlane.xlu0 %1350  ;;  %1964 = vmatprep.subr.bf16.mxu0 %v2163_v3  ;;  %1999 = vmatpush3.bf16.msra.mxu1 %v2081_v51 }
 0x22c   : > { %v1356_v63 = vmul.f32 1.442695, %v1354_v54  ;;  %v1362_v0 = vmul.f32 1.442695, %v1360_v40  ;;  %v1353_v1 = vmax.f32 %v1345_v24, %v1351_v36  ;;  %1125 = vadd.xlane.f32.xlu1 %v1124_v61  ;;  %v2082_v54 = vld [vmem:[%s2578_s4 + $0x18] sm:$0xff]   ;;  %2000 = vmatprep.subr.bf16.mxu1 %v2163_v3 }
 0x22e   : > { %2111 = vpow2.f32 %v1356_v63  ;;  %v1355_v23 = vsub.f32 %v2390_v27, %v1353_v1  ;;  %v1361_v37 = vsub.f32 %v2397_v45, %v1353_v1  ;;  %v2083_v1 = vld [vmem:[%s2578_s4 + $0x20] sm:$0xff]  }
 0x22f   : > { %2113 = vpow2.f32 %v1362_v0  ;;  %v1383_v15 = vpop.permute.xlu0 %1382  ;;  %2001 = vmatpush3.bf16.msra.mxu1 %v2082_v54 }
 0x230   : > { %v1358_v9 = vmul.f32 1.442695, %v1355_v23  ;;  %v1364_v11 = vmul.f32 1.442695, %v1361_v37  ;;  %1131 = vadd.xlane.f32.xlu1 %v1130_v4  ;;  %2002 = vmatprep.subr.bf16.mxu1 %v2163_v3 }
 0x231   : > { %1961 = vmatmul.mubr.msk.bf16.vlgmr.msra.gmra.mrb[16].mxu0 %vm599_vm2, %v1136_v6 }
 0x232   : > { %2115 = vpow2.f32 %v1358_v9  ;;  %1965 = vmatpush3.bf16.msra.mxu0 %v1188_v8  ;;  %1966 = vmatprep.mubr.msk.bf16.mxu0 %vm2164_vm0, %v2163_v3  ;;  %v2084_v9 = vld [vmem:[%s2578_s4 + $0x28] sm:$0xff]  }
 0x233   : > { %1982 = vmatprep.subr.bf16.mxu0 %v2163_v3  ;;  %2117 = vpow2.f32 %v1364_v11  ;;  %2003 = vmatpush3.bf16.msra.mxu1 %v2083_v1 }
 0x234   : > { %2004 = vmatprep.subr.bf16.mxu1 %v2163_v3 }
 0x237   : > { %2005 = vmatpush3.bf16.msra.mxu1 %v2084_v9 }
 0x238   : > { %v2112_v27 = vpop.eup %2111  ;;  %2006 = vmatprep.subr.bf16.mxu1 %v2163_v3 }
 0x239   : > { %v1366_v45 = vsel %vm599_vm2, %v2112_v27, 0.0  ;;  %v2114_v12 = vpop.eup %2113 }
 0x23a   : > { %1367 = vadd.xlane.f32.xlu0 %v1366_v45  ;;  %v1372_v16 = vsel %vm606_vm3, %v2114_v12, 0.0  ;;  %v2085_v45 = vld [vmem:[%s2578_s4 + $0x30] sm:$0xff]  }
 0x23b   : > { %2007 = vmatpush3.bf16.msra.mxu1 %v2085_v45 }
 0x23c   : > { %v2116_v14 = vpop.eup %2115  ;;  %2008 = vmatprep.subr.bf16.mxu1 %v2163_v3 }
 0x23d   : > { %1967 = vmatmul.mubr.msk.bf16.vlgmr.msra.gmra.mrb[16].mxu0 %vm606_vm3, %v1135_v43  ;;  %v1369_v17 = vsel %vm599_vm2, %v2116_v14, 0.0  ;;  %v2118_v18 = vpop.eup %2117  ;;  %v1381_v20 = vpack.c.bf16 %v2116_v14, %v2112_v27 }
 0x23e   : > { %1373 = vadd.xlane.f32.xlu0 %v1372_v16  ;;  %1370 = vadd.xlane.f32.xlu1 %v1369_v17  ;;  %v1375_v19 = vsel %vm606_vm3, %v2118_v18, 0.0  ;;  %v1380_v58 = vpack.c.bf16 %v2118_v18, %v2114_v12  ;;  %v2086_v12 = vld [vmem:[%s2578_s4 + $0x38] sm:$0xff]  }
 0x23f   : > { %1983 = vmatpush3.bf16.msra.mxu0 %v1383_v15  ;;  %1984 = vmatprep.mubr.msk.bf16.mxu0 %vm2164_vm0, %v2163_v3 }
 0x240   : > { %1988 = vmatprep.subr.bf16.mxu0 %v2163_v3  ;;  %2009 = vmatpush3.bf16.msra.mxu1 %v2086_v12 }
 0x242   : > { %628 = vadd.xlane.f32.xlu0 %v627_v50  ;;  %1376 = vadd.xlane.f32.xlu1 %v1375_v19 }
 0x245   : > { %1985 = vmatmul.mubr.msk.bf16.vlgmr.msra.gmra.mrb[20].mxu0 %vm599_vm2, %v1381_v20 }
 0x246   : > { %634 = vadd.xlane.f32.xlu0 %v633_v22  ;;  %631 = vadd.xlane.f32.xlu1 %v630_v52 }
 0x247   : > { %1989 = vmatpush3.bf16.msra.mxu0 %v1433_v21  ;;  %1990 = vmatprep.mubr.msk.bf16.mxu0 %vm2164_vm0, %v2163_v3 }
 0x24a   : > { %637 = vadd.xlane.f32.xlu1 %v636_v56 }
 0x251   : > { %1991 = vmatmul.mubr.msk.bf16.vlgmr.msra.gmra.mrb[20].mxu0 %vm606_vm3, %v1380_v58 }
 0x289   : > { %v2499_v25 = vpop.f32.mrb[8].mxu0 }
 0x28a   : > { %v1920_v26 = vpop.f32.mrb[9].mxu0 }
 0x28b   : > { %v2501_v60 = vpop.f32.mrb[10].mxu0 }
 0x28c   : > { %v1921_v28 = vpop.f32.mrb[11].mxu0 }
 0x2a5   : > { %v878_v57 = vpop.xlane.xlu1 %877 }
 0x2a7   : > { %v881_v32 = vpop.xlane.xlu0 %880 }
 0x2a9   : > { %v884_v29 = vpop.xlane.xlu1 %883 }
 0x2aa   : > { %v888_v34 = vadd.f32 %v884_v29, %v878_v57 }
 0x2ac   : > { %2119 = vrcp.f32 %v888_v34 }
 0x2ad   : > { %v887_v30 = vpop.xlane.xlu1 %886 }
 0x2ae   : > { %v889_v35 = vadd.f32 %v887_v30, %v881_v32 }
 0x2b0   : > { %2121 = vrcp.f32 %v889_v35 }
 0x2b5   : > { %v1123_v38 = vpop.xlane.xlu1 %1122 }
 0x2b6   : > { %v2120_v41 = vpop.eup %2119  ;;  %v1129_v47 = vpop.xlane.xlu0 %1128 }
 0x2b7   : > { %v1133_v49 = vadd.f32 %v1129_v47, %v1123_v38 }
 0x2b9   : > { %v1126_v5 = vpop.xlane.xlu1 %1125  ;;  %2123 = vrcp.f32 %v1133_v49 }
 0x2ba   : > { %v2122_v13 = vpop.eup %2121 }
 0x2bd   : > { %v1132_v31 = vpop.xlane.xlu1 %1131 }
 0x2be   : > { %v1134_v33 = vadd.f32 %v1132_v31, %v1126_v5 }
 0x2c0   : > { %2125 = vrcp.f32 %v1134_v33 }
 0x2c3   : > { %v2124_v61 = vpop.eup %2123 }
 0x2c7   : > { %v1368_v53 = vpop.xlane.xlu0 %1367 }
 0x2ca   : > { %v2126_v63 = vpop.eup %2125 }
 0x2cb   : > { %v1371_v40 = vpop.xlane.xlu1 %1370  ;;  %v1374_v4 = vpop.xlane.xlu0 %1373 }
 0x2cc   : > { %v1378_v11 = vadd.f32 %v1374_v4, %v1368_v53 }
 0x2ce   : > { %2127 = vrcp.f32 %v1378_v11 }
 0x2cf   : > { %v1377_v6 = vpop.xlane.xlu1 %1376  ;;  %v629_v20 = vpop.xlane.xlu0 %628 }
 0x2d0   : > { %v1379_v27 = vadd.f32 %v1377_v6, %v1371_v40 }
 0x2d2   : > { %2129 = vrcp.f32 %v1379_v27 }
 0x2d3   : > { %v632_v21 = vpop.xlane.xlu1 %631  ;;  %v635_v22 = vpop.xlane.xlu0 %634 }
 0x2d4   : > { %v639_v52 = vadd.f32 %v635_v22, %v629_v20 }
 0x2d6   : > { %2131 = vrcp.f32 %v639_v52 }
 0x2d7   : > { %v638_v3 = vpop.xlane.xlu1 %637 }
 0x2d8   : > { %v2128_v14 = vpop.eup %2127  ;;  %v640_v56 = vadd.f32 %v638_v3, %v632_v21 }
 0x2da   : > { %2133 = vrcp.f32 %v640_v56 }
 0x2dc   : > { %v2130_v16 = vpop.eup %2129 }
 0x2e0   : > { %v2132_v26 = vpop.eup %2131 }
 0x2e1   : > { %v743_v35 = vmul.f32 %v2132_v26, %v2499_v25  ;;  %v1531_v25 = vlaneseq }
 0x2e4   : > { %v2134_v57 = vpop.eup %2133 }
 0x2e5   : > { %v744_v38 = vmul.f32 %v2134_v57, %v2501_v60  ;;  %v1532_v60 = vshrl.u32 %v1531_v25, 7 }
 0x2e7   : > { %v1533_v31 = vsub.s32 0, %v1532_v60 }
 0x2fc   : > { %v979_v10 = vpop.f32.mrb[12].mxu0 }
 0x2fd   : > { %v1944_v7 = vpop.f32.mrb[13].mxu0  ;;  %v988_v24 = vmul.f32 %v2120_v41, %v979_v10 }
 0x2fe   : > { %v982_v42 = vpop.f32.mrb[14].mxu0 }
 0x2ff   : > { %v989_v44 = vmul.f32 %v2122_v13, %v982_v42  ;;  %v1945_v46 = vpop.f32.mrb[15].mxu0 }
 0x300   : > { %v1529_v46 = vld [vmem:[%s2579_s5] sm:$0x1] }
 0x301   : > { %v2061_v48 = vpack.i.bf16 %v989_v44, %v988_v24  ;;  %v1530_v47 = vunpack.c.l.bf16 %v1529_v46 }
 0x303   : > { %2062 = vrot.lane.b32.xlu0 %v2061_v48, %s2167_s17  ;;  %v1534_v49 = vrot.slane %v1530_v47, %v1533_v31 }
 0x310   : > { %v1224_v36 = vpop.f32.mrb[16].mxu0 }
 0x311   : > { %v1968_v62 = vpop.f32.mrb[17].mxu0  ;;  %v1233_v2 = vmul.f32 %v2124_v61, %v1224_v36 }
 0x312   : > { %v1227_v0 = vpop.f32.mrb[18].mxu0 }
 0x313   : > { %v1234_v23 = vmul.f32 %v2126_v63, %v1227_v0  ;;  %v1969_v37 = vpop.f32.mrb[19].mxu0 }
 0x315   : > { %v2066_v8 = vpack.i.bf16 %v1234_v23, %v1233_v2 }
 0x317   : > { %2067 = vrot.lane.b32.xlu1 %v2066_v8, %s2166_s30 }
 0x324   : > { %v1469_v43 = vpop.f32.mrb[20].mxu0 }
 0x325   : > { %v1992_v15 = vpop.f32.mrb[21].mxu0  ;;  %v1478_v18 = vmul.f32 %v2128_v14, %v1469_v43 }
 0x326   : > { %v1472_v17 = vpop.f32.mrb[22].mxu0  ;;  %v1653_v15 = vld [vmem:[%s2581_s7] sm:$0x1] }
 0x327   : > { %v1479_v50 = vmul.f32 %v2130_v16, %v1472_v17  ;;  %v1993_v19 = vpop.f32.mrb[23].mxu0  ;;  %v1654_v16 = vunpack.c.l.bf16 %v1653_v15  ;;  %v1661_v17 = vld [vmem:[%s2582_s8] sm:$0x1] }
 0x328   : > { %v1662_v19 = vunpack.c.l.bf16 %v1661_v17 }
 0x329   : > { %v2071_v55 = vpack.i.bf16 %v1479_v50, %v1478_v18  ;;  %v1658_v50 = vrot.slane %v1654_v16, %v1533_v31 }
 0x32a   : > { %v1666_v21 = vrot.slane %v1662_v19, %v1533_v31 }
 0x32b   : > { %2072 = vrot.lane.b32.xlu1 %v2071_v55, %s2165_s28  ;;  %s1797_s28 = sshll.u32 %s2231_s12, 1 }
 0x32c   : > { %p462_p9 = scmp.lt.s32.totalorder %s1797_s28, 3 }
 0x32e   : > { %s2588_s28 = smov (!%p462_p9, %s1797_s28), 3 }
 0x32f   : > { %s1798_s26 = sshll.u32 %s2588_s28, 2 }
 0x330   : > { %s465_s11 = scalar_lea.vmem %s2580_s6, %s1798_s26  ;;  %s471_s20 = scalar_lea.vmem %s2583_s9, %s1798_s26 }
 0x331   : > { %v1849_v48 = vld [vmem:[%s465_s11] sm:$0xff]  }
 0x332   : > { %v1850_v33 = vunpack.c.l.bf16 %v1849_v48  ;;  %v1851_v40 = vunpack.c.h.bf16 %v1849_v48 }
 0x375   : > { %v2063_v58 = vpop.permute.xlu0 %2062 }
 0x376   : > { %v2065_v29 = vunpack.i.h.bf16 %v2063_v58  ;;  %v2064_v30 = vunpack.i.l.bf16 %v2063_v58 }
 0x378   : > { %v1505_v39 = vsel %vm495_vm1, %v744_v38, %v2065_v29  ;;  %v1504_v5 = vsel %vm495_vm1, %v743_v35, %v2064_v30 }
 0x389   : > { %v2068_v28 = vpop.permute.xlu1 %2067 }
 0x38a   : > { %v2070_v32 = vunpack.i.h.bf16 %v2068_v28  ;;  %v2069_v34 = vunpack.i.l.bf16 %v2068_v28 }
 0x38c   : > { %v1508_v7 = vsel %vm1506_vm5, %v1505_v39, %v2070_v32  ;;  %v1507_v13 = vsel %vm1506_vm5, %v1504_v5, %v2069_v34 }
 0x39d   : > { %v2073_v59 = vpop.permute.xlu1 %2072 }
 0x39e   : > { %v2075_v10 = vunpack.i.h.bf16 %v2073_v59  ;;  %v2074_v41 = vunpack.i.l.bf16 %v2073_v59 }
 0x3a0   : > { %v1511_v42 = vsel %vm1509_vm6, %v1508_v7, %v2075_v10  ;;  %v1510_v24 = vsel %vm1509_vm6, %v1507_v13, %v2074_v41 }
 0x3a1   : > { %v1512_v44 = vpack.c.bf16 %v1511_v42, %v1510_v24 }
 0x3a3   : > { %2011 = vmatmul.mubr.bf16.vlgmr.msra.gmra.mrb[24].mxu1 %v1512_v44 }
 0x476   : > { %v1617_v51 = vpop.f32.mrb[24].mxu1 }
 0x477   : > { %v1618_v53 = vadd.f32 %v1617_v51, %v1534_v49  ;;  %v2012_v54 = vpop.f32.mrb[25].mxu1 }
 0x478   : > { %v1620_v36 = vpop.f32.mrb[26].mxu1 }
 0x479   : > { %v1621_v61 = vadd.f32 %v1620_v36, %v1534_v49  ;;  %v2013_v62 = vpop.f32.mrb[27].mxu1  ;;  %v1628_v63 = vadd.f32 %v1850_v33, %v1618_v53 }
 0x47b   : > { %1630 = vadd.xlane.f32.xlu0 %v1628_v63  ;;  %v1629_v0 = vadd.f32 %v1851_v40, %v1621_v61 }
 0x47d   : > { %1632 = vadd.xlane.f32.xlu1 %v1629_v0 }
 0x508   : > { %v1631_v1 = vpop.xlane.xlu0 %1630 }
 0x509   : > { %v1635_v2 = vmul.f32 0.0078125, %v1631_v1 }
 0x50a   : > { %v1633_v23 = vpop.xlane.xlu1 %1632 }
 0x50b   : > { %v1637_v37 = vsub.f32 %v1628_v63, %v1635_v2  ;;  %v1636_v4 = vmul.f32 0.0078125, %v1633_v23 }
 0x50d   : > { %v1638_v6 = vsub.f32 %v1629_v0, %v1636_v4  ;;  %v1639_v8 = vmul.f32 %v1637_v37, %v1637_v37 }
 0x50f   : > { %1641 = vadd.xlane.f32.xlu0 %v1639_v8  ;;  %v1640_v9 = vmul.f32 %v1638_v6, %v1638_v6 }
 0x513   : > { %1643 = vadd.xlane.f32.xlu0 %v1640_v9 }
 0x59c   : > { %v1642_v11 = vpop.xlane.xlu0 %1641 }
 0x59d   : > { %v1645_v27 = vmul.f32 0.0078125, %v1642_v11 }
 0x59f   : > { %v1647_v45 = vadd.f32 1e-05, %v1645_v27 }
 0x5a0   : > { %v1644_v12 = vpop.xlane.xlu0 %1643 }
 0x5a1   : > { %2135 = vrsqrt.f32 %v1647_v45  ;;  %v1646_v43 = vmul.f32 0.0078125, %v1644_v12 }
 0x5a3   : > { %v1648_v14 = vadd.f32 1e-05, %v1646_v43 }
 0x5a5   : > { %2137 = vrsqrt.f32 %v1648_v14 }
 0x5ab   : > { %v2136_v18 = vpop.eup %2135 }
 0x5ac   : > { %v1651_v55 = vmul.f32 %v2136_v18, %v1637_v37 }
 0x5ae   : > { %v1659_v22 = vmul.f32 %v1658_v50, %v1651_v55 }
 0x5af   : > { %v2138_v20 = vpop.eup %2137 }
 0x5b0   : > { %v1652_v3 = vmul.f32 %v2138_v20, %v1638_v6  ;;  %v1667_v56 = vadd.f32 %v1666_v21, %v1659_v22 }
 0x5b2   : > { %v1660_v52 = vmul.f32 %v1658_v50, %v1652_v3 }
 0x5b4   : > { %v1668_v58 = vadd.f32 %v1666_v21, %v1660_v52 }
 0x5b6   : > { %v1855_v26 = vpack.c.bf16 %v1668_v58, %v1667_v56 }
 0x5b8   : > { %1856 = vst [vmem:[%s471_s20] sm:$0xff] %v1855_v26  }
 0x5b9 PF: > { %p16_p10 = scmp.ge.s32.totalorder %s2233_s13, 4   ;;  %s2584_s30 = smov %s2157_s10 }
 0x5ba   : > { %s2585_s10 = smov %s2240_s16  ;;  %s2586_s11 = smov %s2233_s13 }
 0x5bb   :  { %18 = sbr.rel (!%p16_p10) target bundleno = 2 (0x2), region = 152 }

</bundles_post_ra>
